<compile_context>
chip_gen: v7x
topology: tpu7x:2x2x1
jax: 0.10.0
libtpu: 0.0.40
codegen_flags: <defaults>
</compile_context>

<pallas_src>
import numpy as np
import jax
import jax.numpy as jnp
from jax import lax
from jax.experimental import pallas as pl
from jax.experimental.pallas import tpu as pltpu

# ----------------------------- model hyper-parameters -----------------------------
VOCAB = 24          # num_embeddings
EMB_DIM = 32        # embedding_dim (small variant of the module default 64)
NUM_FILTERS = 10    # num_filters
HIDDEN = 16         # hidden_dim
K1, K2, K3 = 10, 8, 5
B = 2               # batch per branch
SEQ_LEN = 64        # protein sequence length
NB = 2 * B          # both branches folded into one flat batch

# derived temporal sizes (Conv1d / MaxPool1d(2) semantics)
L1 = SEQ_LEN - K1 + 1   # 55
P1 = L1 // 2            # 27
L2 = P1 - K2 + 1        # 20
P2 = L2 // 2            # 10
L3 = P2 - K3 + 1        # 6
P3 = L3 // 2            # 3   -> LSTM time steps
T_STRIDE = 8            # 8-aligned row stride per LSTM time step in the time-major layout


def _align8(n):
    return ((n + 7) // 8) * 8


# flat (rows) sizes of the activations flowing through the kernel (all multiples of 8)
N0 = NB * SEQ_LEN           # 256  rows into conv1   (stride SEQ_LEN per sample)
N1 = _align8(NB * P1)       # 112  rows into conv2   (stride P1 per sample + 4 zero pad rows)
N2 = NB * P2                # 40   rows into conv3   (stride P2 per sample)
N3 = P3 * T_STRIDE          # 24   time-major LSTM-input rows (4 valid per step of 8)

# ----------------------------- packed weight-slab row offsets (all multiples of 8) -----------
R_EMB = 0
R_W1 = R_EMB + _align8(VOCAB)          # 24   ; taps at R_W1 + kk*W1_STRIDE, each (EMB_DIM, F)
W1_STRIDE = _align8(EMB_DIM)           # 32
R_B1 = R_W1 + K1 * W1_STRIDE           # 344
R_W2 = R_B1 + 8                        # 352  ; taps at R_W2 + kk*W23_STRIDE, each (F, F)
W23_STRIDE = _align8(NUM_FILTERS)      # 16
R_B2 = R_W2 + K2 * W23_STRIDE          # 480
R_W3 = R_B2 + 8                        # 488
R_B3 = R_W3 + K3 * W23_STRIDE          # 568
R_WIH = R_B3 + 8                       # 576  ; (F, 4H)
R_WHH = R_WIH + _align8(NUM_FILTERS)   # 592  ; (H, 4H)
R_BL = R_WHH + _align8(HIDDEN)         # 608  ; (1, 4H)
WSLAB_ROWS = R_BL + 8                  # 616
WSLAB_COLS = 4 * HIDDEN                # 64

# selector-target vector row offsets
R_S1 = 0
R_S2 = R_S1 + N1                       # 112
R_S3 = R_S2 + N2                       # 152
SELTGT_ROWS = R_S3 + N3                # 176

# advisory cost estimate for XLA scheduling around the custom call
_KERNEL_FLOPS = 2 * (N0 * VOCAB * EMB_DIM
                     + K1 * N0 * EMB_DIM * NUM_FILTERS + N1 * N0 * NUM_FILTERS
                     + K2 * N1 * NUM_FILTERS * NUM_FILTERS + N2 * N1 * NUM_FILTERS
                     + K3 * N2 * NUM_FILTERS * NUM_FILTERS + N3 * N2 * NUM_FILTERS
                     + N3 * NUM_FILTERS * 4 * HIDDEN + P3 * NB * HIDDEN * 4 * HIDDEN)
_KERNEL_TRANS = P3 * NB * 5 * HIDDEN
_KERNEL_BYTES = 4 * (N0 + WSLAB_ROWS * WSLAB_COLS + SELTGT_ROWS + NB * HIDDEN)


# ----------------------------- host-side constant construction -----------------------------
def _build_seltgt():
    """Per pooled-output-row target column into the pairwise-max array (-1 => zero padding row).

    Pool1/Pool2 outputs are batch-major (stride P1 / P2 per sample); Pool3 output is time-major
    with an 8-row stride per time step so the LSTM step slices start at 8-aligned offsets."""
    tgt = np.full((SELTGT_ROWS, 1), -1, np.int32)
    for b in range(NB):
        for p in range(P1):
            tgt[R_S1 + b * P1 + p, 0] = b * SEQ_LEN + 2 * p
    for b in range(NB):
        for p in range(P2):
            tgt[R_S2 + b * P2 + p, 0] = b * P1 + 2 * p
    for t in range(P3):
        for b in range(NB):
            tgt[R_S3 + t * T_STRIDE + b, 0] = b * P2 + 2 * t
    return np.asarray(tgt)


_SELTGT_NP = _build_seltgt()


def pack_weight_slab(p):
    """Pack every weight/bias into one (WSLAB_ROWS, 64) f32 slab at 8-aligned row offsets."""
    W = np.zeros((WSLAB_ROWS, WSLAB_COLS), np.float32)
    W[R_EMB:R_EMB + VOCAB, :EMB_DIM] = np.asarray(p["emb"])
    for kk in range(K1):
        r = R_W1 + kk * W1_STRIDE
        W[r:r + EMB_DIM, :NUM_FILTERS] = np.asarray(p["w1"][kk])
    W[R_B1, :NUM_FILTERS] = np.asarray(p["b1"]).reshape(-1)
    for kk in range(K2):
        r = R_W2 + kk * W23_STRIDE
        W[r:r + NUM_FILTERS, :NUM_FILTERS] = np.asarray(p["w2"][kk])
    W[R_B2, :NUM_FILTERS] = np.asarray(p["b2"]).reshape(-1)
    for kk in range(K3):
        r = R_W3 + kk * W23_STRIDE
        W[r:r + NUM_FILTERS, :NUM_FILTERS] = np.asarray(p["w3"][kk])
    W[R_B3, :NUM_FILTERS] = np.asarray(p["b3"]).reshape(-1)
    W[R_WIH:R_WIH + NUM_FILTERS, :4 * HIDDEN] = np.asarray(p["wih"])
    W[R_WHH:R_WHH + HIDDEN, :4 * HIDDEN] = np.asarray(p["whh"])
    W[R_BL, :4 * HIDDEN] = np.asarray(p["blstm"]).reshape(-1)
    return jnp.asarray(W)


# ----------------------------- in-kernel helpers -----------------------------
def _shift_rows(x, k):
    """result[r] = x[r + k] (rows that wrap land in the never-selected garbage region).
    Uses an XLU sublane rotation instead of an unaligned value slice (no relayout copy)."""
    if k == 0:
        return x
    return pltpu.roll(x, x.shape[0] - k, axis=0)


def _conv_relu_pool(x, w_ref, w_row, w_stride, k, cin, b_row, tgt_ref, t_row, out_rows):
    """Flat Conv1d (+bias) -> ReLU -> MaxPool1d(2) with boundary-garbage rows dropped.

    x       : (N, cin) flat activations, batch-major (rows straddling a sample boundary are
              garbage and are never selected by the pooling selector).
    w_ref   : weight slab; tap kk lives at rows [w_row + kk*w_stride, +cin), cols [0, F).
    tgt_ref : int32 selector targets; rows [t_row, t_row+out_rows) give, per pooled output row,
              which pairwise-max row to pick (-1 => emit a zero padding row).
    Returns (out_rows, NUM_FILTERS)."""
    n = x.shape[0]
    # accumulator initialized from tap 0 with the bias folded in (no zero-fill)
    y = jnp.dot(x, w_ref[w_row:w_row + cin, 0:NUM_FILTERS],
                preferred_element_type=jnp.float32) + w_ref[b_row:b_row + 1, 0:NUM_FILTERS]
    for kk in range(1, k):                     # static unroll; one full-height MXU matmul per tap
        y = y + jnp.dot(_shift_rows(x, kk),
                        w_ref[w_row + kk * w_stride:w_row + kk * w_stride + cin, 0:NUM_FILTERS],
                        preferred_element_type=jnp.float32)
    y = jnp.maximum(y, 0.0)                    # ReLU
    pm = jnp.maximum(y, _shift_rows(y, 1))     # pm[r] = max(y[r], y[r+1])  (MaxPool1d(2) halves)
    # rebuild the 0/1 selector in-kernel from the target vector (one iota + compare)
    tgt = tgt_ref[t_row:t_row + out_rows, :]
    sel = (lax.broadcasted_iota(jnp.int32, (out_rows, n), 1) == tgt).astype(jnp.float32)
    return jnp.dot(sel, pm, preferred_element_type=jnp.float32)


# ----------------------------- the Pallas kernel -----------------------------
def dnn_ppi_kernel(ids_ref, w_ref, tgt_ref, h_out_ref):
    # Embedding as a one-hot matmul: (2B*L, VOCAB) @ (VOCAB, E).  Row 0 of the table is zero
    # (padding_idx=0), so padding tokens embed to zero exactly like nn.Embedding.
    onehot = (lax.broadcasted_iota(jnp.int32, (N0, VOCAB), 1)
              == ids_ref[...]).astype(jnp.float32)
    x = jnp.dot(onehot, w_ref[R_EMB:R_EMB + VOCAB, 0:EMB_DIM],
                preferred_element_type=jnp.float32)                               # (256, 32)

    x = _conv_relu_pool(x, w_ref, R_W1, W1_STRIDE, K1, EMB_DIM, R_B1,
                        tgt_ref, R_S1, N1)                                        # (112, F)
    x = _conv_relu_pool(x, w_ref, R_W2, W23_STRIDE, K2, NUM_FILTERS, R_B2,
                        tgt_ref, R_S2, N2)                                        # (40, F)
    x = _conv_relu_pool(x, w_ref, R_W3, W23_STRIDE, K3, NUM_FILTERS, R_B3,
                        tgt_ref, R_S3, N3)                                        # (24, F) time-major

    # LSTM over P3 steps (gate order i, f, g, o as in PyTorch); the input-gate contribution for
    # all steps of all 2B sequences is ONE (24, F) @ (F, 4H) matmul.
    gx = jnp.dot(x, w_ref[R_WIH:R_WIH + NUM_FILTERS, 0:4 * HIDDEN],
                 preferred_element_type=jnp.float32) + w_ref[R_BL:R_BL + 1, 0:4 * HIDDEN]
    whh = w_ref[R_WHH:R_WHH + HIDDEN, 0:4 * HIDDEN]
    h = jnp.zeros((NB, HIDDEN), jnp.float32)
    c = jnp.zeros((NB, HIDDEN), jnp.float32)
    for t in range(P3):                        # static unroll, T = 3
        g = gx[t * T_STRIDE:t * T_STRIDE + NB, :] + jnp.dot(
            h, whh, preferred_element_type=jnp.float32)
        i = jax.nn.sigmoid(g[:, 0:HIDDEN])
        f = jax.nn.sigmoid(g[:, HIDDEN:2 * HIDDEN])
        gg = jnp.tanh(g[:, 2 * HIDDEN:3 * HIDDEN])
        o = jax.nn.sigmoid(g[:, 3 * HIDDEN:4 * HIDDEN])
        c = f * c + i * gg
        h = o * jnp.tanh(c)
    h_out_ref[...] = h                         # (2B, H): rows [0,B) = branch 1, [B,2B) = branch 2


# ----------------------------- wrapper (glue) -----------------------------
def dnn_ppi_forward(seq1, seq2, params):
    # fold both branches into one flat (2B*L, 1) id column (batch-major, stride SEQ_LEN)
    ids = jnp.concatenate([seq1, seq2], axis=0).astype(jnp.int32).reshape(N0, 1)
    seltgt = jnp.asarray(_SELTGT_NP)

    h = pl.pallas_call(
        dnn_ppi_kernel,
        out_shape=jax.ShapeDtypeStruct((NB, HIDDEN), jnp.float32),
        grid=(1,),                                                   # single program, no tiling
        in_specs=[pl.BlockSpec((N0, 1), lambda i: (0, 0)),
                  pl.BlockSpec((WSLAB_ROWS, WSLAB_COLS), lambda i: (0, 0)),
                  pl.BlockSpec((SELTGT_ROWS, 1), lambda i: (0, 0))],
        out_specs=pl.BlockSpec((NB, HIDDEN), lambda i: (0, 0)),
        cost_estimate=pl.CostEstimate(flops=_KERNEL_FLOPS,
                                      transcendentals=_KERNEL_TRANS,
                                      bytes_accessed=_KERNEL_BYTES),
    )(ids, params["wslab"], seltgt)

    # fc on concat([h1, h2]) == h1 @ Wfc[:, :H].T + h2 @ Wfc[:, H:].T + b   (tiny, fused under jit)
    out = (jnp.dot(h[0:B], params["wfc1"], precision=lax.Precision.HIGHEST)
           + jnp.dot(h[B:NB], params["wfc2"], precision=lax.Precision.HIGHEST)
           + params["bfc"])
    return out


# ----------------------------- pure-JAX reference (sanity check) -----------------------------
def reference_forward(seq1, seq2, params):
    hp = lax.Precision.HIGHEST

    def conv_relu_pool(x, w, b):            # x: (B, L, Cin), w: (K, Cin, Cout), b: (Cout,)
        k = w.shape[0]
        t = x.shape[1] - k + 1
        acc = jnp.zeros((x.shape[0], t, w.shape[2]), jnp.float32) + b[None, None, :]
        for kk in range(k):
            acc = acc + jnp.einsum("blc,cf->blf", x[:, kk:kk + t, :], w[kk], precision=hp)
        acc = jnp.maximum(acc, 0.0)
        p = t // 2
        return acc[:, :2 * p, :].reshape(x.shape[0], p, 2, -1).max(axis=2)

    def branch(seq):
        x = params["emb"][seq]              # (B, L, E)
        x = conv_relu_pool(x, params["w1"], params["b1"])
        x = conv_relu_pool(x, params["w2"], params["b2"])
        x = conv_relu_pool(x, params["w3"], params["b3"])
        nb, t, _ = x.shape
        h = jnp.zeros((nb, HIDDEN), jnp.float32)
        c = jnp.zeros((nb, HIDDEN), jnp.float32)
        for tt in range(t):
            g = (jnp.dot(x[:, tt, :], params["wih"], precision=hp)
                 + jnp.dot(h, params["whh"], precision=hp) + params["blstm"][None, :])
            i = jax.nn.sigmoid(g[:, :HIDDEN])
            f = jax.nn.sigmoid(g[:, HIDDEN:2 * HIDDEN])
            gg = jnp.tanh(g[:, 2 * HIDDEN:3 * HIDDEN])
            o = jax.nn.sigmoid(g[:, 3 * HIDDEN:])
            c = f * c + i * gg
            h = o * jnp.tanh(c)
        return h

    h1, h2 = branch(seq1), branch(seq2)
    return (jnp.dot(h1, params["wfc1"], precision=hp)
            + jnp.dot(h2, params["wfc2"], precision=hp) + params["bfc"])


# ----------------------------- deterministic parameter init -----------------------------
def init_params(key):
    ks = jax.random.split(key, 12)

    def nrm(k, shape, scale=0.1):
        return scale * jax.random.normal(k, shape, dtype=jnp.float32)

    # nn.Embedding(24, EMB_DIM, padding_idx=0)
    emb = nrm(ks[0], (VOCAB, EMB_DIM)).at[0].set(0.0)

    # Conv1d weights in PyTorch layout (Cout, Cin, K); biases (Cout,)
    w1_t = nrm(ks[1], (NUM_FILTERS, EMB_DIM, K1));      b1 = nrm(ks[2], (NUM_FILTERS,))
    w2_t = nrm(ks[3], (NUM_FILTERS, NUM_FILTERS, K2));  b2 = nrm(ks[4], (NUM_FILTERS,))
    w3_t = nrm(ks[5], (NUM_FILTERS, NUM_FILTERS, K3));  b3 = nrm(ks[6], (NUM_FILTERS,))

    # nn.LSTM(input_size=NUM_FILTERS, hidden_size=HIDDEN): weight_ih (4H,F), weight_hh (4H,H)
    wih_t = nrm(ks[7], (4 * HIDDEN, NUM_FILTERS))
    whh_t = nrm(ks[8], (4 * HIDDEN, HIDDEN))
    bih = nrm(ks[9], (4 * HIDDEN,))
    bhh = nrm(ks[10], (4 * HIDDEN,))

    # nn.Linear(2H, 1)
    wfc_t = nrm(ks[11], (1, 2 * HIDDEN))
    bfc = jnp.full((1,), 0.01, dtype=jnp.float32)

    params = {
        "emb": emb,
        # math layout: conv weights (K, Cin, Cout); biases (Cout,)
        "w1": jnp.transpose(w1_t, (2, 1, 0)), "b1": b1,
        "w2": jnp.transpose(w2_t, (2, 1, 0)), "b2": b2,
        "w3": jnp.transpose(w3_t, (2, 1, 0)), "b3": b3,
        # LSTM: x @ Wih^T -> (F, 4H); h @ Whh^T -> (H, 4H); combined bias (4H,)
        "wih": wih_t.T, "whh": whh_t.T, "blstm": bih + bhh,
        # fc split for the two concatenated halves: (H, 1) each
        "wfc1": wfc_t[:, :HIDDEN].T, "wfc2": wfc_t[:, HIDDEN:].T,
        "bfc": bfc.reshape(1, 1),
    }
    params["wslab"] = pack_weight_slab(params)      # single packed kernel operand
    return params


if __name__ == "__main__":
    key = jax.random.PRNGKey(0)
    kp, k1, k2 = jax.random.split(key, 3)
    params = init_params(kp)
    seq1 = jax.random.randint(k1, (B, SEQ_LEN), 0, VOCAB, dtype=jnp.int32)
    seq2 = jax.random.randint(k2, (B, SEQ_LEN), 0, VOCAB, dtype=jnp.int32)

    fwd = jax.jit(dnn_ppi_forward)
    out = jax.block_until_ready(fwd(seq1, seq2, params))

    assert out.shape == (B, 1), out.shape
    assert bool(jnp.all(jnp.isfinite(out)))

    ref = jax.block_until_ready(jax.jit(reference_forward)(seq1, seq2, params))
    err = float(jnp.max(jnp.abs(out - ref)))
    assert err < 1e-4, err      # all-f32 path: tight tolerance so indexing/layout bugs can't hide

    print("KERNEL_OK")
</pallas_src>

<mosaic_0001>
module attributes {stable_mosaic.version = 11 : i64} {
  func.func @dnn_ppi_kernel(%arg0: i32, %arg1: memref<256x1xi32, #tpu.memory_space<vmem>>, %arg2: memref<616x64xf32, #tpu.memory_space<vmem>>, %arg3: memref<176x1xi32, #tpu.memory_space<vmem>>, %arg4: memref<4x16xf32, #tpu.memory_space<vmem>>) attributes {dimension_semantics = [#tpu.dimension_semantics<arbitrary>], iteration_bounds = array<i64: 1>, scalar_prefetch = 0 : i64, scratch_operands = 0 : i64, tpu.core_type = #tpu.core_type<tc>, window_params = [{pipeline_mode = #tpu.pipeline_mode<synchronous>, transform_indices = @transform_0, window_bounds = array<i64: 256, 1>}, {pipeline_mode = #tpu.pipeline_mode<synchronous>, transform_indices = @transform_1, window_bounds = array<i64: 616, 64>}, {pipeline_mode = #tpu.pipeline_mode<synchronous>, transform_indices = @transform_2, window_bounds = array<i64: 176, 1>}, {pipeline_mode = #tpu.pipeline_mode<synchronous>, transform_indices = @transform_3, window_bounds = array<i64: 4, 16>}]} {
    %0 = tpu.iota {dimensions = array<i32: 1>} : vector<256x24xi32>
    %c0 = arith.constant 0 : index
    %c0_0 = arith.constant 0 : index
    %1 = vector.load %arg1[%c0, %c0_0] : memref<256x1xi32, #tpu.memory_space<vmem>>, vector<256x1xi32>
    %2 = vector.broadcast %1 : vector<256x1xi32> to vector<256x24xi32>
    %3 = arith.cmpi eq, %0, %2 : vector<256x24xi32>
    %4 = arith.extui %3 : vector<256x24xi1> to vector<256x24xi32>
    %5 = arith.sitofp %4 : vector<256x24xi32> to vector<256x24xf32>
    %c0_1 = arith.constant 0 : index
    %c0_2 = arith.constant 0 : index
    %6 = vector.load %arg2[%c0_1, %c0_2] : memref<616x64xf32, #tpu.memory_space<vmem>>, vector<24x32xf32>
    %cst = arith.constant dense<0.000000e+00> : vector<256x32xf32>
    %7 = tpu.matmul %5, %6, %cst {dimension_numbers = #tpu.dot_dimension_numbers<[1], [0], [0], [1], [0, 0, 1, 1], [], []>} : vector<256x24xf32>, vector<24x32xf32>, vector<256x32xf32> -> vector<256x32xf32>
    %c24 = arith.constant 24 : index
    %c0_3 = arith.constant 0 : index
    %8 = vector.load %arg2[%c24, %c0_3] : memref<616x64xf32, #tpu.memory_space<vmem>>, vector<32x10xf32>
    %cst_4 = arith.constant dense<0.000000e+00> : vector<256x10xf32>
    %9 = tpu.matmul %7, %8, %cst_4 {dimension_numbers = #tpu.dot_dimension_numbers<[1], [0], [0], [1], [0, 0, 1, 1], [], []>} : vector<256x32xf32>, vector<32x10xf32>, vector<256x10xf32> -> vector<256x10xf32>
    %c344 = arith.constant 344 : index
    %c0_5 = arith.constant 0 : index
    %10 = vector.load %arg2[%c344, %c0_5] : memref<616x64xf32, #tpu.memory_space<vmem>>, vector<1x10xf32>
    %11 = vector.broadcast %10 : vector<1x10xf32> to vector<256x10xf32>
    %12 = arith.addf %9, %11 : vector<256x10xf32>
    %c255_i32 = arith.constant 255 : i32
    %13 = tpu.dynamic_rotate %7 by %c255_i32 dim 0 : vector<256x32xf32>, i32 -> vector<256x32xf32>
    %c56 = arith.constant 56 : index
    %c0_6 = arith.constant 0 : index
    %14 = vector.load %arg2[%c56, %c0_6] : memref<616x64xf32, #tpu.memory_space<vmem>>, vector<32x10xf32>
    %cst_7 = arith.constant dense<0.000000e+00> : vector<256x10xf32>
    %15 = tpu.matmul %13, %14, %cst_7 {dimension_numbers = #tpu.dot_dimension_numbers<[1], [0], [0], [1], [0, 0, 1, 1], [], []>} : vector<256x32xf32>, vector<32x10xf32>, vector<256x10xf32> -> vector<256x10xf32>
    %16 = arith.addf %12, %15 : vector<256x10xf32>
    %c254_i32 = arith.constant 254 : i32
    %17 = tpu.dynamic_rotate %7 by %c254_i32 dim 0 : vector<256x32xf32>, i32 -> vector<256x32xf32>
    %c88 = arith.constant 88 : index
    %c0_8 = arith.constant 0 : index
    %18 = vector.load %arg2[%c88, %c0_8] : memref<616x64xf32, #tpu.memory_space<vmem>>, vector<32x10xf32>
    %cst_9 = arith.constant dense<0.000000e+00> : vector<256x10xf32>
    %19 = tpu.matmul %17, %18, %cst_9 {dimension_numbers = #tpu.dot_dimension_numbers<[1], [0], [0], [1], [0, 0, 1, 1], [], []>} : vector<256x32xf32>, vector<32x10xf32>, vector<256x10xf32> -> vector<256x10xf32>
    %20 = arith.addf %16, %19 : vector<256x10xf32>
    %c253_i32 = arith.constant 253 : i32
    %21 = tpu.dynamic_rotate %7 by %c253_i32 dim 0 : vector<256x32xf32>, i32 -> vector<256x32xf32>
    %c120 = arith.constant 120 : index
    %c0_10 = arith.constant 0 : index
    %22 = vector.load %arg2[%c120, %c0_10] : memref<616x64xf32, #tpu.memory_space<vmem>>, vector<32x10xf32>
    %cst_11 = arith.constant dense<0.000000e+00> : vector<256x10xf32>
    %23 = tpu.matmul %21, %22, %cst_11 {dimension_numbers = #tpu.dot_dimension_numbers<[1], [0], [0], [1], [0, 0, 1, 1], [], []>} : vector<256x32xf32>, vector<32x10xf32>, vector<256x10xf32> -> vector<256x10xf32>
    %24 = arith.addf %20, %23 : vector<256x10xf32>
    %c252_i32 = arith.constant 252 : i32
    %25 = tpu.dynamic_rotate %7 by %c252_i32 dim 0 : vector<256x32xf32>, i32 -> vector<256x32xf32>
    %c152 = arith.constant 152 : index
    %c0_12 = arith.constant 0 : index
    %26 = vector.load %arg2[%c152, %c0_12] : memref<616x64xf32, #tpu.memory_space<vmem>>, vector<32x10xf32>
    %cst_13 = arith.constant dense<0.000000e+00> : vector<256x10xf32>
    %27 = tpu.matmul %25, %26, %cst_13 {dimension_numbers = #tpu.dot_dimension_numbers<[1], [0], [0], [1], [0, 0, 1, 1], [], []>} : vector<256x32xf32>, vector<32x10xf32>, vector<256x10xf32> -> vector<256x10xf32>
    %28 = arith.addf %24, %27 : vector<256x10xf32>
    %c251_i32 = arith.constant 251 : i32
    %29 = tpu.dynamic_rotate %7 by %c251_i32 dim 0 : vector<256x32xf32>, i32 -> vector<256x32xf32>
    %c184 = arith.constant 184 : index
    %c0_14 = arith.constant 0 : index
    %30 = vector.load %arg2[%c184, %c0_14] : memref<616x64xf32, #tpu.memory_space<vmem>>, vector<32x10xf32>
    %cst_15 = arith.constant dense<0.000000e+00> : vector<256x10xf32>
    %31 = tpu.matmul %29, %30, %cst_15 {dimension_numbers = #tpu.dot_dimension_numbers<[1], [0], [0], [1], [0, 0, 1, 1], [], []>} : vector<256x32xf32>, vector<32x10xf32>, vector<256x10xf32> -> vector<256x10xf32>
    %32 = arith.addf %28, %31 : vector<256x10xf32>
    %c250_i32 = arith.constant 250 : i32
    %33 = tpu.dynamic_rotate %7 by %c250_i32 dim 0 : vector<256x32xf32>, i32 -> vector<256x32xf32>
    %c216 = arith.constant 216 : index
    %c0_16 = arith.constant 0 : index
    %34 = vector.load %arg2[%c216, %c0_16] : memref<616x64xf32, #tpu.memory_space<vmem>>, vector<32x10xf32>
    %cst_17 = arith.constant dense<0.000000e+00> : vector<256x10xf32>
    %35 = tpu.matmul %33, %34, %cst_17 {dimension_numbers = #tpu.dot_dimension_numbers<[1], [0], [0], [1], [0, 0, 1, 1], [], []>} : vector<256x32xf32>, vector<32x10xf32>, vector<256x10xf32> -> vector<256x10xf32>
    %36 = arith.addf %32, %35 : vector<256x10xf32>
    %c249_i32 = arith.constant 249 : i32
    %37 = tpu.dynamic_rotate %7 by %c249_i32 dim 0 : vector<256x32xf32>, i32 -> vector<256x32xf32>
    %c248 = arith.constant 248 : index
    %c0_18 = arith.constant 0 : index
    %38 = vector.load %arg2[%c248, %c0_18] : memref<616x64xf32, #tpu.memory_space<vmem>>, vector<32x10xf32>
    %cst_19 = arith.constant dense<0.000000e+00> : vector<256x10xf32>
    %39 = tpu.matmul %37, %38, %cst_19 {dimension_numbers = #tpu.dot_dimension_numbers<[1], [0], [0], [1], [0, 0, 1, 1], [], []>} : vector<256x32xf32>, vector<32x10xf32>, vector<256x10xf32> -> vector<256x10xf32>
    %40 = arith.addf %36, %39 : vector<256x10xf32>
    %c248_i32 = arith.constant 248 : i32
    %41 = tpu.dynamic_rotate %7 by %c248_i32 dim 0 : vector<256x32xf32>, i32 -> vector<256x32xf32>
    %c280 = arith.constant 280 : index
    %c0_20 = arith.constant 0 : index
    %42 = vector.load %arg2[%c280, %c0_20] : memref<616x64xf32, #tpu.memory_space<vmem>>, vector<32x10xf32>
    %cst_21 = arith.constant dense<0.000000e+00> : vector<256x10xf32>
    %43 = tpu.matmul %41, %42, %cst_21 {dimension_numbers = #tpu.dot_dimension_numbers<[1], [0], [0], [1], [0, 0, 1, 1], [], []>} : vector<256x32xf32>, vector<32x10xf32>, vector<256x10xf32> -> vector<256x10xf32>
    %44 = arith.addf %40, %43 : vector<256x10xf32>
    %c247_i32 = arith.constant 247 : i32
    %45 = tpu.dynamic_rotate %7 by %c247_i32 dim 0 : vector<256x32xf32>, i32 -> vector<256x32xf32>
    %c312 = arith.constant 312 : index
    %c0_22 = arith.constant 0 : index
    %46 = vector.load %arg2[%c312, %c0_22] : memref<616x64xf32, #tpu.memory_space<vmem>>, vector<32x10xf32>
    %cst_23 = arith.constant dense<0.000000e+00> : vector<256x10xf32>
    %47 = tpu.matmul %45, %46, %cst_23 {dimension_numbers = #tpu.dot_dimension_numbers<[1], [0], [0], [1], [0, 0, 1, 1], [], []>} : vector<256x32xf32>, vector<32x10xf32>, vector<256x10xf32> -> vector<256x10xf32>
    %48 = arith.addf %44, %47 : vector<256x10xf32>
    %cst_24 = arith.constant 0.000000e+00 : f32
    %49 = vector.broadcast %cst_24 : f32 to vector<256x10xf32>
    %50 = arith.maximumf %48, %49 : vector<256x10xf32>
    %c255_i32_25 = arith.constant 255 : i32
    %51 = tpu.dynamic_rotate %50 by %c255_i32_25 dim 0 : vector<256x10xf32>, i32 -> vector<256x10xf32>
    %52 = arith.maximumf %50, %51 : vector<256x10xf32>
    %c0_26 = arith.constant 0 : index
    %c0_27 = arith.constant 0 : index
    %53 = vector.load %arg3[%c0_26, %c0_27] : memref<176x1xi32, #tpu.memory_space<vmem>>, vector<112x1xi32>
    %54 = tpu.iota {dimensions = array<i32: 1>} : vector<112x256xi32>
    %55 = vector.broadcast %53 : vector<112x1xi32> to vector<112x256xi32>
    %56 = arith.cmpi eq, %54, %55 : vector<112x256xi32>
    %57 = arith.extui %56 : vector<112x256xi1> to vector<112x256xi32>
    %58 = arith.sitofp %57 : vector<112x256xi32> to vector<112x256xf32>
    %cst_28 = arith.constant dense<0.000000e+00> : vector<112x10xf32>
    %59 = tpu.matmul %58, %52, %cst_28 {dimension_numbers = #tpu.dot_dimension_numbers<[1], [0], [0], [1], [0, 0, 1, 1], [], []>} : vector<112x256xf32>, vector<256x10xf32>, vector<112x10xf32> -> vector<112x10xf32>
    %c352 = arith.constant 352 : index
    %c0_29 = arith.constant 0 : index
    %60 = vector.load %arg2[%c352, %c0_29] : memref<616x64xf32, #tpu.memory_space<vmem>>, vector<10x10xf32>
    %cst_30 = arith.constant dense<0.000000e+00> : vector<112x10xf32>
    %61 = tpu.matmul %59, %60, %cst_30 {dimension_numbers = #tpu.dot_dimension_numbers<[1], [0], [0], [1], [0, 0, 1, 1], [], []>} : vector<112x10xf32>, vector<10x10xf32>, vector<112x10xf32> -> vector<112x10xf32>
    %c480 = arith.constant 480 : index
    %c0_31 = arith.constant 0 : index
    %62 = vector.load %arg2[%c480, %c0_31] : memref<616x64xf32, #tpu.memory_space<vmem>>, vector<1x10xf32>
    %63 = vector.broadcast %62 : vector<1x10xf32> to vector<112x10xf32>
    %64 = arith.addf %61, %63 : vector<112x10xf32>
    %c111_i32 = arith.constant 111 : i32
    %65 = tpu.dynamic_rotate %59 by %c111_i32 dim 0 : vector<112x10xf32>, i32 -> vector<112x10xf32>
    %c368 = arith.constant 368 : index
    %c0_32 = arith.constant 0 : index
    %66 = vector.load %arg2[%c368, %c0_32] : memref<616x64xf32, #tpu.memory_space<vmem>>, vector<10x10xf32>
    %cst_33 = arith.constant dense<0.000000e+00> : vector<112x10xf32>
    %67 = tpu.matmul %65, %66, %cst_33 {dimension_numbers = #tpu.dot_dimension_numbers<[1], [0], [0], [1], [0, 0, 1, 1], [], []>} : vector<112x10xf32>, vector<10x10xf32>, vector<112x10xf32> -> vector<112x10xf32>
    %68 = arith.addf %64, %67 : vector<112x10xf32>
    %c110_i32 = arith.constant 110 : i32
    %69 = tpu.dynamic_rotate %59 by %c110_i32 dim 0 : vector<112x10xf32>, i32 -> vector<112x10xf32>
    %c384 = arith.constant 384 : index
    %c0_34 = arith.constant 0 : index
    %70 = vector.load %arg2[%c384, %c0_34] : memref<616x64xf32, #tpu.memory_space<vmem>>, vector<10x10xf32>
    %cst_35 = arith.constant dense<0.000000e+00> : vector<112x10xf32>
    %71 = tpu.matmul %69, %70, %cst_35 {dimension_numbers = #tpu.dot_dimension_numbers<[1], [0], [0], [1], [0, 0, 1, 1], [], []>} : vector<112x10xf32>, vector<10x10xf32>, vector<112x10xf32> -> vector<112x10xf32>
    %72 = arith.addf %68, %71 : vector<112x10xf32>
    %c109_i32 = arith.constant 109 : i32
    %73 = tpu.dynamic_rotate %59 by %c109_i32 dim 0 : vector<112x10xf32>, i32 -> vector<112x10xf32>
    %c400 = arith.constant 400 : index
    %c0_36 = arith.constant 0 : index
    %74 = vector.load %arg2[%c400, %c0_36] : memref<616x64xf32, #tpu.memory_space<vmem>>, vector<10x10xf32>
    %cst_37 = arith.constant dense<0.000000e+00> : vector<112x10xf32>
    %75 = tpu.matmul %73, %74, %cst_37 {dimension_numbers = #tpu.dot_dimension_numbers<[1], [0], [0], [1], [0, 0, 1, 1], [], []>} : vector<112x10xf32>, vector<10x10xf32>, vector<112x10xf32> -> vector<112x10xf32>
    %76 = arith.addf %72, %75 : vector<112x10xf32>
    %c108_i32 = arith.constant 108 : i32
    %77 = tpu.dynamic_rotate %59 by %c108_i32 dim 0 : vector<112x10xf32>, i32 -> vector<112x10xf32>
    %c416 = arith.constant 416 : index
    %c0_38 = arith.constant 0 : index
    %78 = vector.load %arg2[%c416, %c0_38] : memref<616x64xf32, #tpu.memory_space<vmem>>, vector<10x10xf32>
    %cst_39 = arith.constant dense<0.000000e+00> : vector<112x10xf32>
    %79 = tpu.matmul %77, %78, %cst_39 {dimension_numbers = #tpu.dot_dimension_numbers<[1], [0], [0], [1], [0, 0, 1, 1], [], []>} : vector<112x10xf32>, vector<10x10xf32>, vector<112x10xf32> -> vector<112x10xf32>
    %80 = arith.addf %76, %79 : vector<112x10xf32>
    %c107_i32 = arith.constant 107 : i32
    %81 = tpu.dynamic_rotate %59 by %c107_i32 dim 0 : vector<112x10xf32>, i32 -> vector<112x10xf32>
    %c432 = arith.constant 432 : index
    %c0_40 = arith.constant 0 : index
    %82 = vector.load %arg2[%c432, %c0_40] : memref<616x64xf32, #tpu.memory_space<vmem>>, vector<10x10xf32>
    %cst_41 = arith.constant dense<0.000000e+00> : vector<112x10xf32>
    %83 = tpu.matmul %81, %82, %cst_41 {dimension_numbers = #tpu.dot_dimension_numbers<[1], [0], [0], [1], [0, 0, 1, 1], [], []>} : vector<112x10xf32>, vector<10x10xf32>, vector<112x10xf32> -> vector<112x10xf32>
    %84 = arith.addf %80, %83 : vector<112x10xf32>
    %c106_i32 = arith.constant 106 : i32
    %85 = tpu.dynamic_rotate %59 by %c106_i32 dim 0 : vector<112x10xf32>, i32 -> vector<112x10xf32>
    %c448 = arith.constant 448 : index
    %c0_42 = arith.constant 0 : index
    %86 = vector.load %arg2[%c448, %c0_42] : memref<616x64xf32, #tpu.memory_space<vmem>>, vector<10x10xf32>
    %cst_43 = arith.constant dense<0.000000e+00> : vector<112x10xf32>
    %87 = tpu.matmul %85, %86, %cst_43 {dimension_numbers = #tpu.dot_dimension_numbers<[1], [0], [0], [1], [0, 0, 1, 1], [], []>} : vector<112x10xf32>, vector<10x10xf32>, vector<112x10xf32> -> vector<112x10xf32>
    %88 = arith.addf %84, %87 : vector<112x10xf32>
    %c105_i32 = arith.constant 105 : i32
    %89 = tpu.dynamic_rotate %59 by %c105_i32 dim 0 : vector<112x10xf32>, i32 -> vector<112x10xf32>
    %c464 = arith.constant 464 : index
    %c0_44 = arith.constant 0 : index
    %90 = vector.load %arg2[%c464, %c0_44] : memref<616x64xf32, #tpu.memory_space<vmem>>, vector<10x10xf32>
    %cst_45 = arith.constant dense<0.000000e+00> : vector<112x10xf32>
    %91 = tpu.matmul %89, %90, %cst_45 {dimension_numbers = #tpu.dot_dimension_numbers<[1], [0], [0], [1], [0, 0, 1, 1], [], []>} : vector<112x10xf32>, vector<10x10xf32>, vector<112x10xf32> -> vector<112x10xf32>
    %92 = arith.addf %88, %91 : vector<112x10xf32>
    %cst_46 = arith.constant 0.000000e+00 : f32
    %93 = vector.broadcast %cst_46 : f32 to vector<112x10xf32>
    %94 = arith.maximumf %92, %93 : vector<112x10xf32>
    %c111_i32_47 = arith.constant 111 : i32
    %95 = tpu.dynamic_rotate %94 by %c111_i32_47 dim 0 : vector<112x10xf32>, i32 -> vector<112x10xf32>
    %96 = arith.maximumf %94, %95 : vector<112x10xf32>
    %c112 = arith.constant 112 : index
    %c0_48 = arith.constant 0 : index
    %97 = vector.load %arg3[%c112, %c0_48] : memref<176x1xi32, #tpu.memory_space<vmem>>, vector<40x1xi32>
    %98 = tpu.iota {dimensions = array<i32: 1>} : vector<40x112xi32>
    %99 = vector.broadcast %97 : vector<40x1xi32> to vector<40x112xi32>
    %100 = arith.cmpi eq, %98, %99 : vector<40x112xi32>
    %101 = arith.extui %100 : vector<40x112xi1> to vector<40x112xi32>
    %102 = arith.sitofp %101 : vector<40x112xi32> to vector<40x112xf32>
    %cst_49 = arith.constant dense<0.000000e+00> : vector<40x10xf32>
    %103 = tpu.matmul %102, %96, %cst_49 {dimension_numbers = #tpu.dot_dimension_numbers<[1], [0], [0], [1], [0, 0, 1, 1], [], []>} : vector<40x112xf32>, vector<112x10xf32>, vector<40x10xf32> -> vector<40x10xf32>
    %c488 = arith.constant 488 : index
    %c0_50 = arith.constant 0 : index
    %104 = vector.load %arg2[%c488, %c0_50] : memref<616x64xf32, #tpu.memory_space<vmem>>, vector<10x10xf32>
    %cst_51 = arith.constant dense<0.000000e+00> : vector<40x10xf32>
    %105 = tpu.matmul %103, %104, %cst_51 {dimension_numbers = #tpu.dot_dimension_numbers<[1], [0], [0], [1], [0, 0, 1, 1], [], []>} : vector<40x10xf32>, vector<10x10xf32>, vector<40x10xf32> -> vector<40x10xf32>
    %c568 = arith.constant 568 : index
    %c0_52 = arith.constant 0 : index
    %106 = vector.load %arg2[%c568, %c0_52] : memref<616x64xf32, #tpu.memory_space<vmem>>, vector<1x10xf32>
    %107 = vector.broadcast %106 : vector<1x10xf32> to vector<40x10xf32>
    %108 = arith.addf %105, %107 : vector<40x10xf32>
    %c39_i32 = arith.constant 39 : i32
    %109 = tpu.dynamic_rotate %103 by %c39_i32 dim 0 : vector<40x10xf32>, i32 -> vector<40x10xf32>
    %c504 = arith.constant 504 : index
    %c0_53 = arith.constant 0 : index
    %110 = vector.load %arg2[%c504, %c0_53] : memref<616x64xf32, #tpu.memory_space<vmem>>, vector<10x10xf32>
    %cst_54 = arith.constant dense<0.000000e+00> : vector<40x10xf32>
    %111 = tpu.matmul %109, %110, %cst_54 {dimension_numbers = #tpu.dot_dimension_numbers<[1], [0], [0], [1], [0, 0, 1, 1], [], []>} : vector<40x10xf32>, vector<10x10xf32>, vector<40x10xf32> -> vector<40x10xf32>
    %112 = arith.addf %108, %111 : vector<40x10xf32>
    %c38_i32 = arith.constant 38 : i32
    %113 = tpu.dynamic_rotate %103 by %c38_i32 dim 0 : vector<40x10xf32>, i32 -> vector<40x10xf32>
    %c520 = arith.constant 520 : index
    %c0_55 = arith.constant 0 : index
    %114 = vector.load %arg2[%c520, %c0_55] : memref<616x64xf32, #tpu.memory_space<vmem>>, vector<10x10xf32>
    %cst_56 = arith.constant dense<0.000000e+00> : vector<40x10xf32>
    %115 = tpu.matmul %113, %114, %cst_56 {dimension_numbers = #tpu.dot_dimension_numbers<[1], [0], [0], [1], [0, 0, 1, 1], [], []>} : vector<40x10xf32>, vector<10x10xf32>, vector<40x10xf32> -> vector<40x10xf32>
    %116 = arith.addf %112, %115 : vector<40x10xf32>
    %c37_i32 = arith.constant 37 : i32
    %117 = tpu.dynamic_rotate %103 by %c37_i32 dim 0 : vector<40x10xf32>, i32 -> vector<40x10xf32>
    %c536 = arith.constant 536 : index
    %c0_57 = arith.constant 0 : index
    %118 = vector.load %arg2[%c536, %c0_57] : memref<616x64xf32, #tpu.memory_space<vmem>>, vector<10x10xf32>
    %cst_58 = arith.constant dense<0.000000e+00> : vector<40x10xf32>
    %119 = tpu.matmul %117, %118, %cst_58 {dimension_numbers = #tpu.dot_dimension_numbers<[1], [0], [0], [1], [0, 0, 1, 1], [], []>} : vector<40x10xf32>, vector<10x10xf32>, vector<40x10xf32> -> vector<40x10xf32>
    %120 = arith.addf %116, %119 : vector<40x10xf32>
    %c36_i32 = arith.constant 36 : i32
    %121 = tpu.dynamic_rotate %103 by %c36_i32 dim 0 : vector<40x10xf32>, i32 -> vector<40x10xf32>
    %c552 = arith.constant 552 : index
    %c0_59 = arith.constant 0 : index
    %122 = vector.load %arg2[%c552, %c0_59] : memref<616x64xf32, #tpu.memory_space<vmem>>, vector<10x10xf32>
    %cst_60 = arith.constant dense<0.000000e+00> : vector<40x10xf32>
    %123 = tpu.matmul %121, %122, %cst_60 {dimension_numbers = #tpu.dot_dimension_numbers<[1], [0], [0], [1], [0, 0, 1, 1], [], []>} : vector<40x10xf32>, vector<10x10xf32>, vector<40x10xf32> -> vector<40x10xf32>
    %124 = arith.addf %120, %123 : vector<40x10xf32>
    %cst_61 = arith.constant 0.000000e+00 : f32
    %125 = vector.broadcast %cst_61 : f32 to vector<40x10xf32>
    %126 = arith.maximumf %124, %125 : vector<40x10xf32>
    %c39_i32_62 = arith.constant 39 : i32
    %127 = tpu.dynamic_rotate %126 by %c39_i32_62 dim 0 : vector<40x10xf32>, i32 -> vector<40x10xf32>
    %128 = arith.maximumf %126, %127 : vector<40x10xf32>
    %c152_63 = arith.constant 152 : index
    %c0_64 = arith.constant 0 : index
    %129 = vector.load %arg3[%c152_63, %c0_64] : memref<176x1xi32, #tpu.memory_space<vmem>>, vector<24x1xi32>
    %130 = tpu.iota {dimensions = array<i32: 1>} : vector<24x40xi32>
    %131 = vector.broadcast %129 : vector<24x1xi32> to vector<24x40xi32>
    %132 = arith.cmpi eq, %130, %131 : vector<24x40xi32>
    %133 = arith.extui %132 : vector<24x40xi1> to vector<24x40xi32>
    %134 = arith.sitofp %133 : vector<24x40xi32> to vector<24x40xf32>
    %cst_65 = arith.constant dense<0.000000e+00> : vector<24x10xf32>
    %135 = tpu.matmul %134, %128, %cst_65 {dimension_numbers = #tpu.dot_dimension_numbers<[1], [0], [0], [1], [0, 0, 1, 1], [], []>} : vector<24x40xf32>, vector<40x10xf32>, vector<24x10xf32> -> vector<24x10xf32>
    %c576 = arith.constant 576 : index
    %c0_66 = arith.constant 0 : index
    %136 = vector.load %arg2[%c576, %c0_66] : memref<616x64xf32, #tpu.memory_space<vmem>>, vector<10x64xf32>
    %cst_67 = arith.constant dense<0.000000e+00> : vector<24x64xf32>
    %137 = tpu.matmul %135, %136, %cst_67 {dimension_numbers = #tpu.dot_dimension_numbers<[1], [0], [0], [1], [0, 0, 1, 1], [], []>} : vector<24x10xf32>, vector<10x64xf32>, vector<24x64xf32> -> vector<24x64xf32>
    %c608 = arith.constant 608 : index
    %c0_68 = arith.constant 0 : index
    %138 = vector.load %arg2[%c608, %c0_68] : memref<616x64xf32, #tpu.memory_space<vmem>>, vector<1x64xf32>
    %139 = vector.broadcast %138 : vector<1x64xf32> to vector<24x64xf32>
    %140 = arith.addf %137, %139 : vector<24x64xf32>
    %c592 = arith.constant 592 : index
    %c0_69 = arith.constant 0 : index
    %141 = vector.load %arg2[%c592, %c0_69] : memref<616x64xf32, #tpu.memory_space<vmem>>, vector<16x64xf32>
    %cst_70 = arith.constant 0.000000e+00 : f32
    %142 = vector.broadcast %cst_70 : f32 to vector<4x16xf32>
    %cst_71 = arith.constant 0.000000e+00 : f32
    %143 = vector.broadcast %cst_71 : f32 to vector<4x16xf32>
    %144 = vector.extract_strided_slice %140 {offsets = [0, 0], sizes = [4, 64], strides = [1, 1]} : vector<24x64xf32> to vector<4x64xf32>
    %cst_72 = arith.constant dense<0.000000e+00> : vector<4x64xf32>
    %145 = tpu.matmul %142, %141, %cst_72 {dimension_numbers = #tpu.dot_dimension_numbers<[1], [0], [0], [1], [0, 0, 1, 1], [], []>} : vector<4x16xf32>, vector<16x64xf32>, vector<4x64xf32> -> vector<4x64xf32>
    %146 = arith.addf %144, %145 : vector<4x64xf32>
    %147 = vector.extract_strided_slice %146 {offsets = [0, 0], sizes = [4, 16], strides = [1, 1]} : vector<4x64xf32> to vector<4x16xf32>
    %148 = arith.negf %147 : vector<4x16xf32>
    %149 = math.exp %148 : vector<4x16xf32>
    %cst_73 = arith.constant 1.000000e+00 : f32
    %150 = vector.broadcast %cst_73 : f32 to vector<4x16xf32>
    %151 = arith.addf %150, %149 : vector<4x16xf32>
    %152 = arith.divf %150, %151 : vector<4x16xf32>
    %153 = vector.extract_strided_slice %146 {offsets = [0, 16], sizes = [4, 16], strides = [1, 1]} : vector<4x64xf32> to vector<4x16xf32>
    %154 = arith.negf %153 : vector<4x16xf32>
    %155 = math.exp %154 : vector<4x16xf32>
    %cst_74 = arith.constant 1.000000e+00 : f32
    %156 = vector.broadcast %cst_74 : f32 to vector<4x16xf32>
    %157 = arith.addf %156, %155 : vector<4x16xf32>
    %158 = arith.divf %156, %157 : vector<4x16xf32>
    %159 = vector.extract_strided_slice %146 {offsets = [0, 32], sizes = [4, 16], strides = [1, 1]} : vector<4x64xf32> to vector<4x16xf32>
    %160 = math.tanh %159 : vector<4x16xf32>
    %161 = vector.extract_strided_slice %146 {offsets = [0, 48], sizes = [4, 16], strides = [1, 1]} : vector<4x64xf32> to vector<4x16xf32>
    %162 = arith.negf %161 : vector<4x16xf32>
    %163 = math.exp %162 : vector<4x16xf32>
    %cst_75 = arith.constant 1.000000e+00 : f32
    %164 = vector.broadcast %cst_75 : f32 to vector<4x16xf32>
    %165 = arith.addf %164, %163 : vector<4x16xf32>
    %166 = arith.divf %164, %165 : vector<4x16xf32>
    %167 = arith.mulf %158, %143 : vector<4x16xf32>
    %168 = arith.mulf %152, %160 : vector<4x16xf32>
    %169 = arith.addf %167, %168 : vector<4x16xf32>
    %170 = math.tanh %169 : vector<4x16xf32>
    %171 = arith.mulf %166, %170 : vector<4x16xf32>
    %172 = vector.extract_strided_slice %140 {offsets = [8, 0], sizes = [4, 64], strides = [1, 1]} : vector<24x64xf32> to vector<4x64xf32>
    %cst_76 = arith.constant dense<0.000000e+00> : vector<4x64xf32>
    %173 = tpu.matmul %171, %141, %cst_76 {dimension_numbers = #tpu.dot_dimension_numbers<[1], [0], [0], [1], [0, 0, 1, 1], [], []>} : vector<4x16xf32>, vector<16x64xf32>, vector<4x64xf32> -> vector<4x64xf32>
    %174 = arith.addf %172, %173 : vector<4x64xf32>
    %175 = vector.extract_strided_slice %174 {offsets = [0, 0], sizes = [4, 16], strides = [1, 1]} : vector<4x64xf32> to vector<4x16xf32>
    %176 = arith.negf %175 : vector<4x16xf32>
    %177 = math.exp %176 : vector<4x16xf32>
    %cst_77 = arith.constant 1.000000e+00 : f32
    %178 = vector.broadcast %cst_77 : f32 to vector<4x16xf32>
    %179 = arith.addf %178, %177 : vector<4x16xf32>
    %180 = arith.divf %178, %179 : vector<4x16xf32>
    %181 = vector.extract_strided_slice %174 {offsets = [0, 16], sizes = [4, 16], strides = [1, 1]} : vector<4x64xf32> to vector<4x16xf32>
    %182 = arith.negf %181 : vector<4x16xf32>
    %183 = math.exp %182 : vector<4x16xf32>
    %cst_78 = arith.constant 1.000000e+00 : f32
    %184 = vector.broadcast %cst_78 : f32 to vector<4x16xf32>
    %185 = arith.addf %184, %183 : vector<4x16xf32>
    %186 = arith.divf %184, %185 : vector<4x16xf32>
    %187 = vector.extract_strided_slice %174 {offsets = [0, 32], sizes = [4, 16], strides = [1, 1]} : vector<4x64xf32> to vector<4x16xf32>
    %188 = math.tanh %187 : vector<4x16xf32>
    %189 = vector.extract_strided_slice %174 {offsets = [0, 48], sizes = [4, 16], strides = [1, 1]} : vector<4x64xf32> to vector<4x16xf32>
    %190 = arith.negf %189 : vector<4x16xf32>
    %191 = math.exp %190 : vector<4x16xf32>
    %cst_79 = arith.constant 1.000000e+00 : f32
    %192 = vector.broadcast %cst_79 : f32 to vector<4x16xf32>
    %193 = arith.addf %192, %191 : vector<4x16xf32>
    %194 = arith.divf %192, %193 : vector<4x16xf32>
    %195 = arith.mulf %186, %169 : vector<4x16xf32>
    %196 = arith.mulf %180, %188 : vector<4x16xf32>
    %197 = arith.addf %195, %196 : vector<4x16xf32>
    %198 = math.tanh %197 : vector<4x16xf32>
    %199 = arith.mulf %194, %198 : vector<4x16xf32>
    %200 = vector.extract_strided_slice %140 {offsets = [16, 0], sizes = [4, 64], strides = [1, 1]} : vector<24x64xf32> to vector<4x64xf32>
    %cst_80 = arith.constant dense<0.000000e+00> : vector<4x64xf32>
    %201 = tpu.matmul %199, %141, %cst_80 {dimension_numbers = #tpu.dot_dimension_numbers<[1], [0], [0], [1], [0, 0, 1, 1], [], []>} : vector<4x16xf32>, vector<16x64xf32>, vector<4x64xf32> -> vector<4x64xf32>
    %202 = arith.addf %200, %201 : vector<4x64xf32>
    %203 = vector.extract_strided_slice %202 {offsets = [0, 0], sizes = [4, 16], strides = [1, 1]} : vector<4x64xf32> to vector<4x16xf32>
    %204 = arith.negf %203 : vector<4x16xf32>
    %205 = math.exp %204 : vector<4x16xf32>
    %cst_81 = arith.constant 1.000000e+00 : f32
    %206 = vector.broadcast %cst_81 : f32 to vector<4x16xf32>
    %207 = arith.addf %206, %205 : vector<4x16xf32>
    %208 = arith.divf %206, %207 : vector<4x16xf32>
    %209 = vector.extract_strided_slice %202 {offsets = [0, 16], sizes = [4, 16], strides = [1, 1]} : vector<4x64xf32> to vector<4x16xf32>
    %210 = arith.negf %209 : vector<4x16xf32>
    %211 = math.exp %210 : vector<4x16xf32>
    %cst_82 = arith.constant 1.000000e+00 : f32
    %212 = vector.broadcast %cst_82 : f32 to vector<4x16xf32>
    %213 = arith.addf %212, %211 : vector<4x16xf32>
    %214 = arith.divf %212, %213 : vector<4x16xf32>
    %215 = vector.extract_strided_slice %202 {offsets = [0, 32], sizes = [4, 16], strides = [1, 1]} : vector<4x64xf32> to vector<4x16xf32>
    %216 = math.tanh %215 : vector<4x16xf32>
    %217 = vector.extract_strided_slice %202 {offsets = [0, 48], sizes = [4, 16], strides = [1, 1]} : vector<4x64xf32> to vector<4x16xf32>
    %218 = arith.negf %217 : vector<4x16xf32>
    %219 = math.exp %218 : vector<4x16xf32>
    %cst_83 = arith.constant 1.000000e+00 : f32
    %220 = vector.broadcast %cst_83 : f32 to vector<4x16xf32>
    %221 = arith.addf %220, %219 : vector<4x16xf32>
    %222 = arith.divf %220, %221 : vector<4x16xf32>
    %223 = arith.mulf %214, %197 : vector<4x16xf32>
    %224 = arith.mulf %208, %216 : vector<4x16xf32>
    %225 = arith.addf %223, %224 : vector<4x16xf32>
    %226 = math.tanh %225 : vector<4x16xf32>
    %227 = arith.mulf %222, %226 : vector<4x16xf32>
    %c0_84 = arith.constant 0 : index
    %c0_85 = arith.constant 0 : index
    %228 = vector.load %arg4[%c0_84, %c0_85] : memref<4x16xf32, #tpu.memory_space<vmem>>, vector<4x16xf32>
    tpu.vector_store %arg4[%c0_84, %c0_85], %227 {strides = array<i32>} : memref<4x16xf32, #tpu.memory_space<vmem>>, vector<4x16xf32>,
    return
  }
  func.func @transform_0(%arg0: i32) -> (i32, i32) {
    %c0_i32 = arith.constant 0 : i32
    %c0_i32_0 = arith.constant 0 : i32
    %c0_i32_1 = arith.constant 0 : i32
    return %c0_i32, %c0_i32_0 : i32, i32
  }
  func.func @transform_1(%arg0: i32) -> (i32, i32) {
    %c0_i32 = arith.constant 0 : i32
    %c0_i32_0 = arith.constant 0 : i32
    %c0_i32_1 = arith.constant 0 : i32
    return %c0_i32, %c0_i32_0 : i32, i32
  }
  func.func @transform_2(%arg0: i32) -> (i32, i32) {
    %c0_i32 = arith.constant 0 : i32
    %c0_i32_0 = arith.constant 0 : i32
    %c0_i32_1 = arith.constant 0 : i32
    return %c0_i32, %c0_i32_0 : i32, i32
  }
  func.func @transform_3(%arg0: i32) -> (i32, i32) {
    %c0_i32 = arith.constant 0 : i32
    %c0_i32_0 = arith.constant 0 : i32
    %c0_i32_1 = arith.constant 0 : i32
    return %c0_i32, %c0_i32_0 : i32, i32
  }
}

</mosaic_0001>

<bundles_post_ra>
// kernel: dnn_ppi_forward.1
= control target key start
LH: loop header
LB: loop body
LE: loop exit
PB: predicated region body
PF: predicated region fallthrough
CT: control target
= control target key end

     0   :  { %v10931_v0 = vmov 0   ;;  %v14_v62 = vlaneseq  ;;  %vm243_vm0 = vcmask 195584   ;;  %s10937_s19 = smov 96   ;;  %s10940_s20 = smov 80   ;;  %s14649_s0 = inlined_call_operand.vmem [shape: s32[256,1], index: 0, kind: input, shape index: {}]   ;;  %s14650_s1 = inlined_call_operand.vmem [shape: f32[616,64], index: 1, kind: input, shape index: {}]   ;;  %s14651_s2 = inlined_call_operand.vmem [shape: s32[176,1], index: 2, kind: input, shape index: {}]   ;;  %s14652_s3 = inlined_call_operand.vmem [shape: f32[4,16], index: 3, kind: output, shape index: {}]  }
   0x1   :  { %10906 = vset.pattern.permute.xlu1 %v10931_v0  ;;  %10905 = vset.pattern.permute.xlu0 %v10931_v0  ;;  %v18_v1 = vld [vmem:[%s14649_s0 + $0x10] sm:$0xff]  ;;  %v16_v2 = vld [vmem:[%s14649_s0] sm:$0xff]  ;;  %v19_v3 = vld [vmem:[%s14649_s0 + $0x18] sm:$0xff] }
   0x2   :  { %55 = vperm.xlu1 %10906, %v18_v1   ;;  %49 = vperm.xlu0 %10905, %v16_v2   ;;  %v17_v4 = vld [vmem:[%s14649_s0 + $0x8] sm:$0xff]  ;;  %v20_v6 = vld [vmem:[%s14649_s0 + $0x20] sm:$0xff]  ;;  %v23_v7 = vld [vmem:[%s14649_s0 + $0x38] sm:$0xff]  ;;  %v11139_v63 = vand.u32 127, %v14_v62  ;;  %v14653_v2 = vmov 0.0  }
   0x3   :  { %v21_v5 = vld [vmem:[%s14649_s0 + $0x28] sm:$0xff]  ;;  %v22_v8 = vld [vmem:[%s14649_s0 + $0x30] sm:$0xff]  ;;  %v24_v10 = vld [vmem:[%s14649_s0 + $0x40] sm:$0xff] }
   0x4   :  { %v25_v9 = vld [vmem:[%s14649_s0 + $0x48] sm:$0xff]  ;;  %v27_v11 = vld [vmem:[%s14649_s0 + $0x58] sm:$0xff]  ;;  %v26_v12 = vld [vmem:[%s14649_s0 + $0x50] sm:$0xff]  ;;  %14739 = vst [vmem:[#allocation2_spill] sm:$0xff] %v11139_v63 }
   0x5   :  { %v240_v13 = vld [vmem:[%s14650_s1] sm:$0xff]  ;;  %v241_v14 = vld [vmem:[%s14650_s1 + $0x8] sm:$0xff]  ;;  %v242_v16 = vld [vmem:[%s14650_s1 + $0x10] sm:$0xff] }
   0x6   :  { %58 = vperm.xlu1 %10906, %v19_v3   ;;  %52 = vperm.xlu0 %10905, %v17_v4   ;;  %v10185_v15 = vpack.c.bf16 %v241_v14, %v240_v13  ;;  %v29_v17 = vld [vmem:[%s14649_s0 + $0x68] sm:$0xff]  ;;  %v28_v18 = vld [vmem:[%s14649_s0 + $0x60] sm:$0xff]  ;;  %v31_v19 = vld [vmem:[%s14649_s0 + $0x78] sm:$0xff] }
   0x7   :  { %v30_v20 = vld [vmem:[%s14649_s0 + $0x70] sm:$0xff]  ;;  %v33_v21 = vld [vmem:[%s14649_s0 + $0x88] sm:$0xff]  ;;  %v32_v22 = vld [vmem:[%s14649_s0 + $0x80] sm:$0xff] }
   0x8   :  { %10186 = vmatprep.subr.bf16.mxu0 %v10185_v15  ;;  %v35_v23 = vld [vmem:[%s14649_s0 + $0x98] sm:$0xff]  ;;  %v34_v24 = vld [vmem:[%s14649_s0 + $0x90] sm:$0xff]  ;;  %v37_v25 = vld [vmem:[%s14649_s0 + $0xa8] sm:$0xff] }
   0x9   :  { %10188 = vmatpush3.bf16.msra.mxu0 %v10185_v15  ;;  %v36_v26 = vld [vmem:[%s14649_s0 + $0xa0] sm:$0xff]  ;;  %v39_v27 = vld [vmem:[%s14649_s0 + $0xb8] sm:$0xff]  ;;  %v38_v28 = vld [vmem:[%s14649_s0 + $0xb0] sm:$0xff] }
   0xa   :  { %64 = vperm.xlu1 %10906, %v21_v5   ;;  %61 = vperm.xlu0 %10905, %v20_v6   ;;  %v41_v29 = vld [vmem:[%s14649_s0 + $0xc8] sm:$0xff]  ;;  %v40_v30 = vld [vmem:[%s14649_s0 + $0xc0] sm:$0xff]  ;;  %v43_v31 = vld [vmem:[%s14649_s0 + $0xd8] sm:$0xff] }
   0xb   :  { %9184 = vmatprep.subr.mxu0 %v242_v16  ;;  %v42_v32 = vld [vmem:[%s14649_s0 + $0xd0] sm:$0xff]  ;;  %v45_v33 = vld [vmem:[%s14649_s0 + $0xe8] sm:$0xff]  ;;  %v44_v34 = vld [vmem:[%s14649_s0 + $0xe0] sm:$0xff] }
   0xc   :  { %v47_v35 = vld [vmem:[%s14649_s0 + $0xf8] sm:$0xff]  ;;  %v46_v36 = vld [vmem:[%s14649_s0 + $0xf0] sm:$0xff]  ;;  %v4503_v37 = vld [vmem:[%s14651_s2 + $0x8] sm:$0xff] }
   0xd   :  { %9185 = vmatpush3.msra.mxu0 %v242_v16  ;;  %v4502_v38 = vld [vmem:[%s14651_s2] sm:$0xff]  ;;  %v4505_v39 = vld [vmem:[%s14651_s2 + $0x18] sm:$0xff]  ;;  %v4504_v40 = vld [vmem:[%s14651_s2 + $0x10] sm:$0xff] }
   0xe   :  { %70 = vperm.xlu1 %10906, %v23_v7   ;;  %67 = vperm.xlu0 %10905, %v22_v8   ;;  %v4507_v41 = vld [vmem:[%s14651_s2 + $0x28] sm:$0xff]  ;;  %v4506_v42 = vld [vmem:[%s14651_s2 + $0x20] sm:$0xff]  ;;  %v4509_v43 = vld [vmem:[%s14651_s2 + $0x38] sm:$0xff] }
   0xf   :  { %v4508_v44 = vld [vmem:[%s14651_s2 + $0x30] sm:$0xff]  ;;  %v4511_v45 = vld [vmem:[%s14651_s2 + $0x48] sm:$0xff]  ;;  %v4510_v46 = vld [vmem:[%s14651_s2 + $0x40] sm:$0xff] }
  0x10   :  { %v4513_v47 = vld [vmem:[%s14651_s2 + $0x58] sm:$0xff]  ;;  %v4512_v48 = vld [vmem:[%s14651_s2 + $0x50] sm:$0xff]  ;;  %v4515_v49 = vld [vmem:[%s14651_s2 + $0x68] sm:$0xff] }
  0x11   :  { %v4514_v50 = vld [vmem:[%s14651_s2 + $0x60] sm:$0xff]  ;;  %v6592_v51 = vld [vmem:[%s14651_s2 + $0x78] sm:$0xff]  ;;  %v6591_v52 = vld [vmem:[%s14651_s2 + $0x70] sm:$0xff] }
  0x12   :  { %76 = vperm.xlu1 %10906, %v25_v9   ;;  %73 = vperm.xlu0 %10905, %v24_v10   ;;  %v6594_v53 = vld [vmem:[%s14651_s2 + $0x88] sm:$0xff]  ;;  %v6593_v54 = vld [vmem:[%s14651_s2 + $0x80] sm:$0xff]  ;;  %v7367_v55 = vld [vmem:[%s14651_s2 + $0x98] sm:$0xff] }
  0x13   :  { %v6595_v56 = vld [vmem:[%s14651_s2 + $0x90] sm:$0xff]  ;;  %v7369_v57 = vld [vmem:[%s14651_s2 + $0xa8] sm:$0xff]  ;;  %v7368_v58 = vld [vmem:[%s14651_s2 + $0xa0] sm:$0xff]  ;;  %s10938_s2 = smov 16  }
  0x14   :  { %v565_v59 = vld [vmem:[%s14650_s1 + $0x18] sm:$0xff]  ;;  %v566_v60 = vld [vmem:[%s14650_s1 + $0x20] sm:$0xff]  ;;  %v567_v4 = vld [vmem:[%s14650_s1 + $0x28] sm:$0xff] }
  0x15   :  { %v10189_v61 = vpack.c.bf16 %v566_v60, %v565_v59  ;;  %v568_v5 = vld [vmem:[%s14650_s1 + $0x30] sm:$0xff] }
  0x16   :  { %82 = vperm.xlu1 %10906, %v27_v11   ;;  %79 = vperm.xlu0 %10905, %v26_v12   ;;  %v10193_v9 = vpack.c.bf16 %v568_v5, %v567_v4 }
  0x17   :  { %10190 = vmatprep.subr.bf16.mxu0 %v10189_v61 }
  0x1a   :  { %88 = vperm.xlu1 %10906, %v29_v17   ;;  %85 = vperm.xlu0 %10905, %v28_v18  }
  0x1e   :  { %94 = vperm.xlu1 %10906, %v31_v19   ;;  %91 = vperm.xlu0 %10905, %v30_v20  }
  0x22   :  { %100 = vperm.xlu1 %10906, %v33_v21   ;;  %97 = vperm.xlu0 %10905, %v32_v22  }
  0x26   :  { %106 = vperm.xlu1 %10906, %v35_v23   ;;  %103 = vperm.xlu0 %10905, %v34_v24  }
  0x2a   :  { %112 = vperm.xlu1 %10906, %v37_v25   ;;  %109 = vperm.xlu0 %10905, %v36_v26  }
  0x2e   :  { %118 = vperm.xlu1 %10906, %v39_v27   ;;  %115 = vperm.xlu0 %10905, %v38_v28  }
  0x32   :  { %124 = vperm.xlu1 %10906, %v41_v29   ;;  %121 = vperm.xlu0 %10905, %v40_v30  }
  0x36   :  { %130 = vperm.xlu1 %10906, %v43_v31   ;;  %127 = vperm.xlu0 %10905, %v42_v32  }
  0x3a   :  { %136 = vperm.xlu1 %10906, %v45_v33   ;;  %133 = vperm.xlu0 %10905, %v44_v34  }
  0x3e   :  { %142 = vperm.xlu1 %10906, %v47_v35   ;;  %139 = vperm.xlu0 %10905, %v46_v36  }
  0x42   :  { %4521 = vperm.xlu1 %10906, %v4503_v37   ;;  %4518 = vperm.xlu0 %10905, %v4502_v38  }
  0x46   :  { %4527 = vperm.xlu1 %10906, %v4505_v39   ;;  %4524 = vperm.xlu0 %10905, %v4504_v40  }
  0x4a   :  { %4533 = vperm.xlu1 %10906, %v4507_v41   ;;  %4530 = vperm.xlu0 %10905, %v4506_v42  }
  0x4e   :  { %4539 = vperm.xlu1 %10906, %v4509_v43   ;;  %4536 = vperm.xlu0 %10905, %v4508_v44  }
  0x52   :  { %4545 = vperm.xlu1 %10906, %v4511_v45   ;;  %4542 = vperm.xlu0 %10905, %v4510_v46  }
  0x56   :  { %4551 = vperm.xlu1 %10906, %v4513_v47   ;;  %4548 = vperm.xlu0 %10905, %v4512_v48  }
  0x5a   :  { %4557 = vperm.xlu1 %10906, %v4515_v49   ;;  %4554 = vperm.xlu0 %10905, %v4514_v50  }
  0x5e   :  { %6600 = vperm.xlu1 %10906, %v6592_v51   ;;  %6597 = vperm.xlu0 %10905, %v6591_v52  }
  0x62   :  { %6606 = vperm.xlu1 %10906, %v6594_v53   ;;  %6603 = vperm.xlu0 %10905, %v6593_v54  }
  0x66   :  { %7371 = vperm.xlu1 %10906, %v7367_v55   ;;  %6609 = vperm.xlu0 %10905, %v6595_v56  }
  0x6a   :  { %7377 = vperm.xlu1 %10906, %v7369_v57   ;;  %7374 = vperm.xlu0 %10905, %v7368_v58  }
  0x81   :  { %v56_v0 = vpop.permute.xlu1 %55  ;;  %v50_v1 = vpop.permute.xlu0 %49 }
  0x82   :  { %vm144_vm1 = vcmp.eq.s32.totalorder %v11139_v63, %v50_v1  ;;  %vm146_vm2 = vcmp.eq.s32.totalorder %v11139_v63, %v56_v0 }
  0x83   :  { %v7888_v3 = vsel %vm144_vm1, 1.0, %v14653_v2  ;;  %v7890_v8 = vsel %vm146_vm2, 1.0, %v14653_v2 }
  0x84   :  { %9186 = vmatprep.mubr.msk.f32.mxu0 %vm243_vm0, %v7888_v3 }
  0x85   :  { %v59_v6 = vpop.permute.xlu1 %58  ;;  %v53_v7 = vpop.permute.xlu0 %52 }
  0x86   :  { %vm145_vm3 = vcmp.eq.s32.totalorder %v11139_v63, %v53_v7  ;;  %vm147_vm4 = vcmp.eq.s32.totalorder %v11139_v63, %v59_v6  ;;  %v963_v7 = vld [vmem:[%s14650_s1 + $0x38] sm:$0xff] }
  0x87   :  { %v7889_v10 = vsel %vm145_vm3, 1.0, %v14653_v2  ;;  %v7891_v13 = vsel %vm147_vm4, 1.0, %v14653_v2 }
  0x88   :  { %9187 = vmatmul.mubr.msk.f32.vlgmr.msra.gmra.mrb[0].mxu0 %vm243_vm0, %v7889_v10  ;;  %v965_v10 = vld [vmem:[%s14650_s1 + $0x48] sm:$0xff] }
  0x89   :  { %v65_v11 = vpop.permute.xlu1 %64  ;;  %9189 = vmatprep.mubr.msk.f32.mxu0 %vm243_vm0, %v7890_v8  ;;  %v62_v12 = vpop.permute.xlu0 %61  ;;  %10192 = vmatpush3.bf16.msra.mxu0 %v10189_v61  ;;  %v964_v8 = vld [vmem:[%s14650_s1 + $0x40] sm:$0xff] }
  0x8a   :  { %vm148_vm5 = vcmp.eq.s32.totalorder %v11139_v63, %v62_v12  ;;  %10194 = vmatprep.subr.bf16.mxu0 %v10193_v9  ;;  %vm149_vm6 = vcmp.eq.s32.totalorder %v11139_v63, %v65_v11  ;;  %v966_v11 = vld [vmem:[%s14650_s1 + $0x50] sm:$0xff] }
  0x8b   :  { %v7892_v14 = vsel %vm148_vm5, 1.0, %v14653_v2  ;;  %v7893_v17 = vsel %vm149_vm6, 1.0, %v14653_v2  ;;  %v10201_v12 = vpack.c.bf16 %v966_v11, %v965_v10 }
  0x8c   :  { %9190 = vmatmul.mubr.msk.f32.gmra.mrb[2].mxu0 %vm243_vm0, %v7891_v13  ;;  %v1385_v13 = vld [vmem:[%s14650_s1 + $0x58] sm:$0xff] }
  0x8d   :  { %v71_v15 = vpop.permute.xlu1 %70  ;;  %9192 = vmatprep.mubr.msk.f32.mxu0 %vm243_vm0, %v7892_v14  ;;  %v68_v16 = vpop.permute.xlu0 %67  ;;  %10196 = vmatpush3.bf16.msra.mxu0 %v10193_v9  ;;  %v10197_v9 = vpack.c.bf16 %v964_v8, %v963_v7  ;;  %v1386_v14 = vld [vmem:[%s14650_s1 + $0x60] sm:$0xff] }
  0x8e   :  { %vm150_vm7 = vcmp.eq.s32.totalorder %v11139_v63, %v68_v16  ;;  %vm151_vm8 = vcmp.eq.s32.totalorder %v11139_v63, %v71_v15  ;;  %v11261_v15 = vpack.c.bf16 %v1386_v14, %v1385_v13  ;;  %v11265_v16 = vshrl.u32 %v14_v62, 7 }
  0x8f   :  { %v7894_v18 = vsel %vm150_vm7, 1.0, %v14653_v2  ;;  %v7895_v21 = vsel %vm151_vm8, 1.0, %v14653_v2  ;;  %10198 = vmatprep.subr.bf16.mxu1 %v10197_v9 }
  0x90   :  { %9193 = vmatmul.mubr.msk.f32.gmra.mrb[4].mxu0 %vm243_vm0, %v7893_v17  ;;  %10200 = vmatpush3.bf16.msra.mxu1 %v10197_v9  ;;  %14740 = vst [vmem:[#allocation3_spill] sm:$0xff] %v11265_v16  ;;  %v1387_v17 = vld [vmem:[%s14650_s1 + $0x68] sm:$0xff] }
  0x91   :  { %v77_v19 = vpop.permute.xlu1 %76  ;;  %9195 = vmatprep.mubr.msk.f32.mxu0 %vm243_vm0, %v7894_v18  ;;  %v74_v20 = vpop.permute.xlu0 %73  ;;  %10202 = vmatprep.subr.bf16.mxu1 %v10201_v12  ;;  %v1388_v18 = vld [vmem:[%s14650_s1 + $0x70] sm:$0xff] }
  0x92   :  { %vm152_vm9 = vcmp.eq.s32.totalorder %v11139_v63, %v74_v20  ;;  %vm153_vm10 = vcmp.eq.s32.totalorder %v11139_v63, %v77_v19  ;;  %v11275_v19 = vadd.s32 128, %v11139_v63  ;;  %v11281_v20 = vpack.c.bf16 %v1388_v18, %v1387_v17 }
  0x93   :  { %v7896_v22 = vsel %vm152_vm9, 1.0, %v14653_v2  ;;  %v7897_v25 = vsel %vm153_vm10, 1.0, %v14653_v2 }
  0x94   :  { %9196 = vmatmul.mubr.msk.f32.gmra.mrb[6].mxu0 %vm243_vm0, %v7895_v21  ;;  %10204 = vmatpush3.bf16.msra.mxu1 %v10201_v12  ;;  %14741 = vst [vmem:[#allocation4_spill] sm:$0xff] %v11275_v19  ;;  %v1807_v21 = vld [vmem:[%s14650_s1 + $0x78] sm:$0xff] }
  0x95   :  { %v83_v23 = vpop.permute.xlu1 %82  ;;  %9198 = vmatprep.mubr.msk.f32.mxu0 %vm243_vm0, %v7896_v22  ;;  %v80_v24 = vpop.permute.xlu0 %79  ;;  %10206 = vmatprep.subr.bf16.mxu1 %v11261_v15  ;;  %v1808_v22 = vld [vmem:[%s14650_s1 + $0x80] sm:$0xff] }
  0x96   :  { %vm154_vm11 = vcmp.eq.s32.totalorder %v11139_v63, %v80_v24  ;;  %vm155_vm12 = vcmp.eq.s32.totalorder %v11139_v63, %v83_v23 }
  0x97   :  { %v7898_v26 = vsel %vm154_vm11, 1.0, %v14653_v2  ;;  %v7899_v29 = vsel %vm155_vm12, 1.0, %v14653_v2 }
  0x98   :  { %9199 = vmatmul.mubr.msk.f32.gmra.mrb[8].mxu0 %vm243_vm0, %v7897_v25 }
  0x99   :  { %v89_v27 = vpop.permute.xlu1 %88  ;;  %9201 = vmatprep.mubr.msk.f32.mxu0 %vm243_vm0, %v7898_v26  ;;  %v86_v28 = vpop.permute.xlu0 %85 }
  0x9a   :  { %vm156_vm13 = vcmp.eq.s32.totalorder %v11139_v63, %v86_v28  ;;  %vm157_vm14 = vcmp.eq.s32.totalorder %v11139_v63, %v89_v27 }
  0x9b   :  { %v7900_v30 = vsel %vm156_vm13, 1.0, %v14653_v2  ;;  %v7901_v33 = vsel %vm157_vm14, 1.0, %v14653_v2 }
  0x9c   :  { %9202 = vmatmul.mubr.msk.f32.gmra.mrb[10].mxu0 %vm243_vm0, %v7899_v29 }
  0x9d   :  { %v95_v31 = vpop.permute.xlu1 %94  ;;  %9204 = vmatprep.mubr.msk.f32.mxu0 %vm243_vm0, %v7900_v30  ;;  %v92_v32 = vpop.permute.xlu0 %91  ;;  %v1809_v30 = vld [vmem:[%s14650_s1 + $0x88] sm:$0xff] }
  0x9e   :  { %vm158_vm15 = vcmp.eq.s32.totalorder %v11139_v63, %v92_v32  ;;  %vm159_vm1 = vcmp.eq.s32.totalorder %v11139_v63, %v95_v31  ;;  %v1810_v31 = vld [vmem:[%s14650_s1 + $0x90] sm:$0xff] }
  0x9f   :  { %v7902_v34 = vsel %vm158_vm15, 1.0, %v14653_v2  ;;  %v7903_v37 = vsel %vm159_vm1, 1.0, %v14653_v2 }
  0xa0   :  { %9205 = vmatmul.mubr.msk.f32.gmra.mrb[12].mxu0 %vm243_vm0, %v7901_v33 }
  0xa1   :  { %v101_v35 = vpop.permute.xlu1 %100  ;;  %9207 = vmatprep.mubr.msk.f32.mxu0 %vm243_vm0, %v7902_v34  ;;  %v98_v36 = vpop.permute.xlu0 %97  ;;  %v11311_v34 = vpack.c.bf16 %v1808_v22, %v1807_v21 }
  0xa2   :  { %vm160_vm2 = vcmp.eq.s32.totalorder %v11139_v63, %v98_v36  ;;  %vm161_vm3 = vcmp.eq.s32.totalorder %v11139_v63, %v101_v35  ;;  %v11313_v35 = vpack.c.bf16 %v1810_v31, %v1809_v30 }
  0xa3   :  { %v7904_v38 = vsel %vm160_vm2, 1.0, %v14653_v2  ;;  %v7905_v41 = vsel %vm161_vm3, 1.0, %v14653_v2  ;;  %vm574_vm3 = vcmask 261120  }
  0xa4   :  { %9208 = vmatmul.mubr.msk.f32.gmra.mrb[14].mxu0 %vm243_vm0, %v7903_v37 }
  0xa5   :  { %v107_v39 = vpop.permute.xlu1 %106  ;;  %9210 = vmatprep.mubr.msk.f32.mxu0 %vm243_vm0, %v7904_v38  ;;  %v104_v40 = vpop.permute.xlu0 %103 }
  0xa6   :  { %vm162_vm4 = vcmp.eq.s32.totalorder %v11139_v63, %v104_v40  ;;  %vm163_vm5 = vcmp.eq.s32.totalorder %v11139_v63, %v107_v39 }
  0xa7   :  { %v7906_v42 = vsel %vm162_vm4, 1.0, %v14653_v2  ;;  %v7907_v45 = vsel %vm163_vm5, 1.0, %v14653_v2  ;;  %vm1352_vm4 = vcmp.lt.s32.totalorder %v11265_v16, 6  ;;  %vm1774_vm5 = vcmp.lt.s32.totalorder %v11265_v16, 5 }
  0xa8   :  { %9211 = vmatmul.mubr.msk.f32.gmra.mrb[16].mxu0 %vm243_vm0, %v7905_v41 }
  0xa9   :  { %v113_v43 = vpop.permute.xlu1 %112  ;;  %9213 = vmatprep.mubr.msk.f32.mxu0 %vm243_vm0, %v7906_v42  ;;  %v110_v44 = vpop.permute.xlu0 %109 }
  0xaa   :  { %vm164_vm6 = vcmp.eq.s32.totalorder %v11139_v63, %v110_v44  ;;  %vm165_vm7 = vcmp.eq.s32.totalorder %v11139_v63, %v113_v43 }
  0xab   :  { %v7908_v46 = vsel %vm164_vm6, 1.0, %v14653_v2  ;;  %v7909_v49 = vsel %vm165_vm7, 1.0, %v14653_v2  ;;  %vm2196_vm6 = vcmp.lt.s32.totalorder %v11265_v16, 4  ;;  %vm2618_vm7 = vcmp.lt.s32.totalorder %v11265_v16, 3 }
  0xac   :  { %9214 = vmatmul.mubr.msk.f32.gmra.mrb[18].mxu0 %vm243_vm0, %v7907_v45 }
  0xad   :  { %v119_v47 = vpop.permute.xlu1 %118  ;;  %9216 = vmatprep.mubr.msk.f32.mxu0 %vm243_vm0, %v7908_v46  ;;  %v116_v48 = vpop.permute.xlu0 %115 }
  0xae   :  { %vm166_vm8 = vcmp.eq.s32.totalorder %v11139_v63, %v116_v48  ;;  %vm167_vm9 = vcmp.eq.s32.totalorder %v11139_v63, %v119_v47 }
  0xaf   :  { %v7910_v50 = vsel %vm166_vm8, 1.0, %v14653_v2  ;;  %v7911_v53 = vsel %vm167_vm9, 1.0, %v14653_v2  ;;  %vm3040_vm9 = vcmp.lt.s32.totalorder %v11265_v16, 2 }
  0xb0   :  { %9217 = vmatmul.mubr.msk.f32.gmra.mrb[20].mxu0 %vm243_vm0, %v7909_v49 }
  0xb1   :  { %v125_v51 = vpop.permute.xlu1 %124  ;;  %9219 = vmatprep.mubr.msk.f32.mxu0 %vm243_vm0, %v7910_v50  ;;  %v122_v52 = vpop.permute.xlu0 %121 }
  0xb2   :  { %vm168_vm10 = vcmp.eq.s32.totalorder %v11139_v63, %v122_v52  ;;  %vm169_vm11 = vcmp.eq.s32.totalorder %v11139_v63, %v125_v51 }
  0xb3   :  { %v7912_v54 = vsel %vm168_vm10, 1.0, %v14653_v2  ;;  %v7913_v57 = vsel %vm169_vm11, 1.0, %v14653_v2  ;;  %vm3462_vm10 = vcmp.lt.s32.totalorder %v11265_v16, 1 }
  0xb4   :  { %9220 = vmatmul.mubr.msk.f32.gmra.mrb[22].mxu0 %vm243_vm0, %v7911_v53 }
  0xb5   :  { %v131_v55 = vpop.permute.xlu1 %130  ;;  %9222 = vmatprep.mubr.msk.f32.mxu0 %vm243_vm0, %v7912_v54  ;;  %v128_v56 = vpop.permute.xlu0 %127 }
  0xb6   :  { %vm170_vm12 = vcmp.eq.s32.totalorder %v11139_v63, %v128_v56  ;;  %vm171_vm13 = vcmp.eq.s32.totalorder %v11139_v63, %v131_v55 }
  0xb7   :  { %v7914_v58 = vsel %vm170_vm12, 1.0, %v14653_v2  ;;  %v7915_v61 = vsel %vm171_vm13, 1.0, %v14653_v2 }
  0xb8   :  { %9223 = vmatmul.mubr.msk.f32.gmra.mrb[24].mxu0 %vm243_vm0, %v7913_v57 }
  0xb9   :  { %v137_v59 = vpop.permute.xlu1 %136  ;;  %9225 = vmatprep.mubr.msk.f32.mxu0 %vm243_vm0, %v7914_v58  ;;  %v134_v60 = vpop.permute.xlu0 %133 }
  0xba   :  { %vm172_vm14 = vcmp.eq.s32.totalorder %v11139_v63, %v134_v60  ;;  %vm173_vm15 = vcmp.eq.s32.totalorder %v11139_v63, %v137_v59 }
  0xbb   :  { %v7916_v0 = vsel %vm172_vm14, 1.0, %v14653_v2  ;;  %v7917_v4 = vsel %vm173_vm15, 1.0, %v14653_v2 }
  0xbc   :  { %9226 = vmatmul.mubr.msk.f32.gmra.mrb[26].mxu0 %vm243_vm0, %v7915_v61 }
  0xbd   :  { %v143_v1 = vpop.permute.xlu1 %142  ;;  %9228 = vmatprep.mubr.msk.f32.mxu0 %vm243_vm0, %v7916_v0  ;;  %v140_v3 = vpop.permute.xlu0 %139 }
  0xbe   :  { %vm174_vm1 = vcmp.eq.s32.totalorder %v11139_v63, %v140_v3  ;;  %vm175_vm2 = vcmp.eq.s32.totalorder %v11139_v63, %v143_v1 }
  0xbf   :  { %v7918_v5 = vsel %vm174_vm1, 1.0, %v14653_v2  ;;  %v7919_v6 = vsel %vm175_vm2, 1.0, %v14653_v2 }
  0xc0   :  { %9229 = vmatmul.mubr.msk.f32.gmra.mrb[28].mxu0 %vm243_vm0, %v7917_v4 }
  0xc1   :  { %9231 = vmatprep.mubr.msk.f32.mxu0 %vm243_vm0, %v7918_v5 }
  0xc4   :  { %9232 = vmatmul.mubr.msk.f32.gmra.mrb[30].mxu0 %vm243_vm0, %v7919_v6  ;;  %vm930_vm0 = vcmp.lt.s32.totalorder %v11265_v16, 7 }
 0x15b   :  { %v11279_v62 = vpop.f32.mrb[0].mxu0 }
 0x15c   :  { %14742 = vst [vmem:[#allocation5_spill] sm:$0xff] %v11279_v62  ;;  %v11291_v23 = vpop.f32.mrb[1].mxu0  ;;  %v897_v24 = vrot.slane %v11279_v62, 1  ;;  %v1321_v25 = vrot.slane %v11279_v62, 2  ;;  %v1743_v26 = vrot.slane %v11279_v62, 3  ;;  %v2165_v27 = vrot.slane %v11279_v62, 4 }
 0x15d   :  { %14743 = vst [vmem:[#allocation6_spill] sm:$0xff] %v11291_v23  ;;  %9242 = vmatprep.mubr.msk.f32.mxu0 %vm574_vm3, %v11291_v23  ;;  %v14660_v28 = vrot.slane %v11291_v23, 1  ;;  %v14659_v29 = vrot.slane %v11291_v23, 2  ;;  %v14658_v32 = vrot.slane %v11291_v23, 3  ;;  %v14656_v33 = vrot.slane %v11291_v23, 4 }
 0x15e   :  { %9243 = vmatmul.mubr.msk.f32.vlgmr.msra.gmra.mrb[32].mxu0 %vm574_vm3, %v11279_v62  ;;  %v14655_v36 = vrot.slane %v11291_v23, 5  ;;  %v14657_v37 = vrot.slane %v11279_v62, 5 }
 0x15f   :  { %v11317_v38 = vpop.f32.mrb[2].mxu0  ;;  %v11323_v39 = vsel %vm930_vm0, %v14660_v28, %v897_v24  ;;  %v11329_v40 = vsel %vm1352_vm4, %v14659_v29, %v1321_v25  ;;  %v11335_v41 = vsel %vm1774_vm5, %v14658_v32, %v1743_v26  ;;  %v11341_v42 = vsel %vm2196_vm6, %v14656_v33, %v2165_v27 }
 0x160   :  { %14744 = vst [vmem:[#allocation7_spill] sm:$0xff] %v11317_v38  ;;  %14745 = vst [vmem:[#allocation8_spill] sm:$0xff] %v11323_v39  ;;  %v11343_v43 = vpop.f32.mrb[3].mxu0  ;;  %9298 = vmatprep.mubr.msk.f32.mxu1 %vm574_vm3, %v11323_v39  ;;  %v899_v44 = vrot.slane %v11317_v38, 1  ;;  %v1323_v45 = vrot.slane %v11317_v38, 2  ;;  %v1745_v46 = vrot.slane %v11317_v38, 3  ;;  %v11366_v53 = vsel %vm2618_vm7, %v14655_v36, %v14657_v37 }
 0x161   :  { %14746 = vst [vmem:[#allocation9_spill] sm:$0xff] %v11335_v41  ;;  %14747 = vst [vmem:[#allocation10_spill] sm:$0xff] %v11341_v42  ;;  %9245 = vmatprep.mubr.msk.f32.mxu0 %vm574_vm3, %v11343_v43  ;;  %v898_v48 = vrot.slane %v11343_v43, 1  ;;  %v1322_v49 = vrot.slane %v11343_v43, 2  ;;  %v1744_v50 = vrot.slane %v11343_v43, 3  ;;  %v2167_v51 = vrot.slane %v11317_v38, 4 }
 0x162   :  { %14748 = vst [vmem:[#allocation11_spill] sm:$0xff] %v11343_v43  ;;  %9246 = vmatmul.mubr.msk.f32.gmra.mrb[34].mxu0 %vm574_vm3, %v11317_v38  ;;  %v2166_v52 = vrot.slane %v11343_v43, 4  ;;  %14749 = vst [vmem:[#allocation12_spill] sm:$0xff] %v11366_v53 }
 0x163   :  { %v11370_v56 = vpop.f32.mrb[4].mxu0  ;;  %v11374_v57 = vsel %vm930_vm0, %v897_v24, %v898_v48  ;;  %v11378_v58 = vsel %vm930_vm0, %v898_v48, %v899_v44  ;;  %v11382_v59 = vsel %vm1352_vm4, %v1321_v25, %v1322_v49  ;;  %v11386_v60 = vsel %vm1352_vm4, %v1322_v49, %v1323_v45 }
 0x164   :  { %14750 = vst [vmem:[#allocation13_spill] sm:$0xff] %v11370_v56  ;;  %14751 = vst [vmem:[#allocation14_spill] sm:$0xff] %v11374_v57  ;;  %v11388_v61 = vpop.f32.mrb[5].mxu0  ;;  %9299 = vmatmul.mubr.msk.f32.vlgmr.msra.gmra.mrb[0].mxu1 %vm574_vm3, %v11374_v57  ;;  %v901_v0 = vrot.slane %v11370_v56, 1  ;;  %v1325_v1 = vrot.slane %v11370_v56, 2  ;;  %v11396_v3 = vsel %vm1774_vm5, %v1743_v26, %v1744_v50  ;;  %v11400_v4 = vsel %vm1774_vm5, %v1744_v50, %v1745_v46 }
 0x165   :  { %14752 = vst [vmem:[#allocation15_spill] sm:$0xff] %v11378_v58  ;;  %14753 = vst [vmem:[#allocation16_spill] sm:$0xff] %v11388_v61  ;;  %9248 = vmatprep.mubr.msk.f32.mxu0 %vm574_vm3, %v11388_v61  ;;  %9301 = vmatprep.mubr.msk.f32.mxu1 %vm574_vm3, %v11378_v58  ;;  %v900_v5 = vrot.slane %v11388_v61, 1  ;;  %v1324_v6 = vrot.slane %v11388_v61, 2  ;;  %v1746_v7 = vrot.slane %v11388_v61, 3  ;;  %v1747_v8 = vrot.slane %v11370_v56, 3 }
 0x166   :  { %14754 = vst [vmem:[#allocation17_spill] sm:$0xff] %v11396_v3  ;;  %14755 = vst [vmem:[#allocation18_spill] sm:$0xff] %v11400_v4  ;;  %9249 = vmatmul.mubr.msk.f32.gmra.mrb[36].mxu0 %vm574_vm3, %v11370_v56  ;;  %10208 = vmatpush3.bf16.msra.mxu1 %v11261_v15  ;;  %v11415_v9 = vsel %vm2196_vm6, %v2165_v27, %v2166_v52  ;;  %v11419_v10 = vsel %vm2196_vm6, %v2166_v52, %v2167_v51  ;;  %v2168_v11 = vrot.slane %v11388_v61, 4 }
 0x167   :  { %14756 = vst [vmem:[#allocation19_spill] sm:$0xff] %v11415_v9  ;;  %14757 = vst [vmem:[#allocation20_spill] sm:$0xff] %v11419_v10  ;;  %v2169_v12 = vrot.slane %v11370_v56, 4  ;;  %v11423_v13 = vpop.f32.mrb[6].mxu0  ;;  %v11427_v14 = vsel %vm930_vm0, %v899_v44, %v900_v5  ;;  %v11431_v15 = vsel %vm930_vm0, %v900_v5, %v901_v0  ;;  %10210 = vmatprep.subr.bf16.mxu1 %v11281_v20 }
 0x168   :  { %14758 = vst [vmem:[#allocation21_spill] sm:$0xff] %v11423_v13  ;;  %14759 = vst [vmem:[#allocation22_spill] sm:$0xff] %v11427_v14  ;;  %v11436_v17 = vsel %vm1352_vm4, %v1323_v45, %v1324_v6  ;;  %v11440_v18 = vsel %vm1352_vm4, %v1324_v6, %v1325_v1  ;;  %v11442_v21 = vpop.f32.mrb[7].mxu0  ;;  %9302 = vmatmul.mubr.msk.f32.gmra.mrb[2].mxu1 %vm574_vm3, %v11427_v14  ;;  %v903_v22 = vrot.slane %v11423_v13, 1  ;;  %v1327_v24 = vrot.slane %v11423_v13, 2 }
 0x169   :  { %14760 = vst [vmem:[#allocation23_spill] sm:$0xff] %v11431_v15  ;;  %14761 = vst [vmem:[#allocation24_spill] sm:$0xff] %v11442_v21  ;;  %v11450_v25 = vsel %vm1774_vm5, %v1745_v46, %v1746_v7  ;;  %v11454_v26 = vsel %vm1774_vm5, %v1746_v7, %v1747_v8  ;;  %9251 = vmatprep.mubr.msk.f32.mxu0 %vm574_vm3, %v11442_v21  ;;  %9304 = vmatprep.mubr.msk.f32.mxu1 %vm574_vm3, %v11431_v15  ;;  %v902_v27 = vrot.slane %v11442_v21, 1 }
 0x16a   :  { %14762 = vst [vmem:[#allocation25_spill] sm:$0xff] %v11450_v25  ;;  %14763 = vst [vmem:[#allocation26_spill] sm:$0xff] %v11454_v26  ;;  %v1326_v30 = vrot.slane %v11442_v21, 2  ;;  %v1748_v31 = vrot.slane %v11442_v21, 3  ;;  %v1749_v44 = vrot.slane %v11423_v13, 3  ;;  %9252 = vmatmul.mubr.msk.f32.gmra.mrb[38].mxu0 %vm574_vm3, %v11423_v13  ;;  %10212 = vmatpush3.bf16.msra.mxu1 %v11281_v20  ;;  %v11469_v45 = vsel %vm2196_vm6, %v2167_v51, %v2168_v11 }
 0x16b   :  { %14764 = vst [vmem:[#allocation27_spill] sm:$0xff] %v11469_v45  ;;  %v11473_v46 = vsel %vm2196_vm6, %v2168_v11, %v2169_v12  ;;  %v2170_v48 = vrot.slane %v11442_v21, 4  ;;  %v2171_v49 = vrot.slane %v11423_v13, 4  ;;  %v11477_v50 = vpop.f32.mrb[8].mxu0  ;;  %v11481_v52 = vsel %vm930_vm0, %v901_v0, %v902_v27  ;;  %10214 = vmatprep.subr.bf16.mxu1 %v11311_v34 }
 0x16c   :  { %14765 = vst [vmem:[#allocation28_spill] sm:$0xff] %v11473_v46  ;;  %14766 = vst [vmem:[#allocation29_spill] sm:$0xff] %v11477_v50  ;;  %v11485_v20 = vsel %vm930_vm0, %v902_v27, %v903_v22  ;;  %v11489_v51 = vsel %vm1352_vm4, %v1325_v1, %v1326_v30  ;;  %v11493_v5 = vsel %vm1352_vm4, %v1326_v30, %v1327_v24  ;;  %v11496_v6 = vpop.f32.mrb[9].mxu0  ;;  %9305 = vmatmul.mubr.msk.f32.gmra.mrb[4].mxu1 %vm574_vm3, %v11481_v52 }
 0x16d   :  { %14767 = vst [vmem:[#allocation30_spill] sm:$0xff] %v11481_v52  ;;  %14768 = vst [vmem:[#allocation31_spill] sm:$0xff] %v11485_v20  ;;  %v905_v0 = vrot.slane %v11477_v50, 1  ;;  %v1329_v7 = vrot.slane %v11477_v50, 2  ;;  %v11504_v11 = vsel %vm1774_vm5, %v1747_v8, %v1748_v31  ;;  %v11508_v1 = vsel %vm1774_vm5, %v1748_v31, %v1749_v44  ;;  %9254 = vmatprep.mubr.msk.f32.mxu0 %vm574_vm3, %v11496_v6 }
 0x16e   :  { %14769 = vst [vmem:[#allocation32_spill] sm:$0xff] %v11496_v6  ;;  %14770 = vst [vmem:[#allocation33_spill] sm:$0xff] %v11504_v11  ;;  %9307 = vmatprep.mubr.msk.f32.mxu1 %vm574_vm3, %v11485_v20  ;;  %v904_v27 = vrot.slane %v11496_v6, 1  ;;  %v1328_v30 = vrot.slane %v11496_v6, 2  ;;  %v1750_v2 = vrot.slane %v11496_v6, 3  ;;  %v1751_v36 = vrot.slane %v11477_v50, 3  ;;  %9255 = vmatmul.mubr.msk.f32.gmra.mrb[40].mxu0 %vm574_vm3, %v11477_v50 }
 0x16f   :  { %14771 = vst [vmem:[#allocation34_spill] sm:$0xff] %v11508_v1  ;;  %v11522_v8 = vsel %vm2196_vm6, %v2169_v12, %v2170_v48  ;;  %v11526_v31 = vsel %vm2196_vm6, %v2170_v48, %v2171_v49  ;;  %v2172_v47 = vrot.slane %v11496_v6, 4  ;;  %v2173_v33 = vrot.slane %v11477_v50, 4  ;;  %v11530_v55 = vpop.f32.mrb[10].mxu0 }
 0x170   :  { %14772 = vst [vmem:[#allocation35_spill] sm:$0xff] %v11522_v8  ;;  %14773 = vst [vmem:[#allocation36_spill] sm:$0xff] %v11526_v31  ;;  %v11534_v37 = vsel %vm930_vm0, %v903_v22, %v904_v27  ;;  %v11538_v54 = vsel %vm930_vm0, %v904_v27, %v905_v0  ;;  %v11542_v12 = vsel %vm1352_vm4, %v1327_v24, %v1328_v30  ;;  %v11548_v32 = vpop.f32.mrb[11].mxu0  ;;  %v907_v22 = vrot.slane %v11530_v55, 1 }
 0x171   :  { %14774 = vst [vmem:[#allocation37_spill] sm:$0xff] %v11530_v55  ;;  %14775 = vst [vmem:[#allocation38_spill] sm:$0xff] %v11534_v37  ;;  %v11546_v48 = vsel %vm1352_vm4, %v1328_v30, %v1329_v7  ;;  %9308 = vmatmul.mubr.msk.f32.gmra.mrb[6].mxu1 %vm574_vm3, %v11534_v37  ;;  %v1331_v29 = vrot.slane %v11530_v55, 2  ;;  %v11556_v27 = vsel %vm1774_vm5, %v1749_v44, %v1750_v2  ;;  %9257 = vmatprep.mubr.msk.f32.mxu0 %vm574_vm3, %v11548_v32 }
 0x172   :  { %14776 = vst [vmem:[#allocation39_spill] sm:$0xff] %v11538_v54  ;;  %14777 = vst [vmem:[#allocation40_spill] sm:$0xff] %v11548_v32  ;;  %v11560_v24 = vsel %vm1774_vm5, %v1750_v2, %v1751_v36  ;;  %9310 = vmatprep.mubr.msk.f32.mxu1 %vm574_vm3, %v11538_v54  ;;  %v906_v30 = vrot.slane %v11548_v32, 1  ;;  %v1330_v28 = vrot.slane %v11548_v32, 2  ;;  %v1752_v63 = vrot.slane %v11548_v32, 3  ;;  %9258 = vmatmul.mubr.msk.f32.gmra.mrb[42].mxu0 %vm574_vm3, %v11530_v55 }
 0x173   :  { %14778 = vst [vmem:[#allocation41_spill] sm:$0xff] %v11556_v27  ;;  %14779 = vst [vmem:[#allocation42_spill] sm:$0xff] %v11560_v24  ;;  %v1753_v39 = vrot.slane %v11530_v55, 3  ;;  %v11574_v2 = vsel %vm2196_vm6, %v2171_v49, %v2172_v47  ;;  %v11578_v44 = vsel %vm2196_vm6, %v2172_v47, %v2173_v33  ;;  %v2174_v54 = vrot.slane %v11548_v32, 4  ;;  %v11582_v20 = vpop.f32.mrb[12].mxu0 }
 0x174   :  { %14780 = vst [vmem:[#allocation43_spill] sm:$0xff] %v11574_v2  ;;  %14781 = vst [vmem:[#allocation44_spill] sm:$0xff] %v11578_v44  ;;  %v2175_v37 = vrot.slane %v11530_v55, 4  ;;  %v11586_v52 = vsel %vm930_vm0, %v905_v0, %v906_v30  ;;  %v11590_v15 = vsel %vm930_vm0, %v906_v30, %v907_v22  ;;  %v11594_v49 = vsel %vm1352_vm4, %v1329_v7, %v1330_v28  ;;  %v11600_v14 = vpop.f32.mrb[13].mxu0 }
 0x175   :  { %14782 = vst [vmem:[#allocation45_spill] sm:$0xff] %v11582_v20  ;;  %14783 = vst [vmem:[#allocation46_spill] sm:$0xff] %v11586_v52  ;;  %v11598_v47 = vsel %vm1352_vm4, %v1330_v28, %v1331_v29  ;;  %9311 = vmatmul.mubr.msk.f32.gmra.mrb[8].mxu1 %vm574_vm3, %v11586_v52  ;;  %v909_v0 = vrot.slane %v11582_v20, 1  ;;  %v1333_v58 = vrot.slane %v11582_v20, 2  ;;  %v11608_v30 = vsel %vm1774_vm5, %v1751_v36, %v1752_v63 }
 0x176   :  { %14784 = vst [vmem:[#allocation47_spill] sm:$0xff] %v11590_v15  ;;  %14785 = vst [vmem:[#allocation48_spill] sm:$0xff] %v11594_v49  ;;  %v11612_v7 = vsel %vm1774_vm5, %v1752_v63, %v1753_v39  ;;  %9260 = vmatprep.mubr.msk.f32.mxu0 %vm574_vm3, %v11600_v14  ;;  %9313 = vmatprep.mubr.msk.f32.mxu1 %vm574_vm3, %v11590_v15  ;;  %v908_v28 = vrot.slane %v11600_v14, 1  ;;  %v1332_v52 = vrot.slane %v11600_v14, 2  ;;  %v1754_v57 = vrot.slane %v11600_v14, 3 }
 0x177   :  { %14786 = vst [vmem:[#allocation49_spill] sm:$0xff] %v11598_v47  ;;  %14787 = vst [vmem:[#allocation50_spill] sm:$0xff] %v11600_v14  ;;  %v1755_v53 = vrot.slane %v11582_v20, 3  ;;  %9261 = vmatmul.mubr.msk.f32.gmra.mrb[44].mxu0 %vm574_vm3, %v11582_v20  ;;  %v11626_v63 = vsel %vm2196_vm6, %v2173_v33, %v2174_v54  ;;  %v11630_v36 = vsel %vm2196_vm6, %v2174_v54, %v2175_v37  ;;  %v2176_v15 = vrot.slane %v11600_v14, 4  ;;  %v11634_v2 = vpop.f32.mrb[14].mxu0 }
 0x178   :  { %14788 = vst [vmem:[#allocation51_spill] sm:$0xff] %v11608_v30  ;;  %14789 = vst [vmem:[#allocation52_spill] sm:$0xff] %v11612_v7  ;;  %v2177_v44 = vrot.slane %v11582_v20, 4  ;;  %v11638_v31 = vsel %vm930_vm0, %v907_v22, %v908_v28  ;;  %v11642_v8 = vsel %vm930_vm0, %v908_v28, %v909_v0  ;;  %v11646_v33 = vsel %vm1352_vm4, %v1331_v29, %v1332_v52 }
 0x179   :  { %14790 = vst [vmem:[#allocation53_spill] sm:$0xff] %v11626_v63  ;;  %14791 = vst [vmem:[#allocation54_spill] sm:$0xff] %v11630_v36  ;;  %v11650_v54 = vsel %vm1352_vm4, %v1332_v52, %v1333_v58  ;;  %v11652_v36 = vpop.f32.mrb[15].mxu0  ;;  %9314 = vmatmul.mubr.msk.f32.gmra.mrb[10].mxu1 %vm574_vm3, %v11638_v31  ;;  %v911_v22 = vrot.slane %v11634_v2, 1  ;;  %v1335_v63 = vrot.slane %v11634_v2, 2  ;;  %v11660_v28 = vsel %vm1774_vm5, %v1753_v39, %v1754_v57 }
 0x17a   :  { %14792 = vst [vmem:[#allocation55_spill] sm:$0xff] %v11634_v2  ;;  %14793 = vst [vmem:[#allocation56_spill] sm:$0xff] %v11638_v31  ;;  %v11664_v29 = vsel %vm1774_vm5, %v1754_v57, %v1755_v53  ;;  %9263 = vmatprep.mubr.msk.f32.mxu0 %vm574_vm3, %v11652_v36  ;;  %9316 = vmatprep.mubr.msk.f32.mxu1 %vm574_vm3, %v11642_v8  ;;  %v910_v52 = vrot.slane %v11652_v36, 1  ;;  %v1334_v31 = vrot.slane %v11652_v36, 2  ;;  %v1756_v46 = vrot.slane %v11652_v36, 3 }
 0x17b   :  { %14794 = vst [vmem:[#allocation57_spill] sm:$0xff] %v11642_v8  ;;  %14795 = vst [vmem:[#allocation58_spill] sm:$0xff] %v11646_v33  ;;  %v1757_v45 = vrot.slane %v11634_v2, 3  ;;  %9264 = vmatmul.mubr.msk.f32.gmra.mrb[46].mxu0 %vm574_vm3, %v11634_v2  ;;  %v11678_v39 = vsel %vm2196_vm6, %v2175_v37, %v2176_v15  ;;  %v11682_v57 = vsel %vm2196_vm6, %v2176_v15, %v2177_v44  ;;  %v2178_v8 = vrot.slane %v11652_v36, 4  ;;  %v11686_v9 = vpop.f32.mrb[16].mxu0 }
 0x17c   :  { %14796 = vst [vmem:[#allocation59_spill] sm:$0xff] %v11650_v54  ;;  %14797 = vst [vmem:[#allocation60_spill] sm:$0xff] %v11652_v36  ;;  %v2179_v10 = vrot.slane %v11634_v2, 4  ;;  %v11690_v42 = vsel %vm930_vm0, %v909_v0, %v910_v52  ;;  %v11698_v37 = vsel %vm1352_vm4, %v1333_v58, %v1334_v31  ;;  %v11702_v15 = vsel %vm1352_vm4, %v1334_v31, %v1335_v63 }
 0x17d   :  { %14798 = vst [vmem:[#allocation61_spill] sm:$0xff] %v11660_v28  ;;  %14799 = vst [vmem:[#allocation62_spill] sm:$0xff] %v11664_v29  ;;  %v11694_v29 = vsel %vm930_vm0, %v910_v52, %v911_v22  ;;  %9317 = vmatmul.mubr.msk.f32.gmra.mrb[12].mxu1 %vm574_vm3, %v11690_v42  ;;  %v913_v0 = vrot.slane %v11686_v9, 1  ;;  %v11712_v52 = vsel %vm1774_vm5, %v1755_v53, %v1756_v46  ;;  %v1759_v7 = vrot.slane %v11686_v9, 3 }
 0x17e   :  { %14800 = vst [vmem:[#allocation63_spill] sm:$0xff] %v11678_v39  ;;  %14801 = vst [vmem:[#allocation64_spill] sm:$0xff] %v11682_v57  ;;  %v11704_v57 = vpop.f32.mrb[17].mxu0  ;;  %v1337_v39 = vrot.slane %v11686_v9, 2  ;;  %v11716_v58 = vsel %vm1774_vm5, %v1756_v46, %v1757_v45  ;;  %9319 = vmatprep.mubr.msk.f32.mxu1 %vm574_vm3, %v11694_v29  ;;  %v11730_v53 = vsel %vm2196_vm6, %v2177_v44, %v2178_v8  ;;  %v14692_v49 = vmov 1.0  }
 0x17f   :  { %14802 = vst [vmem:[#allocation65_spill] sm:$0xff] %v11686_v9  ;;  %14803 = vst [vmem:[#allocation66_spill] sm:$0xff] %v11690_v42  ;;  %9266 = vmatprep.mubr.msk.f32.mxu0 %vm574_vm3, %v11704_v57  ;;  %v912_v31 = vrot.slane %v11704_v57, 1  ;;  %v1336_v42 = vrot.slane %v11704_v57, 2  ;;  %v1758_v28 = vrot.slane %v11704_v57, 3  ;;  %v11734_v46 = vsel %vm2196_vm6, %v2178_v8, %v2179_v10 }
 0x180   :  { %14804 = vst [vmem:[#allocation67_spill] sm:$0xff] %v11694_v29  ;;  %14805 = vst [vmem:[#allocation68_spill] sm:$0xff] %v11698_v37  ;;  %9267 = vmatmul.mubr.msk.f32.gmra.mrb[48].mxu0 %vm574_vm3, %v11686_v9  ;;  %v2180_v29 = vrot.slane %v11704_v57, 4 }
 0x181   :  { %14806 = vst [vmem:[#allocation69_spill] sm:$0xff] %v11702_v15  ;;  %14807 = vst [vmem:[#allocation70_spill] sm:$0xff] %v11704_v57  ;;  %v11742_v30 = vsel %vm930_vm0, %v911_v22, %v912_v31  ;;  %v11746_v24 = vsel %vm930_vm0, %v912_v31, %v913_v0  ;;  %v11750_v44 = vsel %vm1352_vm4, %v1335_v63, %v1336_v42 }
 0x182   :  { %14808 = vst [vmem:[#allocation71_spill] sm:$0xff] %v11712_v52  ;;  %14809 = vst [vmem:[#allocation72_spill] sm:$0xff] %v11716_v58  ;;  %v2181_v58 = vrot.slane %v11686_v9, 4  ;;  %v11738_v52 = vpop.f32.mrb[18].mxu0  ;;  %v11754_v8 = vsel %vm1352_vm4, %v1336_v42, %v1337_v39  ;;  %9320 = vmatmul.mubr.msk.f32.gmra.mrb[14].mxu1 %vm574_vm3, %v11742_v30  ;;  %v11764_v31 = vsel %vm1774_vm5, %v1757_v45, %v1758_v28 }
 0x183   :  { %14810 = vst [vmem:[#allocation73_spill] sm:$0xff] %v11730_v53  ;;  %14811 = vst [vmem:[#allocation74_spill] sm:$0xff] %v11734_v46  ;;  %v11756_v46 = vpop.f32.mrb[19].mxu0  ;;  %v915_v22 = vrot.slane %v11738_v52, 1  ;;  %v1339_v53 = vrot.slane %v11738_v52, 2  ;;  %v11768_v63 = vsel %vm1774_vm5, %v1758_v28, %v1759_v7  ;;  %9322 = vmatprep.mubr.msk.f32.mxu1 %vm574_vm3, %v11746_v24  ;;  %v1761_v1 = vrot.slane %v11738_v52, 3 }
 0x184   :  { %14812 = vst [vmem:[#allocation75_spill] sm:$0xff] %v11738_v52  ;;  %14813 = vst [vmem:[#allocation76_spill] sm:$0xff] %v11742_v30  ;;  %9269 = vmatprep.mubr.msk.f32.mxu0 %vm574_vm3, %v11756_v46  ;;  %v914_v42 = vrot.slane %v11756_v46, 1  ;;  %v1338_v30 = vrot.slane %v11756_v46, 2  ;;  %v1760_v27 = vrot.slane %v11756_v46, 3  ;;  %v11782_v45 = vsel %vm2196_vm6, %v2179_v10, %v2180_v29 }
 0x185   :  { %14814 = vst [vmem:[#allocation77_spill] sm:$0xff] %v11746_v24  ;;  %14815 = vst [vmem:[#allocation78_spill] sm:$0xff] %v11750_v44  ;;  %9270 = vmatmul.mubr.msk.f32.gmra.mrb[50].mxu0 %vm574_vm3, %v11738_v52  ;;  %v11786_v28 = vsel %vm2196_vm6, %v2180_v29, %v2181_v58  ;;  %v2182_v24 = vrot.slane %v11756_v46, 4 }
 0x186   :  { %14816 = vst [vmem:[#allocation79_spill] sm:$0xff] %v11754_v8  ;;  %14817 = vst [vmem:[#allocation80_spill] sm:$0xff] %v11764_v31  ;;  %v11790_v31 = vpop.f32.mrb[20].mxu0  ;;  %v11794_v11 = vsel %vm930_vm0, %v913_v0, %v914_v42  ;;  %v11798_v26 = vsel %vm930_vm0, %v914_v42, %v915_v22  ;;  %v11802_v10 = vsel %vm1352_vm4, %v1337_v39, %v1338_v30 }
 0x187   :  { %14818 = vst [vmem:[#allocation81_spill] sm:$0xff] %v11768_v63  ;;  %14819 = vst [vmem:[#allocation82_spill] sm:$0xff] %v11782_v45  ;;  %v2183_v63 = vrot.slane %v11738_v52, 4  ;;  %v11806_v29 = vsel %vm1352_vm4, %v1338_v30, %v1339_v53  ;;  %9323 = vmatmul.mubr.msk.f32.gmra.mrb[16].mxu1 %vm574_vm3, %v11794_v11  ;;  %v917_v0 = vrot.slane %v11790_v31, 1  ;;  %v1341_v45 = vrot.slane %v11790_v31, 2 }
 0x188   :  { %14820 = vst [vmem:[#allocation83_spill] sm:$0xff] %v11786_v28  ;;  %14821 = vst [vmem:[#allocation84_spill] sm:$0xff] %v11790_v31  ;;  %v11808_v28 = vpop.f32.mrb[21].mxu0  ;;  %v11816_v42 = vsel %vm1774_vm5, %v1759_v7, %v1760_v27  ;;  %v11820_v39 = vsel %vm1774_vm5, %v1760_v27, %v1761_v1  ;;  %9325 = vmatprep.mubr.msk.f32.mxu1 %vm574_vm3, %v11798_v26  ;;  %v1763_v27 = vrot.slane %v11790_v31, 3 }
 0x189   :  { %14822 = vst [vmem:[#allocation85_spill] sm:$0xff] %v11794_v11  ;;  %14823 = vst [vmem:[#allocation86_spill] sm:$0xff] %v11798_v26  ;;  %9272 = vmatprep.mubr.msk.f32.mxu0 %vm574_vm3, %v11808_v28  ;;  %v916_v30 = vrot.slane %v11808_v28, 1  ;;  %v1340_v11 = vrot.slane %v11808_v28, 2  ;;  %v1762_v25 = vrot.slane %v11808_v28, 3  ;;  %v11835_v7 = vsel %vm2196_vm6, %v2181_v58, %v2182_v24 }
 0x18a   :  { %14824 = vst [vmem:[#allocation87_spill] sm:$0xff] %v11802_v10  ;;  %14825 = vst [vmem:[#allocation88_spill] sm:$0xff] %v11806_v29  ;;  %9273 = vmatmul.mubr.msk.f32.gmra.mrb[52].mxu0 %vm574_vm3, %v11790_v31  ;;  %v11839_v26 = vsel %vm2196_vm6, %v2182_v24, %v2183_v63 }
 0x18b   :  { %14826 = vst [vmem:[#allocation89_spill] sm:$0xff] %v11808_v28  ;;  %14827 = vst [vmem:[#allocation90_spill] sm:$0xff] %v11816_v42  ;;  %v11842_v42 = vpop.f32.mrb[22].mxu0  ;;  %v11846_v4 = vsel %vm930_vm0, %v915_v22, %v916_v30  ;;  %v11850_v3 = vsel %vm930_vm0, %v916_v30, %v917_v0  ;;  %v11854_v58 = vsel %vm1352_vm4, %v1339_v53, %v1340_v11 }
 0x18c   :  { %14828 = vst [vmem:[#allocation91_spill] sm:$0xff] %v11820_v39  ;;  %14829 = vst [vmem:[#allocation92_spill] sm:$0xff] %v11835_v7  ;;  %v2184_v39 = vrot.slane %v11808_v28, 4  ;;  %v11858_v24 = vsel %vm1352_vm4, %v1340_v11, %v1341_v45  ;;  %9326 = vmatmul.mubr.msk.f32.gmra.mrb[18].mxu1 %vm574_vm3, %v11846_v4  ;;  %v919_v22 = vrot.slane %v11842_v42, 1  ;;  %v1343_v7 = vrot.slane %v11842_v42, 2 }
 0x18d   :  { %14830 = vst [vmem:[#allocation93_spill] sm:$0xff] %v11839_v26  ;;  %14831 = vst [vmem:[#allocation94_spill] sm:$0xff] %v11842_v42  ;;  %v11860_v26 = vpop.f32.mrb[23].mxu0  ;;  %v11868_v30 = vsel %vm1774_vm5, %v1761_v1, %v1762_v25  ;;  %v11872_v53 = vsel %vm1774_vm5, %v1762_v25, %v1763_v27  ;;  %9328 = vmatprep.mubr.msk.f32.mxu1 %vm574_vm3, %v11850_v3  ;;  %v2185_v1 = vrot.slane %v11790_v31, 4 }
 0x18e   :  { %14832 = vst [vmem:[#allocation95_spill] sm:$0xff] %v11846_v4  ;;  %14833 = vst [vmem:[#allocation96_spill] sm:$0xff] %v11850_v3  ;;  %9275 = vmatprep.mubr.msk.f32.mxu0 %vm574_vm3, %v11860_v26  ;;  %v918_v11 = vrot.slane %v11860_v26, 1  ;;  %v1342_v4 = vrot.slane %v11860_v26, 2  ;;  %v1764_v41 = vrot.slane %v11860_v26, 3  ;;  %v11886_v25 = vsel %vm2196_vm6, %v2183_v63, %v2184_v39  ;;  %v15022_v16 = vld [vmem:[#allocation82_spill] sm:$0xff] }
 0x18f   :  { %14834 = vst [vmem:[#allocation97_spill] sm:$0xff] %v11854_v58  ;;  %14835 = vst [vmem:[#allocation98_spill] sm:$0xff] %v11858_v24  ;;  %v1765_v24 = vrot.slane %v11842_v42, 3  ;;  %9276 = vmatmul.mubr.msk.f32.gmra.mrb[54].mxu0 %vm574_vm3, %v11842_v42  ;;  %v2187_v3 = vrot.slane %v11842_v42, 4 }
 0x190   :  { %14836 = vst [vmem:[#allocation99_spill] sm:$0xff] %v11860_v26  ;;  %14837 = vst [vmem:[#allocation100_spill] sm:$0xff] %v11868_v30  ;;  %v11891_v30 = vpop.f32.mrb[24].mxu0  ;;  %v11895_v58 = vsel %vm930_vm0, %v917_v0, %v918_v11  ;;  %v11899_v29 = vsel %vm930_vm0, %v918_v11, %v919_v22  ;;  %v11903_v63 = vsel %vm1352_vm4, %v1341_v45, %v1342_v4 }
 0x191   :  { %14838 = vst [vmem:[#allocation101_spill] sm:$0xff] %v11872_v53  ;;  %14839 = vst [vmem:[#allocation102_spill] sm:$0xff] %v11886_v25  ;;  %v2186_v53 = vrot.slane %v11860_v26, 4  ;;  %v11907_v25 = vsel %vm1352_vm4, %v1342_v4, %v1343_v7  ;;  %v11909_v10 = vpop.f32.mrb[25].mxu0  ;;  %9329 = vmatmul.mubr.msk.f32.gmra.mrb[20].mxu1 %vm574_vm3, %v11895_v58  ;;  %v921_v0 = vrot.slane %v11891_v30, 1  ;;  %v1345_v8 = vrot.slane %v11891_v30, 2 }
 0x192   :  { %14840 = vst [vmem:[#allocation103_spill] sm:$0xff] %v11891_v30  ;;  %14841 = vst [vmem:[#allocation104_spill] sm:$0xff] %v11895_v58  ;;  %v11917_v11 = vsel %vm1774_vm5, %v1763_v27, %v1764_v41  ;;  %v11921_v45 = vsel %vm1774_vm5, %v1764_v41, %v1765_v24  ;;  %9278 = vmatprep.mubr.msk.f32.mxu0 %vm574_vm3, %v11909_v10  ;;  %9331 = vmatprep.mubr.msk.f32.mxu1 %vm574_vm3, %v11899_v29  ;;  %v920_v4 = vrot.slane %v11909_v10, 1  ;;  %v11948_v44 = vpop.f32.mrb[26].mxu0 }
 0x193   :  { %14842 = vst [vmem:[#allocation105_spill] sm:$0xff] %v11899_v29  ;;  %14843 = vst [vmem:[#allocation106_spill] sm:$0xff] %v11903_v63  ;;  %v1344_v58 = vrot.slane %v11909_v10, 2  ;;  %v1767_v63 = vrot.slane %v11891_v30, 3  ;;  %9279 = vmatmul.mubr.msk.f32.gmra.mrb[56].mxu0 %vm574_vm3, %v11891_v30  ;;  %v11935_v41 = vsel %vm2196_vm6, %v2184_v39, %v2185_v1  ;;  %v11939_v27 = vsel %vm2196_vm6, %v2185_v1, %v2186_v53 }
 0x194   :  { %14844 = vst [vmem:[#allocation107_spill] sm:$0xff] %v11907_v25  ;;  %14845 = vst [vmem:[#allocation108_spill] sm:$0xff] %v11909_v10  ;;  %v1766_v25 = vrot.slane %v11909_v10, 3  ;;  %v11943_v29 = vsel %vm2196_vm6, %v2186_v53, %v2187_v3  ;;  %v11952_v15 = vsel %vm930_vm0, %v919_v22, %v920_v4  ;;  %v11956_v39 = vsel %vm930_vm0, %v920_v4, %v921_v0 }
 0x195   :  { %14846 = vst [vmem:[#allocation109_spill] sm:$0xff] %v11917_v11  ;;  %14847 = vst [vmem:[#allocation110_spill] sm:$0xff] %v11921_v45  ;;  %v2188_v45 = vrot.slane %v11909_v10, 4  ;;  %v11946_v11 = vpop.permute.xlu0 %4518  ;;  %v11960_v1 = vsel %vm1352_vm4, %v1343_v7, %v1344_v58  ;;  %v11964_v53 = vsel %vm1352_vm4, %v1344_v58, %v1345_v8  ;;  %9332 = vmatmul.mubr.msk.f32.gmra.mrb[22].mxu1 %vm574_vm3, %v11952_v15  ;;  %v923_v22 = vrot.slane %v11948_v44, 1 }
 0x196   :  { %14848 = vst [vmem:[#allocation111_spill] sm:$0xff] %v11935_v41  ;;  %14849 = vst [vmem:[#allocation112_spill] sm:$0xff] %v11939_v27  ;;  %v1347_v27 = vrot.slane %v11948_v44, 2  ;;  %v11974_v4 = vsel %vm1774_vm5, %v1765_v24, %v1766_v25  ;;  %v11978_v7 = vsel %vm1774_vm5, %v1766_v25, %v1767_v63  ;;  %9334 = vmatprep.mubr.msk.f32.mxu1 %vm574_vm3, %v11956_v39  ;;  %v2189_v25 = vrot.slane %v11891_v30, 4 }
 0x197   :  { %14850 = vst [vmem:[#allocation113_spill] sm:$0xff] %v11943_v29  ;;  %14851 = vst [vmem:[#allocation114_spill] sm:$0xff] %v11946_v11  ;;  %v11966_v29 = vpop.f32.mrb[27].mxu0  ;;  %vm4560_vm8 = vcmp.eq.s32.totalorder %v11275_v19, %v11946_v11  ;;  %v11994_v24 = vsel %vm2196_vm6, %v2187_v3, %v2188_v45  ;;  %v14891_v19 = vrot.slane %v11317_v38, 5 }
 0x198   :  { %14852 = vst [vmem:[#allocation115_spill] sm:$0xff] %v11952_v15  ;;  %14853 = vst [vmem:[#allocation116_spill] sm:$0xff] %v11956_v39  ;;  %9281 = vmatprep.mubr.msk.f32.mxu0 %vm574_vm3, %v11966_v29  ;;  %v922_v58 = vrot.slane %v11966_v29, 1  ;;  %v1346_v15 = vrot.slane %v11966_v29, 2  ;;  %v1768_v41 = vrot.slane %v11966_v29, 3  ;;  %v2190_v39 = vrot.slane %v11966_v29, 4 }
 0x199   :  { %14854 = vst [vmem:[#allocation117_spill] sm:$0xff] %v11960_v1  ;;  %14855 = vst [vmem:[#allocation118_spill] sm:$0xff] %v11964_v53  ;;  %v1769_v53 = vrot.slane %v11948_v44, 3  ;;  %9282 = vmatmul.mubr.msk.f32.gmra.mrb[58].mxu0 %vm574_vm3, %v11948_v44 }
 0x19a   :  { %14856 = vst [vmem:[#allocation119_spill] sm:$0xff] %v11974_v4  ;;  %14857 = vst [vmem:[#allocation120_spill] sm:$0xff] %v11978_v7  ;;  %v2191_v7 = vrot.slane %v11948_v44, 4  ;;  %v11999_v4 = vpop.f32.mrb[28].mxu0  ;;  %v12003_v1 = vsel %vm930_vm0, %v921_v0, %v922_v58  ;;  %v12007_v37 = vsel %vm930_vm0, %v922_v58, %v923_v22  ;;  %v12011_v3 = vsel %vm1352_vm4, %v1345_v8, %v1346_v15 }
 0x19b   :  { %14858 = vst [vmem:[#allocation121_spill] sm:$0xff] %v11994_v24  ;;  %14859 = vst [vmem:[#allocation122_spill] sm:$0xff] %v11999_v4  ;;  %v12015_v24 = vsel %vm1352_vm4, %v1346_v15, %v1347_v27  ;;  %v12017_v54 = vpop.f32.mrb[29].mxu0  ;;  %9335 = vmatmul.mubr.msk.f32.gmra.mrb[24].mxu1 %vm574_vm3, %v12003_v1  ;;  %v925_v0 = vrot.slane %v11999_v4, 1  ;;  %v1349_v33 = vrot.slane %v11999_v4, 2  ;;  %v12025_v58 = vsel %vm1774_vm5, %v1767_v63, %v1768_v41 }
 0x19c   :  { %14860 = vst [vmem:[#allocation123_spill] sm:$0xff] %v12003_v1  ;;  %14861 = vst [vmem:[#allocation124_spill] sm:$0xff] %v12007_v37  ;;  %v12029_v8 = vsel %vm1774_vm5, %v1768_v41, %v1769_v53  ;;  %9284 = vmatprep.mubr.msk.f32.mxu0 %vm574_vm3, %v12017_v54  ;;  %9337 = vmatprep.mubr.msk.f32.mxu1 %vm574_vm3, %v12007_v37  ;;  %v924_v15 = vrot.slane %v12017_v54, 1  ;;  %v1348_v1 = vrot.slane %v12017_v54, 2 }
 0x19d   :  { %14862 = vst [vmem:[#allocation125_spill] sm:$0xff] %v12011_v3  ;;  %14863 = vst [vmem:[#allocation126_spill] sm:$0xff] %v12015_v24  ;;  %v1770_v24 = vrot.slane %v12017_v54, 3  ;;  %v1771_v3 = vrot.slane %v11999_v4, 3  ;;  %9285 = vmatmul.mubr.msk.f32.gmra.mrb[60].mxu0 %vm574_vm3, %v11999_v4  ;;  %v12043_v63 = vsel %vm2196_vm6, %v2188_v45, %v2189_v25  ;;  %v12047_v41 = vsel %vm2196_vm6, %v2189_v25, %v2190_v39 }
 0x19e   :  { %14864 = vst [vmem:[#allocation127_spill] sm:$0xff] %v12017_v54  ;;  %14865 = vst [vmem:[#allocation128_spill] sm:$0xff] %v12025_v58  ;;  %v12051_v37 = vsel %vm2196_vm6, %v2190_v39, %v2191_v7  ;;  %v12054_v58 = vpop.f32.mrb[30].mxu0  ;;  %v12058_v47 = vsel %vm930_vm0, %v923_v22, %v924_v15  ;;  %v12062_v45 = vsel %vm930_vm0, %v924_v15, %v925_v0 }
 0x19f   :  { %14866 = vst [vmem:[#allocation129_spill] sm:$0xff] %v12029_v8  ;;  %14867 = vst [vmem:[#allocation130_spill] sm:$0xff] %v12043_v63  ;;  %v2192_v8 = vrot.slane %v12017_v54, 4  ;;  %v12066_v25 = vsel %vm1352_vm4, %v1347_v27, %v1348_v1  ;;  %v12070_v39 = vsel %vm1352_vm4, %v1348_v1, %v1349_v33  ;;  %9338 = vmatmul.mubr.msk.f32.gmra.mrb[26].mxu1 %vm574_vm3, %v12058_v47  ;;  %v927_v22 = vrot.slane %v12054_v58, 1 }
 0x1a0   :  { %14868 = vst [vmem:[#allocation131_spill] sm:$0xff] %v12047_v41  ;;  %14869 = vst [vmem:[#allocation132_spill] sm:$0xff] %v12051_v37  ;;  %v12072_v37 = vpop.f32.mrb[31].mxu0  ;;  %v1351_v41 = vrot.slane %v12054_v58, 2  ;;  %v12080_v15 = vsel %vm1774_vm5, %v1769_v53, %v1770_v24  ;;  %v12084_v27 = vsel %vm1774_vm5, %v1770_v24, %v1771_v3  ;;  %9340 = vmatprep.mubr.msk.f32.mxu1 %vm574_vm3, %v12062_v45  ;;  %v14878_v53 = vrot.slane %v11291_v23, 1 }
 0x1a1   :  { %14870 = vst [vmem:[#allocation133_spill] sm:$0xff] %v12054_v58  ;;  %14871 = vst [vmem:[#allocation134_spill] sm:$0xff] %v12058_v47  ;;  %9287 = vmatprep.mubr.msk.f32.mxu0 %vm574_vm3, %v12072_v37  ;;  %v926_v1 = vrot.slane %v12072_v37, 1  ;;  %v1350_v47 = vrot.slane %v12072_v37, 2  ;;  %v1772_v63 = vrot.slane %v12072_v37, 3 }
 0x1a2   :  { %14872 = vst [vmem:[#allocation135_spill] sm:$0xff] %v12062_v45  ;;  %14873 = vst [vmem:[#allocation136_spill] sm:$0xff] %v12066_v25  ;;  %9288 = vmatmul.mubr.msk.f32.gmra.mrb[62].mxu0 %vm574_vm3, %v12054_v58  ;;  %v12100_v24 = vsel %vm930_vm0, %v927_v22, %v14878_v53  ;;  %v2193_v25 = vrot.slane %v11999_v4, 4 }
 0x1a3   :  { %14874 = vst [vmem:[#allocation137_spill] sm:$0xff] %v12070_v39  ;;  %14875 = vst [vmem:[#allocation138_spill] sm:$0xff] %v12072_v37  ;;  %v1773_v39 = vrot.slane %v12054_v58, 3  ;;  %8301 = vmatprep.mubr.msk.f32.mxu0 %vm4560_vm8, %v14692_v49  ;;  %v12119_v53 = vsel %vm930_vm0, %v925_v0, %v926_v1  ;;  %v12137_v49 = vsel %vm1774_vm5, %v1771_v3, %v1772_v63  ;;  %v2229_v3 = vld [vmem:[%s14650_s1 + $0x98] sm:$0xff] }
 0x1a4   :  { %14876 = vst [vmem:[#allocation139_spill] sm:$0xff] %v12080_v15  ;;  %14877 = vst [vmem:[#allocation140_spill] sm:$0xff] %v12084_v27  ;;  %v14880_v27 = vrot.slane %v11291_v23, 2  ;;  %v12110_v15 = vsel %vm2196_vm6, %v2191_v7, %v2192_v8  ;;  %v12127_v7 = vsel %vm1352_vm4, %v1349_v33, %v1350_v47  ;;  %9341 = vmatmul.mubr.msk.f32.gmra.mrb[28].mxu1 %vm574_vm3, %v12119_v53 }
 0x1a5   :  { %14879 = vst [vmem:[#allocation141_spill] sm:$0xff] %v12100_v24  ;;  %14881 = vst [vmem:[#allocation142_spill] sm:$0xff] %v12110_v15  ;;  %v12131_v15 = vsel %vm1352_vm4, %v1350_v47, %v1351_v41  ;;  %v12141_v0 = vsel %vm1774_vm5, %v1772_v63, %v1773_v39  ;;  %v12151_v47 = vsel %vm2196_vm6, %v2192_v8, %v2193_v25  ;;  %v2230_v63 = vld [vmem:[%s14650_s1 + $0xa0] sm:$0xff]  ;;  %v14889_v8 = vrot.slane %v11279_v62, 5 }
 0x1a6   :  { %v12106_v45 = vsel %vm1352_vm4, %v1351_v41, %v14880_v27  ;;  %14882 = vst [vmem:[#allocation143_spill] sm:$0xff] %v12119_v53  ;;  %v12123_v27 = vsel %vm930_vm0, %v926_v1, %v927_v22  ;;  %14884 = vst [vmem:[#allocation145_spill] sm:$0xff] %v12141_v0  ;;  %v14885_v22 = vrot.slane %v11291_v23, 3  ;;  %v2194_v41 = vrot.slane %v12072_v37, 4 }
 0x1a7   :  { %14883 = vst [vmem:[#allocation144_spill] sm:$0xff] %v12123_v27  ;;  %14887 = vst [vmem:[#allocation147_spill] sm:$0xff] %v12151_v47  ;;  %9343 = vmatprep.mubr.msk.f32.mxu1 %vm574_vm3, %v12123_v27  ;;  %v14888_v1 = vrot.slane %v11343_v43, 5  ;;  %v2590_v53 = vrot.slane %v11388_v61, 5  ;;  %v2591_v47 = vrot.slane %v11370_v56, 5  ;;  %v2593_v0 = vrot.slane %v11423_v13, 5 }
 0x1a8   :  { %v12147_v33 = vsel %vm1774_vm5, %v1773_v39, %v14885_v22  ;;  %v2195_v39 = vrot.slane %v12054_v58, 4  ;;  %9344 = vmatmul.mubr.msk.f32.gmra.mrb[30].mxu1 %vm574_vm3, %v12100_v24  ;;  %v2599_v24 = vrot.slane %v11582_v20, 5 }
 0x1a9   :  { %14886 = vst [vmem:[#allocation146_spill] sm:$0xff] %v12147_v33  ;;  %v12169_v22 = vsel %vm2618_vm7, %v14889_v8, %v14888_v1  ;;  %v14892_v11 = vmov %v14888_v1  ;;  %v2592_v33 = vrot.slane %v11442_v21, 5  ;;  %v12185_v1 = vsel %vm2196_vm6, %v2193_v25, %v2194_v41  ;;  %9354 = vmatprep.mubr.msk.f32.mxu1 %vm574_vm3, %v11329_v40 }
 0x1aa   :  { %14890 = vst [vmem:[#allocation148_spill] sm:$0xff] %v12169_v22  ;;  %v12177_v27 = vsel %vm2618_vm7, %v14892_v11, %v14891_v19  ;;  %14894 = vst [vmem:[#allocation150_spill] sm:$0xff] %v12185_v1  ;;  %v12189_v8 = vsel %vm2196_vm6, %v2194_v41, %v2195_v39  ;;  %v14895_v22 = vrot.slane %v11291_v23, 4  ;;  %v2594_v11 = vrot.slane %v11496_v6, 5 }
 0x1ab   :  { %14893 = vst [vmem:[#allocation149_spill] sm:$0xff] %v12177_v27  ;;  %v12200_v27 = vpack.c.bf16 %v2230_v63, %v2229_v3  ;;  %v14896_v25 = vrot.slane %v11317_v38, 5  ;;  %v12210_v41 = vsel %vm2618_vm7, %v2590_v53, %v2591_v47  ;;  %v12221_v3 = vsel %vm2618_vm7, %v2592_v33, %v2593_v0 }
 0x1ac   :  { %v12195_v19 = vsel %vm2196_vm6, %v2195_v39, %v14895_v22  ;;  %14897 = vst [vmem:[#allocation151_spill] sm:$0xff] %v12210_v41  ;;  %v12214_v39 = vsel %vm2618_vm7, %v2591_v47, %v2592_v33  ;;  %14899 = vst [vmem:[#allocation153_spill] sm:$0xff] %v12221_v3  ;;  %v12225_v63 = vsel %vm2618_vm7, %v2593_v0, %v2594_v11  ;;  %v2596_v22 = vrot.slane %v11548_v32, 5 }
 0x1ad   :  { %v12206_v1 = vsel %vm2618_vm7, %v14896_v25, %v2590_v53  ;;  %14898 = vst [vmem:[#allocation152_spill] sm:$0xff] %v12214_v39  ;;  %14900 = vst [vmem:[#allocation154_spill] sm:$0xff] %v12225_v63  ;;  %v2595_v53 = vrot.slane %v11477_v50, 5  ;;  %v2597_v47 = vrot.slane %v11530_v55, 5  ;;  %v2598_v25 = vrot.slane %v11600_v14, 5  ;;  %9355 = vmatmul.mubr.msk.f32.vlgmr.msra.gmra.mrb[0].mxu1 %vm574_vm3, %v11382_v59 }
 0x1ae   :  { %v2600_v40 = vrot.slane %v11652_v36, 5  ;;  %v2601_v63 = vrot.slane %v11634_v2, 5  ;;  %v2602_v3 = vrot.slane %v11704_v57, 5  ;;  %9357 = vmatprep.mubr.msk.f32.mxu1 %vm574_vm3, %v11386_v60  ;;  %10216 = vmatpush3.bf16.msra.mxu1 %v11311_v34  ;;  %v2606_v60 = vrot.slane %v11808_v28, 5 }
 0x1af   :  { %v12235_v33 = vsel %vm2618_vm7, %v2594_v11, %v2595_v53  ;;  %v12239_v0 = vsel %vm2618_vm7, %v2595_v53, %v2596_v22  ;;  %v12247_v39 = vsel %vm2618_vm7, %v2596_v22, %v2597_v47  ;;  %v12251_v41 = vsel %vm2618_vm7, %v2597_v47, %v2598_v25  ;;  %10218 = vmatprep.subr.bf16.mxu1 %v11313_v35 }
 0x1b0   :  { %14901 = vst [vmem:[#allocation155_spill] sm:$0xff] %v12251_v41  ;;  %v12255_v11 = vsel %vm2618_vm7, %v2598_v25, %v2599_v24  ;;  %v12259_v53 = vsel %vm2618_vm7, %v2599_v24, %v2600_v40  ;;  %v12266_v59 = vsel %vm2618_vm7, %v2600_v40, %v2601_v63  ;;  %v12270_v22 = vsel %vm2618_vm7, %v2601_v63, %v2602_v3 }
 0x1b1   :  { %14902 = vst [vmem:[#allocation156_spill] sm:$0xff] %v12255_v11  ;;  %14903 = vst [vmem:[#allocation157_spill] sm:$0xff] %v12259_v53  ;;  %v2603_v47 = vrot.slane %v11686_v9, 5  ;;  %v2604_v25 = vrot.slane %v11756_v46, 5  ;;  %v2605_v24 = vrot.slane %v11738_v52, 5  ;;  %v2607_v34 = vrot.slane %v11790_v31, 5  ;;  %9358 = vmatmul.mubr.msk.f32.gmra.mrb[2].mxu1 %vm574_vm3, %v11436_v17 }
 0x1b2   :  { %14904 = vst [vmem:[#allocation158_spill] sm:$0xff] %v12266_v59  ;;  %14905 = vst [vmem:[#allocation159_spill] sm:$0xff] %v12270_v22  ;;  %v2608_v53 = vrot.slane %v11860_v26, 5  ;;  %v2609_v22 = vrot.slane %v11842_v42, 5  ;;  %v2610_v59 = vrot.slane %v11909_v10, 5  ;;  %9360 = vmatprep.mubr.msk.f32.mxu1 %vm574_vm3, %v11440_v18  ;;  %10220 = vmatpush3.bf16.msra.mxu1 %v11313_v35  ;;  %v2614_v18 = vrot.slane %v12017_v54, 5 }
 0x1b3   :  { %v12281_v40 = vsel %vm2618_vm7, %v2602_v3, %v2603_v47  ;;  %v12285_v63 = vsel %vm2618_vm7, %v2603_v47, %v2604_v25  ;;  %v12293_v11 = vsel %vm2618_vm7, %v2604_v25, %v2605_v24  ;;  %v12297_v41 = vsel %vm2618_vm7, %v2605_v24, %v2606_v60  ;;  %10222 = vmatprep.subr.bf16.mxu1 %v12200_v27 }
 0x1b4   :  { %14906 = vst [vmem:[#allocation160_spill] sm:$0xff] %v12297_v41  ;;  %v12301_v3 = vsel %vm2618_vm7, %v2606_v60, %v2607_v34  ;;  %v12305_v47 = vsel %vm2618_vm7, %v2607_v34, %v2608_v53  ;;  %v12312_v17 = vsel %vm2618_vm7, %v2608_v53, %v2609_v22  ;;  %v12316_v25 = vsel %vm2618_vm7, %v2609_v22, %v2610_v59 }
 0x1b5   :  { %14907 = vst [vmem:[#allocation161_spill] sm:$0xff] %v12301_v3  ;;  %14908 = vst [vmem:[#allocation162_spill] sm:$0xff] %v12305_v47  ;;  %v2611_v24 = vrot.slane %v11891_v30, 5  ;;  %v2612_v60 = vrot.slane %v11966_v29, 5  ;;  %v2613_v34 = vrot.slane %v11948_v44, 5  ;;  %v2615_v35 = vrot.slane %v11999_v4, 5  ;;  %9361 = vmatmul.mubr.msk.f32.gmra.mrb[4].mxu1 %vm574_vm3, %v11489_v51 }
 0x1b6   :  { %14909 = vst [vmem:[#allocation163_spill] sm:$0xff] %v12312_v17  ;;  %14910 = vst [vmem:[#allocation164_spill] sm:$0xff] %v12316_v25  ;;  %v2616_v47 = vrot.slane %v12072_v37, 5  ;;  %v2617_v25 = vrot.slane %v12054_v58, 5  ;;  %v14913_v17 = vrot.slane %v11279_v62, 6  ;;  %v14914_v3 = vrot.slane %v11291_v23, 6  ;;  %9363 = vmatprep.mubr.msk.f32.mxu1 %vm574_vm3, %v11493_v5 }
 0x1b7   :  { %v12327_v53 = vsel %vm2618_vm7, %v2610_v59, %v2611_v24  ;;  %v12331_v22 = vsel %vm2618_vm7, %v2611_v24, %v2612_v60  ;;  %v12346_v59 = vsel %vm2618_vm7, %v2612_v60, %v2613_v34  ;;  %v12350_v24 = vsel %vm2618_vm7, %v2613_v34, %v2614_v18 }
 0x1b8   :  { %14911 = vst [vmem:[#allocation165_spill] sm:$0xff] %v12327_v53  ;;  %14912 = vst [vmem:[#allocation166_spill] sm:$0xff] %v12331_v22  ;;  %v12340_v41 = vsel %vm3040_vm9, %v14914_v3, %v14913_v17  ;;  %v12354_v22 = vsel %vm2618_vm7, %v2614_v18, %v2615_v35  ;;  %v12358_v53 = vsel %vm2618_vm7, %v2615_v35, %v2616_v47  ;;  %v14919_v3 = vrot.slane %v11291_v23, 5 }
 0x1b9   :  { %14915 = vst [vmem:[#allocation167_spill] sm:$0xff] %v12340_v41  ;;  %14916 = vst [vmem:[#allocation168_spill] sm:$0xff] %v12354_v22  ;;  %v12364_v51 = vsel %vm2618_vm7, %v2616_v47, %v2617_v25  ;;  %v3010_v60 = vrot.slane %v11343_v43, 6  ;;  %v3011_v34 = vrot.slane %v11317_v38, 6  ;;  %v3012_v18 = vrot.slane %v11388_v61, 6  ;;  %9364 = vmatmul.mubr.msk.f32.gmra.mrb[6].mxu1 %vm574_vm3, %v11542_v12 }
 0x1ba   :  { %14917 = vst [vmem:[#allocation169_spill] sm:$0xff] %v12358_v53  ;;  %14918 = vst [vmem:[#allocation170_spill] sm:$0xff] %v12364_v51  ;;  %v12370_v17 = vsel %vm2618_vm7, %v2617_v25, %v14919_v3  ;;  %v3013_v35 = vrot.slane %v11370_v56, 6  ;;  %v3014_v5 = vrot.slane %v11442_v21, 6  ;;  %v3015_v41 = vrot.slane %v11423_v13, 6  ;;  %9366 = vmatprep.mubr.msk.f32.mxu1 %vm574_vm3, %v11546_v48 }
 0x1bb   :  { %14920 = vst [vmem:[#allocation171_spill] sm:$0xff] %v12370_v17  ;;  %v14921_v47 = vrot.slane %v11279_v62, 6  ;;  %v12386_v25 = vsel %vm3040_vm9, %v3010_v60, %v3011_v34  ;;  %v3016_v3 = vrot.slane %v11496_v6, 6  ;;  %v3017_v17 = vrot.slane %v11477_v50, 6 }
 0x1bc   :  { %14922 = vst [vmem:[#allocation172_spill] sm:$0xff] %v12386_v25  ;;  %v12394_v53 = vsel %vm3040_vm9, %v3011_v34, %v3012_v18  ;;  %v12398_v22 = vsel %vm3040_vm9, %v3012_v18, %v3013_v35  ;;  %v3018_v18 = vrot.slane %v11548_v32, 6  ;;  %v3023_v48 = vrot.slane %v11634_v2, 6 }
 0x1bd   :  { %v12382_v51 = vsel %vm3040_vm9, %v14921_v47, %v3010_v60  ;;  %14923 = vst [vmem:[#allocation173_spill] sm:$0xff] %v12394_v53  ;;  %14924 = vst [vmem:[#allocation174_spill] sm:$0xff] %v12398_v22  ;;  %v12402_v47 = vsel %vm3040_vm9, %v3013_v35, %v3014_v5  ;;  %v12406_v60 = vsel %vm3040_vm9, %v3014_v5, %v3015_v41  ;;  %v3019_v35 = vrot.slane %v11530_v55, 6  ;;  %v14931_v22 = vld [vmem:[#allocation48_spill] sm:$0xff] }
 0x1be   :  { %14925 = vst [vmem:[#allocation175_spill] sm:$0xff] %v12402_v47  ;;  %14926 = vst [vmem:[#allocation176_spill] sm:$0xff] %v12406_v60  ;;  %v12412_v12 = vsel %vm3040_vm9, %v3015_v41, %v3016_v3  ;;  %v12416_v34 = vsel %vm3040_vm9, %v3016_v3, %v3017_v17  ;;  %v3020_v47 = vrot.slane %v11600_v14, 6  ;;  %v3021_v5 = vrot.slane %v11582_v20, 6  ;;  %9367 = vmatmul.mubr.msk.f32.gmra.mrb[8].mxu1 %vm574_vm3, %v14931_v22 }
 0x1bf   :  { %14927 = vst [vmem:[#allocation177_spill] sm:$0xff] %v12412_v12  ;;  %14928 = vst [vmem:[#allocation178_spill] sm:$0xff] %v12416_v34  ;;  %v3022_v60 = vrot.slane %v11652_v36, 6  ;;  %v12427_v41 = vsel %vm3040_vm9, %v3017_v17, %v3018_v18  ;;  %v12431_v3 = vsel %vm3040_vm9, %v3018_v18, %v3019_v35  ;;  %v3024_v34 = vrot.slane %v11704_v57, 6 }
 0x1c0   :  { %14929 = vst [vmem:[#allocation179_spill] sm:$0xff] %v12427_v41  ;;  %14930 = vst [vmem:[#allocation180_spill] sm:$0xff] %v12431_v3  ;;  %v3025_v12 = vrot.slane %v11686_v9, 6  ;;  %v12439_v53 = vsel %vm3040_vm9, %v3019_v35, %v3020_v47  ;;  %v12443_v25 = vsel %vm3040_vm9, %v3020_v47, %v3021_v5  ;;  %v14936_v3 = vld [vmem:[#allocation49_spill] sm:$0xff]  ;;  %v3026_v47 = vrot.slane %v11756_v46, 6 }
 0x1c1   :  { %14932 = vst [vmem:[#allocation48_spill] sm:$0xff] %v12439_v53  ;;  %14933 = vst [vmem:[#allocation181_spill] sm:$0xff] %v12443_v25  ;;  %v12447_v17 = vsel %vm3040_vm9, %v3021_v5, %v3022_v60  ;;  %v12451_v18 = vsel %vm3040_vm9, %v3022_v60, %v3023_v48  ;;  %9369 = vmatprep.mubr.msk.f32.mxu1 %vm574_vm3, %v14936_v3  ;;  %v12457_v22 = vsel %vm3040_vm9, %v3023_v48, %v3024_v34  ;;  %v14941_v25 = vld [vmem:[#allocation58_spill] sm:$0xff] }
 0x1c2   :  { %14934 = vst [vmem:[#allocation182_spill] sm:$0xff] %v12447_v17  ;;  %14935 = vst [vmem:[#allocation183_spill] sm:$0xff] %v12451_v18  ;;  %v12461_v35 = vsel %vm3040_vm9, %v3024_v34, %v3025_v12  ;;  %v3027_v5 = vrot.slane %v11738_v52, 6  ;;  %v3028_v17 = vrot.slane %v11808_v28, 6  ;;  %v3029_v60 = vrot.slane %v11790_v31, 6  ;;  %9370 = vmatmul.mubr.msk.f32.gmra.mrb[10].mxu1 %vm574_vm3, %v14941_v25 }
 0x1c3   :  { %14937 = vst [vmem:[#allocation49_spill] sm:$0xff] %v12457_v22  ;;  %14938 = vst [vmem:[#allocation184_spill] sm:$0xff] %v12461_v35  ;;  %v3030_v18 = vrot.slane %v11860_v26, 6  ;;  %v3031_v3 = vrot.slane %v11842_v42, 6  ;;  %v12471_v48 = vsel %vm3040_vm9, %v3025_v12, %v3026_v47  ;;  %v3032_v35 = vrot.slane %v11909_v10, 6 }
 0x1c4   :  { %14939 = vst [vmem:[#allocation185_spill] sm:$0xff] %v12471_v48  ;;  %v12475_v34 = vsel %vm3040_vm9, %v3026_v47, %v3027_v5  ;;  %v3033_v22 = vrot.slane %v11891_v30, 6  ;;  %v12483_v53 = vsel %vm3040_vm9, %v3027_v5, %v3028_v17  ;;  %v12487_v41 = vsel %vm3040_vm9, %v3028_v17, %v3029_v60 }
 0x1c5   :  { %14940 = vst [vmem:[#allocation186_spill] sm:$0xff] %v12475_v34  ;;  %14942 = vst [vmem:[#allocation58_spill] sm:$0xff] %v12483_v53  ;;  %v12491_v12 = vsel %vm3040_vm9, %v3029_v60, %v3030_v18  ;;  %v12495_v47 = vsel %vm3040_vm9, %v3030_v18, %v3031_v3  ;;  %v14946_v34 = vld [vmem:[#allocation59_spill] sm:$0xff]  ;;  %v12501_v25 = vsel %vm3040_vm9, %v3031_v3, %v3032_v35  ;;  %v3034_v17 = vrot.slane %v11966_v29, 6 }
 0x1c6   :  { %14943 = vst [vmem:[#allocation187_spill] sm:$0xff] %v12487_v41  ;;  %14944 = vst [vmem:[#allocation188_spill] sm:$0xff] %v12491_v12  ;;  %9372 = vmatprep.mubr.msk.f32.mxu1 %vm574_vm3, %v14946_v34  ;;  %v12505_v5 = vsel %vm3040_vm9, %v3032_v35, %v3033_v22  ;;  %v3035_v60 = vrot.slane %v11948_v44, 6  ;;  %v3036_v12 = vrot.slane %v12017_v54, 6  ;;  %v3037_v18 = vrot.slane %v11999_v4, 6  ;;  %v14949_v41 = vld [vmem:[#allocation68_spill] sm:$0xff] }
 0x1c7   :  { %14945 = vst [vmem:[#allocation189_spill] sm:$0xff] %v12495_v47  ;;  %14947 = vst [vmem:[#allocation59_spill] sm:$0xff] %v12501_v25  ;;  %v3038_v47 = vrot.slane %v12072_v37, 6  ;;  %v3039_v34 = vrot.slane %v12054_v58, 6  ;;  %v12515_v3 = vsel %vm3040_vm9, %v3033_v22, %v3034_v17  ;;  %v3431_v25 = vrot.slane %v11279_v62, 7  ;;  %9373 = vmatmul.mubr.msk.f32.gmra.mrb[12].mxu1 %vm574_vm3, %v14949_v41 }
 0x1c8   :  { %14948 = vst [vmem:[#allocation190_spill] sm:$0xff] %v12505_v5  ;;  %v12519_v35 = vsel %vm3040_vm9, %v3034_v17, %v3035_v60  ;;  %v12527_v53 = vsel %vm3040_vm9, %v3035_v60, %v3036_v12  ;;  %v12531_v48 = vsel %vm3040_vm9, %v3036_v12, %v3037_v18  ;;  %v14953_v5 = vld [vmem:[#allocation69_spill] sm:$0xff]  ;;  %v14954_v41 = vrot.slane %v11291_v23, 6 }
 0x1c9   :  { %14950 = vst [vmem:[#allocation68_spill] sm:$0xff] %v12531_v48  ;;  %v12535_v22 = vsel %vm3040_vm9, %v3037_v18, %v3038_v47  ;;  %v12539_v17 = vsel %vm3040_vm9, %v3038_v47, %v3039_v34  ;;  %9375 = vmatprep.mubr.msk.f32.mxu1 %vm574_vm3, %v14953_v5  ;;  %v14955_v12 = vrot.slane %v11291_v23, 7  ;;  %v3432_v18 = vrot.slane %v11343_v43, 7  ;;  %v14956_v43 = vld [vmem:[#allocation78_spill] sm:$0xff] }
 0x1ca   :  { %14951 = vst [vmem:[#allocation191_spill] sm:$0xff] %v12535_v22  ;;  %14952 = vst [vmem:[#allocation192_spill] sm:$0xff] %v12539_v17  ;;  %v12547_v60 = vsel %vm3040_vm9, %v3039_v34, %v14954_v41  ;;  %v3433_v47 = vrot.slane %v11317_v38, 7  ;;  %v3434_v17 = vrot.slane %v11388_v61, 7  ;;  %v3435_v5 = vrot.slane %v11370_v56, 7  ;;  %v14958_v61 = vld [vmem:[#allocation87_spill] sm:$0xff] }
 0x1cb   :  { %v12553_v62 = vsel %vm3462_vm10, %v14955_v12, %v3431_v25  ;;  %v3436_v22 = vrot.slane %v11442_v21, 7  ;;  %v3437_v48 = vrot.slane %v11423_v13, 7  ;;  %v12563_v34 = vsel %vm3462_vm10, %v3431_v25, %v3432_v18  ;;  %9376 = vmatmul.mubr.msk.f32.gmra.mrb[14].mxu1 %vm574_vm3, %v14956_v43 }
 0x1cc   :  { %v12567_v41 = vsel %vm3462_vm10, %v3432_v18, %v3433_v47  ;;  %v3438_v12 = vrot.slane %v11496_v6, 7  ;;  %v3439_v38 = vrot.slane %v11477_v50, 7  ;;  %v12575_v21 = vsel %vm3462_vm10, %v3433_v47, %v3434_v17  ;;  %v14957_v50 = vld [vmem:[#allocation79_spill] sm:$0xff] }
 0x1cd   :  { %v12579_v13 = vsel %vm3462_vm10, %v3434_v17, %v3435_v5  ;;  %v12583_v25 = vsel %vm3462_vm10, %v3435_v5, %v3436_v22  ;;  %v12587_v18 = vsel %vm3462_vm10, %v3436_v22, %v3437_v48  ;;  %9378 = vmatprep.mubr.msk.f32.mxu1 %vm574_vm3, %v14957_v50  ;;  %v3440_v17 = vrot.slane %v11548_v32, 7 }
 0x1ce   :  { %v12593_v43 = vsel %vm3462_vm10, %v3437_v48, %v3438_v12  ;;  %v12597_v47 = vsel %vm3462_vm10, %v3438_v12, %v3439_v38  ;;  %v3441_v5 = vrot.slane %v11530_v55, 7  ;;  %v3442_v6 = vrot.slane %v11600_v14, 7 }
 0x1cf   :  { %v3443_v22 = vrot.slane %v11582_v20, 7  ;;  %v3444_v56 = vrot.slane %v11652_v36, 7  ;;  %v3445_v50 = vrot.slane %v11634_v2, 7  ;;  %v12607_v48 = vsel %vm3462_vm10, %v3439_v38, %v3440_v17  ;;  %9379 = vmatmul.mubr.msk.f32.gmra.mrb[16].mxu1 %vm574_vm3, %v14958_v61 }
 0x1d0   :  { %v12611_v12 = vsel %vm3462_vm10, %v3440_v17, %v3441_v5  ;;  %v3446_v32 = vrot.slane %v11704_v57, 7  ;;  %v3447_v55 = vrot.slane %v11686_v9, 7  ;;  %v12619_v36 = vsel %vm3462_vm10, %v3441_v5, %v3442_v6  ;;  %v14959_v9 = vld [vmem:[#allocation88_spill] sm:$0xff] }
 0x1d1   :  { %v12623_v2 = vsel %vm3462_vm10, %v3442_v6, %v3443_v22  ;;  %v12627_v38 = vsel %vm3462_vm10, %v3443_v22, %v3444_v56  ;;  %v12631_v17 = vsel %vm3462_vm10, %v3444_v56, %v3445_v50  ;;  %9381 = vmatprep.mubr.msk.f32.mxu1 %vm574_vm3, %v14959_v9  ;;  %v3448_v6 = vrot.slane %v11756_v46, 7 }
 0x1d2   :  { %v12637_v61 = vsel %vm3462_vm10, %v3445_v50, %v3446_v32  ;;  %v12641_v5 = vsel %vm3462_vm10, %v3446_v32, %v3447_v55  ;;  %v3449_v22 = vrot.slane %v11738_v52, 7  ;;  %v3450_v57 = vrot.slane %v11808_v28, 7  ;;  %v14963_v52 = vld [vmem:[#allocation106_spill] sm:$0xff] }
 0x1d3   :  { %14960 = vst [vmem:[#allocation69_spill] sm:$0xff] %v12641_v5  ;;  %v3451_v56 = vrot.slane %v11790_v31, 7  ;;  %v3452_v20 = vrot.slane %v11860_v26, 7  ;;  %v12650_v9 = vsel %vm3462_vm10, %v3447_v55, %v3448_v6  ;;  %v3453_v50 = vrot.slane %v11842_v42, 7  ;;  %v14961_v5 = vld [vmem:[#allocation97_spill] sm:$0xff] }
 0x1d4   :  { %v3454_v14 = vrot.slane %v11909_v10, 7  ;;  %v3455_v32 = vrot.slane %v11891_v30, 7  ;;  %9382 = vmatmul.mubr.msk.f32.gmra.mrb[18].mxu1 %vm574_vm3, %v14961_v5  ;;  %v12659_v28 = vsel %vm3462_vm10, %v3448_v6, %v3449_v22  ;;  %v12663_v26 = vsel %vm3462_vm10, %v3449_v22, %v3450_v57  ;;  %v14962_v30 = vld [vmem:[#allocation98_spill] sm:$0xff] }
 0x1d5   :  { %v12667_v55 = vsel %vm3462_vm10, %v3450_v57, %v3451_v56  ;;  %v12671_v10 = vsel %vm3462_vm10, %v3451_v56, %v3452_v20  ;;  %9384 = vmatprep.mubr.msk.f32.mxu1 %vm574_vm3, %v14962_v30  ;;  %v12677_v5 = vsel %vm3462_vm10, %v3452_v20, %v3453_v50  ;;  %v3456_v57 = vrot.slane %v11966_v29, 7 }
 0x1d6   :  { %v12681_v6 = vsel %vm3462_vm10, %v3453_v50, %v3454_v14  ;;  %v12685_v22 = vsel %vm3462_vm10, %v3454_v14, %v3455_v32  ;;  %v3457_v56 = vrot.slane %v11948_v44, 7  ;;  %v3458_v42 = vrot.slane %v12017_v54, 7 }
 0x1d7   :  { %v3459_v30 = vrot.slane %v11999_v4, 7  ;;  %v3460_v31 = vrot.slane %v12072_v37, 7  ;;  %v12694_v20 = vsel %vm3462_vm10, %v3455_v32, %v3456_v57  ;;  %v3461_v50 = vrot.slane %v12054_v58, 7  ;;  %v14964_v58 = vld [vmem:[#allocation107_spill] sm:$0xff]  ;;  %v14966_v4 = vld [vmem:[#allocation117_spill] sm:$0xff] }
 0x1d8   :  { %9385 = vmatmul.mubr.msk.f32.gmra.mrb[20].mxu1 %vm574_vm3, %v14963_v52  ;;  %v12701_v14 = vsel %vm3462_vm10, %v3456_v57, %v3457_v56  ;;  %v12705_v54 = vsel %vm3462_vm10, %v3457_v56, %v3458_v42  ;;  %v14965_v57 = vrot.slane %v11291_v23, 7  ;;  %v14971_v23 = vld [vmem:[#allocation137_spill] sm:$0xff] }
 0x1d9   :  { %v12709_v37 = vsel %vm3462_vm10, %v3458_v42, %v3459_v30  ;;  %v12713_v32 = vsel %vm3462_vm10, %v3459_v30, %v3460_v31  ;;  %9387 = vmatprep.mubr.msk.f32.mxu1 %vm574_vm3, %v14964_v58  ;;  %v12719_v52 = vsel %vm3462_vm10, %v3460_v31, %v3461_v50  ;;  %v14967_v42 = vld [vmem:[#allocation118_spill] sm:$0xff]  ;;  %v14968_v30 = vld [vmem:[#allocation125_spill] sm:$0xff]  ;;  %v14970_v31 = vld [vmem:[#allocation136_spill] sm:$0xff] }
 0x1da   :  { %v12725_v56 = vsel %vm3462_vm10, %v3461_v50, %v14965_v57  ;;  %v14969_v58 = vld [vmem:[#allocation126_spill] sm:$0xff]  ;;  %v2232_v50 = vld [vmem:[%s14650_s1 + $0xb0] sm:$0xff]  ;;  %v14972_v57 = vld [vmem:[#allocation9_spill] sm:$0xff] }
 0x1dc   :  { %9388 = vmatmul.mubr.msk.f32.gmra.mrb[22].mxu1 %vm574_vm3, %v14966_v4  ;;  %v2231_v4 = vld [vmem:[%s14650_s1 + $0xa8] sm:$0xff] }
 0x1dd   :  { %9390 = vmatprep.mubr.msk.f32.mxu1 %vm574_vm3, %v14967_v42  ;;  %v14973_v42 = vld [vmem:[#allocation17_spill] sm:$0xff] }
 0x1e0   :  { %9391 = vmatmul.mubr.msk.f32.gmra.mrb[24].mxu1 %vm574_vm3, %v14968_v30  ;;  %v14974_v30 = vld [vmem:[#allocation18_spill] sm:$0xff] }
 0x1e1   :  { %9393 = vmatprep.mubr.msk.f32.mxu1 %vm574_vm3, %v14969_v58  ;;  %v14975_v58 = vld [vmem:[#allocation25_spill] sm:$0xff] }
 0x1e4   :  { %9394 = vmatmul.mubr.msk.f32.gmra.mrb[26].mxu1 %vm574_vm3, %v14970_v31  ;;  %v14976_v31 = vld [vmem:[#allocation26_spill] sm:$0xff] }
 0x1e5   :  { %9396 = vmatprep.mubr.msk.f32.mxu1 %vm574_vm3, %v14971_v23  ;;  %v10225_v23 = vpack.c.bf16 %v2232_v50, %v2231_v4  ;;  %v14977_v4 = vld [vmem:[#allocation33_spill] sm:$0xff]  ;;  %v14978_v50 = vld [vmem:[#allocation34_spill] sm:$0xff] }
 0x1e8   :  { %9397 = vmatmul.mubr.msk.f32.gmra.mrb[28].mxu1 %vm574_vm3, %v12127_v7  ;;  %v2651_v7 = vld [vmem:[%s14650_s1 + $0xb8] sm:$0xff] }
 0x1e9   :  { %9399 = vmatprep.mubr.msk.f32.mxu1 %vm574_vm3, %v12131_v15  ;;  %v2652_v15 = vld [vmem:[%s14650_s1 + $0xc0] sm:$0xff] }
 0x1ec   :  { %9400 = vmatmul.mubr.msk.f32.gmra.mrb[30].mxu1 %vm574_vm3, %v12106_v45  ;;  %v10229_v45 = vpack.c.bf16 %v2652_v15, %v2651_v7  ;;  %v14981_v7 = vld [vmem:[#allocation51_spill] sm:$0xff]  ;;  %v14982_v15 = vld [vmem:[#allocation52_spill] sm:$0xff] }
 0x1ed   :  { %9410 = vmatprep.mubr.msk.f32.mxu1 %vm574_vm3, %v14972_v57  ;;  %v14979_v57 = vld [vmem:[#allocation41_spill] sm:$0xff] }
 0x1f0   :  { %9411 = vmatmul.mubr.msk.f32.vlgmr.msra.gmra.mrb[0].mxu1 %vm574_vm3, %v14973_v42  ;;  %v14984_v42 = vld [vmem:[#allocation62_spill] sm:$0xff] }
 0x1f1   :  { %9413 = vmatprep.mubr.msk.f32.mxu1 %vm574_vm3, %v14974_v30  ;;  %10224 = vmatpush3.bf16.msra.mxu1 %v12200_v27  ;;  %v14980_v27 = vld [vmem:[#allocation42_spill] sm:$0xff]  ;;  %v14985_v30 = vld [vmem:[#allocation71_spill] sm:$0xff] }
 0x1f2   :  { %10226 = vmatprep.subr.bf16.mxu1 %v10225_v23 }
 0x1f4   :  { %9414 = vmatmul.mubr.msk.f32.gmra.mrb[2].mxu1 %vm574_vm3, %v14975_v58  ;;  %v14986_v58 = vld [vmem:[#allocation72_spill] sm:$0xff] }
 0x1f5   :  { %9416 = vmatprep.mubr.msk.f32.mxu1 %vm574_vm3, %v14976_v31  ;;  %10228 = vmatpush3.bf16.msra.mxu1 %v10225_v23  ;;  %v14983_v23 = vld [vmem:[#allocation61_spill] sm:$0xff]  ;;  %v14987_v31 = vld [vmem:[#allocation80_spill] sm:$0xff] }
 0x1f6   :  { %10230 = vmatprep.subr.bf16.mxu1 %v10229_v45 }
 0x1f8   :  { %9417 = vmatmul.mubr.msk.f32.gmra.mrb[4].mxu1 %vm574_vm3, %v14977_v4  ;;  %v14988_v4 = vld [vmem:[#allocation81_spill] sm:$0xff] }
 0x1f9   :  { %9419 = vmatprep.mubr.msk.f32.mxu1 %vm574_vm3, %v14978_v50  ;;  %v14989_v50 = vld [vmem:[#allocation90_spill] sm:$0xff] }
 0x1fc   :  { %9420 = vmatmul.mubr.msk.f32.gmra.mrb[6].mxu1 %vm574_vm3, %v14979_v57  ;;  %v14990_v57 = vld [vmem:[#allocation91_spill] sm:$0xff] }
 0x1fd   :  { %9422 = vmatprep.mubr.msk.f32.mxu1 %vm574_vm3, %v14980_v27  ;;  %v14991_v27 = vld [vmem:[#allocation100_spill] sm:$0xff] }
 0x200   :  { %9423 = vmatmul.mubr.msk.f32.gmra.mrb[8].mxu1 %vm574_vm3, %v14981_v7  ;;  %v14992_v7 = vld [vmem:[#allocation101_spill] sm:$0xff] }
 0x201   :  { %9425 = vmatprep.mubr.msk.f32.mxu1 %vm574_vm3, %v14982_v15  ;;  %v14993_v15 = vld [vmem:[#allocation109_spill] sm:$0xff] }
 0x204   :  { %9426 = vmatmul.mubr.msk.f32.gmra.mrb[10].mxu1 %vm574_vm3, %v14983_v23  ;;  %v14994_v23 = vld [vmem:[#allocation110_spill] sm:$0xff] }
 0x205   :  { %9428 = vmatprep.mubr.msk.f32.mxu1 %vm574_vm3, %v14984_v42  ;;  %v14995_v42 = vld [vmem:[#allocation119_spill] sm:$0xff] }
 0x208   :  { %9429 = vmatmul.mubr.msk.f32.gmra.mrb[12].mxu1 %vm574_vm3, %v14985_v30  ;;  %v14996_v30 = vld [vmem:[#allocation120_spill] sm:$0xff] }
 0x209   :  { %9431 = vmatprep.mubr.msk.f32.mxu1 %vm574_vm3, %v14986_v58  ;;  %v14997_v58 = vld [vmem:[#allocation128_spill] sm:$0xff] }
 0x20c   :  { %9432 = vmatmul.mubr.msk.f32.gmra.mrb[14].mxu1 %vm574_vm3, %v14987_v31  ;;  %v14998_v31 = vld [vmem:[#allocation129_spill] sm:$0xff] }
 0x20d   :  { %9434 = vmatprep.mubr.msk.f32.mxu1 %vm574_vm3, %v14988_v4  ;;  %v14999_v4 = vld [vmem:[#allocation139_spill] sm:$0xff] }
 0x210   :  { %9435 = vmatmul.mubr.msk.f32.gmra.mrb[16].mxu1 %vm574_vm3, %v14989_v50  ;;  %v15000_v50 = vld [vmem:[#allocation140_spill] sm:$0xff] }
 0x211   :  { %9437 = vmatprep.mubr.msk.f32.mxu1 %vm574_vm3, %v14990_v57  ;;  %v15001_v57 = vld [vmem:[#allocation145_spill] sm:$0xff] }
 0x214   :  { %9438 = vmatmul.mubr.msk.f32.gmra.mrb[18].mxu1 %vm574_vm3, %v14991_v27  ;;  %v2653_v27 = vld [vmem:[%s14650_s1 + $0xc8] sm:$0xff] }
 0x215   :  { %9440 = vmatprep.mubr.msk.f32.mxu1 %vm574_vm3, %v14992_v7  ;;  %v2654_v7 = vld [vmem:[%s14650_s1 + $0xd0] sm:$0xff] }
 0x218   :  { %9441 = vmatmul.mubr.msk.f32.gmra.mrb[20].mxu1 %vm574_vm3, %v14993_v15  ;;  %v15002_v15 = vld [vmem:[#allocation146_spill] sm:$0xff] }
 0x219   :  { %9443 = vmatprep.mubr.msk.f32.mxu1 %vm574_vm3, %v14994_v23  ;;  %v15003_v23 = vld [vmem:[#allocation10_spill] sm:$0xff] }
 0x21c   :  { %9444 = vmatmul.mubr.msk.f32.gmra.mrb[22].mxu1 %vm574_vm3, %v14995_v42  ;;  %v10233_v42 = vpack.c.bf16 %v2654_v7, %v2653_v27  ;;  %v15008_v27 = vld [vmem:[#allocation35_spill] sm:$0xff]  ;;  %v15009_v7 = vld [vmem:[#allocation36_spill] sm:$0xff] }
 0x21d   :  { %9446 = vmatprep.mubr.msk.f32.mxu1 %vm574_vm3, %v14996_v30  ;;  %v3074_v30 = vld [vmem:[%s14650_s1 + $0xe0] sm:$0xff] }
 0x220   :  { %9447 = vmatmul.mubr.msk.f32.gmra.mrb[24].mxu1 %vm574_vm3, %v14997_v58  ;;  %v15004_v58 = vld [vmem:[#allocation19_spill] sm:$0xff] }
 0x221   :  { %9449 = vmatprep.mubr.msk.f32.mxu1 %vm574_vm3, %v14998_v31  ;;  %v15005_v31 = vld [vmem:[#allocation20_spill] sm:$0xff] }
 0x224   :  { %9450 = vmatmul.mubr.msk.f32.gmra.mrb[26].mxu1 %vm574_vm3, %v14999_v4 }
 0x225   :  { %9452 = vmatprep.mubr.msk.f32.mxu1 %vm574_vm3, %v15000_v50  ;;  %v15006_v50 = vld [vmem:[#allocation27_spill] sm:$0xff] }
 0x228   :  { %9453 = vmatmul.mubr.msk.f32.gmra.mrb[28].mxu1 %vm574_vm3, %v12137_v49  ;;  %v3073_v49 = vld [vmem:[%s14650_s1 + $0xd8] sm:$0xff] }
 0x229   :  { %9455 = vmatprep.mubr.msk.f32.mxu1 %vm574_vm3, %v15001_v57  ;;  %v12840_v4 = vpack.c.bf16 %v3074_v30, %v3073_v49  ;;  %v15007_v57 = vld [vmem:[#allocation28_spill] sm:$0xff]  ;;  %v15012_v30 = vld [vmem:[#allocation53_spill] sm:$0xff] }
 0x22c   :  { %9456 = vmatmul.mubr.msk.f32.gmra.mrb[30].mxu1 %vm574_vm3, %v15002_v15  ;;  %v15010_v15 = vld [vmem:[#allocation43_spill] sm:$0xff] }
 0x22d   :  { %9466 = vmatprep.mubr.msk.f32.mxu1 %vm574_vm3, %v15003_v23  ;;  %v15011_v23 = vld [vmem:[#allocation44_spill] sm:$0xff] }
 0x230   :  { %9467 = vmatmul.mubr.msk.f32.vlgmr.msra.gmra.mrb[0].mxu1 %vm574_vm3, %v15004_v58  ;;  %v15013_v58 = vld [vmem:[#allocation54_spill] sm:$0xff] }
 0x231   :  { %9469 = vmatprep.mubr.msk.f32.mxu1 %vm574_vm3, %v15005_v31  ;;  %10232 = vmatpush3.bf16.msra.mxu1 %v10229_v45  ;;  %v12853_v45 = vpop.f32.mrb[32].mxu0 }
 0x232   :  { %10234 = vmatprep.subr.bf16.mxu1 %v10233_v42  ;;  %v12857_v49 = vpop.f32.mrb[33].mxu0 }
 0x234   :  { %9470 = vmatmul.mubr.msk.f32.gmra.mrb[2].mxu1 %vm574_vm3, %v15006_v50  ;;  %v15014_v50 = vld [vmem:[#allocation63_spill] sm:$0xff] }
 0x235   :  { %9472 = vmatprep.mubr.msk.f32.mxu1 %vm574_vm3, %v15007_v57  ;;  %10236 = vmatpush3.bf16.msra.mxu1 %v10233_v42  ;;  %v12861_v42 = vpop.f32.mrb[34].mxu0 }
 0x236   :  { %10238 = vmatprep.subr.bf16.mxu1 %v12840_v4  ;;  %v12865_v31 = vpop.f32.mrb[35].mxu0 }
 0x238   :  { %9473 = vmatmul.mubr.msk.f32.gmra.mrb[4].mxu1 %vm574_vm3, %v15008_v27  ;;  %v15016_v27 = vld [vmem:[#allocation64_spill] sm:$0xff] }
 0x239   :  { %9475 = vmatprep.mubr.msk.f32.mxu1 %vm574_vm3, %v15009_v7  ;;  %v12869_v57 = vpop.f32.mrb[36].mxu0 }
 0x23a   :  { %15015 = vst [vmem:[#allocation78_spill] sm:$0xff] %v12869_v57  ;;  %v12873_v7 = vpop.f32.mrb[37].mxu0  ;;  %v15024_v57 = vld [vmem:[#allocation83_spill] sm:$0xff] }
 0x23b   :  { %15017 = vst [vmem:[#allocation79_spill] sm:$0xff] %v12873_v7  ;;  %v15026_v7 = vld [vmem:[#allocation92_spill] sm:$0xff] }
 0x23c   :  { %9476 = vmatmul.mubr.msk.f32.gmra.mrb[6].mxu1 %vm574_vm3, %v15010_v15  ;;  %v15018_v15 = vld [vmem:[#allocation73_spill] sm:$0xff] }
 0x23d   :  { %9478 = vmatprep.mubr.msk.f32.mxu1 %vm574_vm3, %v15011_v23  ;;  %v12877_v23 = vpop.f32.mrb[38].mxu0 }
 0x23e   :  { %15019 = vst [vmem:[#allocation87_spill] sm:$0xff] %v12877_v23  ;;  %v15028_v23 = vld [vmem:[#allocation93_spill] sm:$0xff] }
 0x240   :  { %9479 = vmatmul.mubr.msk.f32.gmra.mrb[8].mxu1 %vm574_vm3, %v15012_v30  ;;  %v15020_v30 = vld [vmem:[#allocation74_spill] sm:$0xff] }
 0x241   :  { %9481 = vmatprep.mubr.msk.f32.mxu1 %vm574_vm3, %v15013_v58  ;;  %v12881_v58 = vpop.f32.mrb[39].mxu0 }
 0x242   :  { %15021 = vst [vmem:[#allocation88_spill] sm:$0xff] %v12881_v58  ;;  %v15030_v58 = vld [vmem:[#allocation102_spill] sm:$0xff] }
 0x244   :  { %9482 = vmatmul.mubr.msk.f32.gmra.mrb[10].mxu1 %vm574_vm3, %v15014_v50  ;;  %v12885_v50 = vpop.f32.mrb[40].mxu0 }
 0x245   :  { %9484 = vmatprep.mubr.msk.f32.mxu1 %vm574_vm3, %v15016_v27  ;;  %15023 = vst [vmem:[#allocation97_spill] sm:$0xff] %v12885_v50  ;;  %v12889_v27 = vpop.f32.mrb[41].mxu0  ;;  %v15032_v50 = vld [vmem:[#allocation111_spill] sm:$0xff] }
 0x246   :  { %15025 = vst [vmem:[#allocation98_spill] sm:$0xff] %v12889_v27  ;;  %v15034_v27 = vld [vmem:[#allocation112_spill] sm:$0xff] }
 0x248   :  { %9485 = vmatmul.mubr.msk.f32.gmra.mrb[12].mxu1 %vm574_vm3, %v15018_v15  ;;  %v12893_v15 = vpop.f32.mrb[42].mxu0 }
 0x249   :  { %9487 = vmatprep.mubr.msk.f32.mxu1 %vm574_vm3, %v15020_v30  ;;  %15027 = vst [vmem:[#allocation106_spill] sm:$0xff] %v12893_v15  ;;  %v12897_v30 = vpop.f32.mrb[43].mxu0  ;;  %v15036_v15 = vld [vmem:[#allocation113_spill] sm:$0xff] }
 0x24a   :  { %15029 = vst [vmem:[#allocation107_spill] sm:$0xff] %v12897_v30  ;;  %v15038_v30 = vld [vmem:[#allocation121_spill] sm:$0xff] }
 0x24c   :  { %9488 = vmatmul.mubr.msk.f32.gmra.mrb[14].mxu1 %vm574_vm3, %v15022_v16  ;;  %v12901_v16 = vpop.f32.mrb[44].mxu0 }
 0x24d   :  { %9490 = vmatprep.mubr.msk.f32.mxu1 %vm574_vm3, %v15024_v57  ;;  %15031 = vst [vmem:[#allocation117_spill] sm:$0xff] %v12901_v16  ;;  %v12905_v57 = vpop.f32.mrb[45].mxu0  ;;  %v15040_v16 = vld [vmem:[#allocation130_spill] sm:$0xff] }
 0x24e   :  { %15033 = vst [vmem:[#allocation118_spill] sm:$0xff] %v12905_v57  ;;  %v15042_v57 = vld [vmem:[#allocation131_spill] sm:$0xff] }
 0x250   :  { %9491 = vmatmul.mubr.msk.f32.gmra.mrb[16].mxu1 %vm574_vm3, %v15026_v7  ;;  %v12909_v7 = vpop.f32.mrb[46].mxu0 }
 0x251   :  { %9493 = vmatprep.mubr.msk.f32.mxu1 %vm574_vm3, %v15028_v23  ;;  %15035 = vst [vmem:[#allocation125_spill] sm:$0xff] %v12909_v7  ;;  %v12913_v23 = vpop.f32.mrb[47].mxu0  ;;  %v15043_v7 = vld [vmem:[#allocation132_spill] sm:$0xff] }
 0x252   :  { %15037 = vst [vmem:[#allocation126_spill] sm:$0xff] %v12913_v23  ;;  %v15045_v23 = vld [vmem:[#allocation142_spill] sm:$0xff] }
 0x254   :  { %9494 = vmatmul.mubr.msk.f32.gmra.mrb[18].mxu1 %vm574_vm3, %v15030_v58  ;;  %v12917_v58 = vpop.f32.mrb[48].mxu0 }
 0x255   :  { %9496 = vmatprep.mubr.msk.f32.mxu1 %vm574_vm3, %v15032_v50  ;;  %15039 = vst [vmem:[#allocation136_spill] sm:$0xff] %v12917_v58  ;;  %v12921_v50 = vpop.f32.mrb[49].mxu0  ;;  %v15047_v58 = vld [vmem:[#allocation147_spill] sm:$0xff] }
 0x256   :  { %15041 = vst [vmem:[#allocation137_spill] sm:$0xff] %v12921_v50  ;;  %v15049_v50 = vld [vmem:[#allocation150_spill] sm:$0xff] }
 0x258   :  { %9497 = vmatmul.mubr.msk.f32.gmra.mrb[20].mxu1 %vm574_vm3, %v15034_v27  ;;  %v12925_v27 = vpop.f32.mrb[50].mxu0 }
 0x259   :  { %9499 = vmatprep.mubr.msk.f32.mxu1 %vm574_vm3, %v15036_v15  ;;  %v12929_v15 = vpop.f32.mrb[51].mxu0 }
 0x25a   :  { %15044 = vst [vmem:[#allocation9_spill] sm:$0xff] %v12929_v15  ;;  %v15055_v15 = vld [vmem:[#allocation148_spill] sm:$0xff] }
 0x25c   :  { %9500 = vmatmul.mubr.msk.f32.gmra.mrb[22].mxu1 %vm574_vm3, %v15038_v30 }
 0x25d   :  { %9502 = vmatprep.mubr.msk.f32.mxu1 %vm574_vm3, %v15040_v16  ;;  %v12933_v30 = vpop.f32.mrb[52].mxu0 }
 0x25e   :  { %15046 = vst [vmem:[#allocation17_spill] sm:$0xff] %v12933_v30  ;;  %v12937_v16 = vpop.f32.mrb[53].mxu0  ;;  %v3496_v30 = vld [vmem:[%s14650_s1 + $0x100] sm:$0xff] }
 0x25f   :  { %15048 = vst [vmem:[#allocation18_spill] sm:$0xff] %v12937_v16 }
 0x260   :  { %9503 = vmatmul.mubr.msk.f32.gmra.mrb[24].mxu1 %vm574_vm3, %v15042_v57 }
 0x261   :  { %9505 = vmatprep.mubr.msk.f32.mxu1 %vm574_vm3, %v15043_v7 }
 0x262   :  { %v12941_v57 = vpop.f32.mrb[54].mxu0 }
 0x263   :  { %15050 = vst [vmem:[#allocation25_spill] sm:$0xff] %v12941_v57  ;;  %v12945_v7 = vpop.f32.mrb[55].mxu0 }
 0x264   :  { %9506 = vmatmul.mubr.msk.f32.gmra.mrb[26].mxu1 %vm574_vm3, %v15045_v23  ;;  %15051 = vst [vmem:[#allocation26_spill] sm:$0xff] %v12945_v7  ;;  %v3075_v23 = vld [vmem:[%s14650_s1 + $0xe8] sm:$0xff]  ;;  %v3495_v7 = vld [vmem:[%s14650_s1 + $0xf8] sm:$0xff] }
 0x265   :  { %9508 = vmatprep.mubr.msk.f32.mxu1 %vm574_vm3, %v15047_v58  ;;  %v3076_v58 = vld [vmem:[%s14650_s1 + $0xf0] sm:$0xff] }
 0x266   :  { %v12955_v16 = vpop.f32.mrb[56].mxu0 }
 0x267   :  { %15052 = vst [vmem:[#allocation33_spill] sm:$0xff] %v12955_v16  ;;  %v12959_v57 = vpop.f32.mrb[57].mxu0  ;;  %v15057_v16 = vld [vmem:[#allocation149_spill] sm:$0xff] }
 0x268   :  { %9509 = vmatmul.mubr.msk.f32.gmra.mrb[28].mxu1 %vm574_vm3, %v15049_v50  ;;  %v15053_v50 = vld [vmem:[#allocation12_spill] sm:$0xff]  ;;  %15054 = vst [vmem:[#allocation34_spill] sm:$0xff] %v12959_v57  ;;  %v15058_v57 = vld [vmem:[#allocation151_spill] sm:$0xff] }
 0x269   :  { %9511 = vmatprep.mubr.msk.f32.mxu1 %vm574_vm3, %v12189_v8  ;;  %v10241_v8 = vpack.c.bf16 %v3076_v58, %v3075_v23  ;;  %v10245_v23 = vpack.c.bf16 %v3496_v30, %v3495_v7  ;;  %v15063_v7 = vld [vmem:[#allocation156_spill] sm:$0xff] }
 0x26c   :  { %9512 = vmatmul.mubr.msk.f32.gmra.mrb[30].mxu1 %vm574_vm3, %v12195_v19  ;;  %v12969_v19 = vpop.f32.mrb[58].mxu0 }
 0x26d   :  { %9522 = vmatprep.mubr.msk.f32.mxu1 %vm574_vm3, %v15053_v50  ;;  %15056 = vst [vmem:[#allocation41_spill] sm:$0xff] %v12969_v19  ;;  %v12974_v50 = vpop.f32.mrb[59].mxu0  ;;  %v15059_v19 = vld [vmem:[#allocation152_spill] sm:$0xff] }
 0x270   :  { %9523 = vmatmul.mubr.msk.f32.vlgmr.msra.gmra.mrb[0].mxu1 %vm574_vm3, %v15055_v15  ;;  %v12978_v58 = vpop.f32.mrb[60].mxu0 }
 0x271   :  { %9525 = vmatprep.mubr.msk.f32.mxu1 %vm574_vm3, %v15057_v16  ;;  %10240 = vmatpush3.bf16.msra.mxu1 %v12840_v4  ;;  %v12982_v15 = vpop.f32.mrb[61].mxu0  ;;  %v15060_v16 = vld [vmem:[#allocation153_spill] sm:$0xff] }
 0x272   :  { %10242 = vmatprep.subr.bf16.mxu1 %v10241_v8 }
 0x274   :  { %9526 = vmatmul.mubr.msk.f32.gmra.mrb[2].mxu1 %vm574_vm3, %v12206_v1  ;;  %v15061_v1 = vld [vmem:[#allocation154_spill] sm:$0xff] }
 0x275   :  { %9528 = vmatprep.mubr.msk.f32.mxu1 %vm574_vm3, %v15058_v57  ;;  %10244 = vmatpush3.bf16.msra.mxu1 %v10241_v8  ;;  %v12986_v4 = vpop.f32.mrb[62].mxu0  ;;  %v15062_v57 = vld [vmem:[#allocation155_spill] sm:$0xff]  ;;  %v15064_v8 = vld [vmem:[#allocation157_spill] sm:$0xff] }
 0x276   :  { %10246 = vmatprep.subr.bf16.mxu1 %v10245_v23  ;;  %v12990_v30 = vpop.f32.mrb[63].mxu0 }
 0x278   :  { %9529 = vmatmul.mubr.msk.f32.gmra.mrb[4].mxu1 %vm574_vm3, %v15059_v19  ;;  %v15065_v19 = vld [vmem:[#allocation158_spill] sm:$0xff] }
 0x279   :  { %9531 = vmatprep.mubr.msk.f32.mxu1 %vm574_vm3, %v15060_v16  ;;  %v15066_v16 = vld [vmem:[#allocation159_spill] sm:$0xff] }
 0x27c   :  { %9532 = vmatmul.mubr.msk.f32.gmra.mrb[6].mxu1 %vm574_vm3, %v15061_v1  ;;  %v15070_v1 = vld [vmem:[#allocation163_spill] sm:$0xff] }
 0x27d   :  { %9534 = vmatprep.mubr.msk.f32.mxu1 %vm574_vm3, %v12235_v33  ;;  %v15068_v33 = vld [vmem:[#allocation161_spill] sm:$0xff] }
 0x280   :  { %9535 = vmatmul.mubr.msk.f32.gmra.mrb[8].mxu1 %vm574_vm3, %v12239_v0  ;;  %v15069_v0 = vld [vmem:[#allocation162_spill] sm:$0xff] }
 0x281   :  { %9537 = vmatprep.mubr.msk.f32.mxu1 %vm574_vm3, %v12247_v39  ;;  %v15067_v39 = vld [vmem:[#allocation160_spill] sm:$0xff] }
 0x284   :  { %9538 = vmatmul.mubr.msk.f32.gmra.mrb[10].mxu1 %vm574_vm3, %v15062_v57  ;;  %v15071_v57 = vld [vmem:[#allocation164_spill] sm:$0xff] }
 0x285   :  { %9540 = vmatprep.mubr.msk.f32.mxu1 %vm574_vm3, %v15063_v7  ;;  %v15075_v7 = vld [vmem:[#allocation169_spill] sm:$0xff] }
 0x288   :  { %9541 = vmatmul.mubr.msk.f32.gmra.mrb[12].mxu1 %vm574_vm3, %v15064_v8  ;;  %v15076_v8 = vld [vmem:[#allocation170_spill] sm:$0xff] }
 0x289   :  { %9543 = vmatprep.mubr.msk.f32.mxu1 %vm574_vm3, %v15065_v19  ;;  %v3497_v19 = vld [vmem:[%s14650_s1 + $0x108] sm:$0xff] }
 0x28c   :  { %9544 = vmatmul.mubr.msk.f32.gmra.mrb[14].mxu1 %vm574_vm3, %v15066_v16  ;;  %v15077_v16 = vld [vmem:[#allocation171_spill] sm:$0xff] }
 0x28d   :  { %9546 = vmatprep.mubr.msk.f32.mxu1 %vm574_vm3, %v12281_v40  ;;  %v15072_v40 = vld [vmem:[#allocation165_spill] sm:$0xff] }
 0x290   :  { %9547 = vmatmul.mubr.msk.f32.gmra.mrb[16].mxu1 %vm574_vm3, %v12285_v63  ;;  %v15073_v63 = vld [vmem:[#allocation166_spill] sm:$0xff] }
 0x291   :  { %9549 = vmatprep.mubr.msk.f32.mxu1 %vm574_vm3, %v12293_v11  ;;  %v15074_v11 = vld [vmem:[#allocation168_spill] sm:$0xff] }
 0x294   :  { %9550 = vmatmul.mubr.msk.f32.gmra.mrb[18].mxu1 %vm574_vm3, %v15067_v39 }
 0x295   :  { %9552 = vmatprep.mubr.msk.f32.mxu1 %vm574_vm3, %v15068_v33  ;;  %v3852_v33 = vld [vmem:[%s14650_s1 + $0x118] sm:$0xff] }
 0x298   :  { %9553 = vmatmul.mubr.msk.f32.gmra.mrb[20].mxu1 %vm574_vm3, %v15069_v0  ;;  %v3853_v0 = vld [vmem:[%s14650_s1 + $0x120] sm:$0xff] }
 0x299   :  { %9555 = vmatprep.mubr.msk.f32.mxu1 %vm574_vm3, %v15070_v1  ;;  %v15079_v1 = vld [vmem:[#allocation172_spill] sm:$0xff] }
 0x29c   :  { %9556 = vmatmul.mubr.msk.f32.gmra.mrb[22].mxu1 %vm574_vm3, %v15071_v57  ;;  %v10253_v57 = vpack.c.bf16 %v3853_v0, %v3852_v33  ;;  %v15092_v33 = vld [vmem:[#allocation49_spill] sm:$0xff]  ;;  %v15093_v0 = vld [vmem:[#allocation184_spill] sm:$0xff] }
 0x29d   :  { %9558 = vmatprep.mubr.msk.f32.mxu1 %vm574_vm3, %v15072_v40  ;;  %v15080_v40 = vld [vmem:[#allocation173_spill] sm:$0xff] }
 0x2a0   :  { %9559 = vmatmul.mubr.msk.f32.gmra.mrb[24].mxu1 %vm574_vm3, %v15073_v63  ;;  %v15081_v63 = vld [vmem:[#allocation174_spill] sm:$0xff] }
 0x2a1   :  { %9561 = vmatprep.mubr.msk.f32.mxu1 %vm574_vm3, %v12346_v59  ;;  %v3498_v59 = vld [vmem:[%s14650_s1 + $0x110] sm:$0xff] }
 0x2a2   :  { %v10249_v39 = vpack.c.bf16 %v3498_v59, %v3497_v19  ;;  %v15087_v19 = vld [vmem:[#allocation180_spill] sm:$0xff] }
 0x2a3   :  { %v15088_v59 = vld [vmem:[#allocation48_spill] sm:$0xff] }
 0x2a4   :  { %9562 = vmatmul.mubr.msk.f32.gmra.mrb[26].mxu1 %vm574_vm3, %v12350_v24  ;;  %v15078_v24 = vld [vmem:[#allocation167_spill] sm:$0xff] }
 0x2a5   :  { %9564 = vmatprep.mubr.msk.f32.mxu1 %vm574_vm3, %v15074_v11  ;;  %v15082_v11 = vld [vmem:[#allocation175_spill] sm:$0xff] }
 0x2a8   :  { %9565 = vmatmul.mubr.msk.f32.gmra.mrb[28].mxu1 %vm574_vm3, %v15075_v7  ;;  %v15083_v7 = vld [vmem:[#allocation176_spill] sm:$0xff] }
 0x2a9   :  { %9567 = vmatprep.mubr.msk.f32.mxu1 %vm574_vm3, %v15076_v8  ;;  %v15086_v8 = vld [vmem:[#allocation179_spill] sm:$0xff] }
 0x2ac   :  { %9568 = vmatmul.mubr.msk.f32.gmra.mrb[30].mxu1 %vm574_vm3, %v15077_v16  ;;  %v15089_v16 = vld [vmem:[#allocation181_spill] sm:$0xff] }
 0x2ad   :  { %9578 = vmatprep.mubr.msk.f32.mxu1 %vm574_vm3, %v15078_v24  ;;  %v15090_v24 = vld [vmem:[#allocation182_spill] sm:$0xff] }
 0x2b0   :  { %9579 = vmatmul.mubr.msk.f32.vlgmr.msra.gmra.mrb[0].mxu1 %vm574_vm3, %v12382_v51  ;;  %v15084_v51 = vld [vmem:[#allocation177_spill] sm:$0xff] }
 0x2b1   :  { %9581 = vmatprep.mubr.msk.f32.mxu1 %vm574_vm3, %v15079_v1  ;;  %10248 = vmatpush3.bf16.msra.mxu1 %v10245_v23  ;;  %v15085_v23 = vld [vmem:[#allocation178_spill] sm:$0xff]  ;;  %v15094_v1 = vld [vmem:[#allocation185_spill] sm:$0xff] }
 0x2b2   :  { %10250 = vmatprep.subr.bf16.mxu1 %v10249_v39 }
 0x2b4   :  { %9582 = vmatmul.mubr.msk.f32.gmra.mrb[2].mxu1 %vm574_vm3, %v15080_v40  ;;  %v15095_v40 = vld [vmem:[#allocation186_spill] sm:$0xff] }
 0x2b5   :  { %9584 = vmatprep.mubr.msk.f32.mxu1 %vm574_vm3, %v15081_v63  ;;  %10252 = vmatpush3.bf16.msra.mxu1 %v10249_v39  ;;  %v15091_v39 = vld [vmem:[#allocation183_spill] sm:$0xff]  ;;  %v15096_v63 = vld [vmem:[#allocation58_spill] sm:$0xff] }
 0x2b6   :  { %10254 = vmatprep.subr.bf16.mxu1 %v10253_v57 }
 0x2b8   :  { %9585 = vmatmul.mubr.msk.f32.gmra.mrb[4].mxu1 %vm574_vm3, %v15082_v11  ;;  %v15097_v11 = vld [vmem:[#allocation187_spill] sm:$0xff] }
 0x2b9   :  { %9587 = vmatprep.mubr.msk.f32.mxu1 %vm574_vm3, %v15083_v7  ;;  %v15098_v7 = vld [vmem:[#allocation188_spill] sm:$0xff] }
 0x2bc   :  { %9588 = vmatmul.mubr.msk.f32.gmra.mrb[6].mxu1 %vm574_vm3, %v15084_v51  ;;  %v15099_v51 = vld [vmem:[#allocation189_spill] sm:$0xff] }
 0x2bd   :  { %9590 = vmatprep.mubr.msk.f32.mxu1 %vm574_vm3, %v15085_v23  ;;  %v15100_v23 = vld [vmem:[#allocation59_spill] sm:$0xff] }
 0x2c0   :  { %9591 = vmatmul.mubr.msk.f32.gmra.mrb[8].mxu1 %vm574_vm3, %v15086_v8  ;;  %v15101_v8 = vld [vmem:[#allocation190_spill] sm:$0xff] }
 0x2c1   :  { %9593 = vmatprep.mubr.msk.f32.mxu1 %vm574_vm3, %v15087_v19  ;;  %v15102_v19 = vld [vmem:[#allocation68_spill] sm:$0xff] }
 0x2c4   :  { %9594 = vmatmul.mubr.msk.f32.gmra.mrb[10].mxu1 %vm574_vm3, %v15088_v59  ;;  %v15103_v59 = vld [vmem:[#allocation191_spill] sm:$0xff] }
 0x2c5   :  { %9596 = vmatprep.mubr.msk.f32.mxu1 %vm574_vm3, %v15089_v16  ;;  %v15104_v16 = vld [vmem:[#allocation192_spill] sm:$0xff] }
 0x2c8   :  { %9597 = vmatmul.mubr.msk.f32.gmra.mrb[12].mxu1 %vm574_vm3, %v15090_v24  ;;  %v3854_v24 = vld [vmem:[%s14650_s1 + $0x128] sm:$0xff] }
 0x2c9   :  { %9599 = vmatprep.mubr.msk.f32.mxu1 %vm574_vm3, %v15091_v39  ;;  %v4114_v39 = vld [vmem:[%s14650_s1 + $0x140] sm:$0xff] }
 0x2cc   :  { %9600 = vmatmul.mubr.msk.f32.gmra.mrb[14].mxu1 %vm574_vm3, %v15092_v33  ;;  %v15135_v33 = vld [vmem:[#allocation14_spill] sm:$0xff] }
 0x2cd   :  { %9602 = vmatprep.mubr.msk.f32.mxu1 %vm574_vm3, %v15093_v0  ;;  %v15138_v0 = vld [vmem:[#allocation23_spill] sm:$0xff] }
 0x2d0   :  { %9603 = vmatmul.mubr.msk.f32.gmra.mrb[16].mxu1 %vm574_vm3, %v15094_v1  ;;  %v15139_v1 = vld [vmem:[#allocation30_spill] sm:$0xff] }
 0x2d1   :  { %9605 = vmatprep.mubr.msk.f32.mxu1 %vm574_vm3, %v15095_v40  ;;  %v15140_v40 = vld [vmem:[#allocation31_spill] sm:$0xff] }
 0x2d4   :  { %9606 = vmatmul.mubr.msk.f32.gmra.mrb[18].mxu1 %vm574_vm3, %v15096_v63  ;;  %v15141_v63 = vld [vmem:[#allocation38_spill] sm:$0xff] }
 0x2d5   :  { %9608 = vmatprep.mubr.msk.f32.mxu1 %vm574_vm3, %v15097_v11  ;;  %v15142_v11 = vld [vmem:[#allocation39_spill] sm:$0xff] }
 0x2d8   :  { %9609 = vmatmul.mubr.msk.f32.gmra.mrb[20].mxu1 %vm574_vm3, %v15098_v7  ;;  %v15143_v7 = vld [vmem:[#allocation46_spill] sm:$0xff] }
 0x2d9   :  { %9611 = vmatprep.mubr.msk.f32.mxu1 %vm574_vm3, %v15099_v51  ;;  %v15144_v51 = vld [vmem:[#allocation47_spill] sm:$0xff] }
 0x2dc   :  { %9612 = vmatmul.mubr.msk.f32.gmra.mrb[22].mxu1 %vm574_vm3, %v15100_v23  ;;  %v15145_v23 = vld [vmem:[#allocation56_spill] sm:$0xff] }
 0x2dd   :  { %9614 = vmatprep.mubr.msk.f32.mxu1 %vm574_vm3, %v15101_v8  ;;  %v15146_v8 = vld [vmem:[#allocation57_spill] sm:$0xff] }
 0x2e0   :  { %9615 = vmatmul.mubr.msk.f32.gmra.mrb[24].mxu1 %vm574_vm3, %v12515_v3  ;;  %v3855_v3 = vld [vmem:[%s14650_s1 + $0x130] sm:$0xff] }
 0x2e1   :  { %9617 = vmatprep.mubr.msk.f32.mxu1 %vm574_vm3, %v12519_v35  ;;  %v4113_v35 = vld [vmem:[%s14650_s1 + $0x138] sm:$0xff] }
 0x2e4   :  { %9618 = vmatmul.mubr.msk.f32.gmra.mrb[26].mxu1 %vm574_vm3, %v12527_v53  ;;  %v10257_v53 = vpack.c.bf16 %v3855_v3, %v3854_v24  ;;  %v15150_v24 = vld [vmem:[#allocation77_spill] sm:$0xff] }
 0x2e5   :  { %9620 = vmatprep.mubr.msk.f32.mxu1 %vm574_vm3, %v15102_v19  ;;  %v15147_v19 = vld [vmem:[#allocation66_spill] sm:$0xff]  ;;  %v15151_v3 = vld [vmem:[#allocation85_spill] sm:$0xff] }
 0x2e8   :  { %9621 = vmatmul.mubr.msk.f32.gmra.mrb[28].mxu1 %vm574_vm3, %v15103_v59  ;;  %v15148_v59 = vld [vmem:[#allocation67_spill] sm:$0xff] }
 0x2e9   :  { %9623 = vmatprep.mubr.msk.f32.mxu1 %vm574_vm3, %v15104_v16  ;;  %v15149_v16 = vld [vmem:[#allocation76_spill] sm:$0xff] }
 0x2ec   :  { %9624 = vmatmul.mubr.msk.f32.gmra.mrb[30].mxu1 %vm574_vm3, %v12547_v60  ;;  %v10261_v60 = vpack.c.bf16 %v4114_v39, %v4113_v35  ;;  %v15153_v35 = vld [vmem:[#allocation95_spill] sm:$0xff]  ;;  %v15154_v39 = vld [vmem:[#allocation96_spill] sm:$0xff] }
 0x2ed   :  { %9634 = vmatprep.mubr.msk.f32.mxu1 %vm574_vm3, %v12553_v62  ;;  %v15105_v62 = vld [vmem:[#allocation69_spill] sm:$0xff] }
 0x2f0   :  { %9635 = vmatmul.mubr.msk.f32.vlgmr.msra.gmra.mrb[0].mxu1 %vm574_vm3, %v12563_v34  ;;  %v15112_v34 = vld [vmem:[#allocation21_spill] sm:$0xff] }
 0x2f1   :  { %9637 = vmatprep.mubr.msk.f32.mxu1 %vm574_vm3, %v12567_v41  ;;  %10256 = vmatpush3.bf16.msra.mxu1 %v10253_v57  ;;  %v15113_v41 = vld [vmem:[#allocation32_spill] sm:$0xff]  ;;  %v15134_v57 = vld [vmem:[#allocation6_spill] sm:$0xff] }
 0x2f2   :  { %10258 = vmatprep.subr.bf16.mxu1 %v10257_v53 }
 0x2f4   :  { %9638 = vmatmul.mubr.msk.f32.gmra.mrb[2].mxu1 %vm574_vm3, %v12575_v21  ;;  %v4116_v21 = vld [vmem:[%s14650_s1 + $0x150] sm:$0xff] }
 0x2f5   :  { %9640 = vmatprep.mubr.msk.f32.mxu1 %vm574_vm3, %v12579_v13  ;;  %10260 = vmatpush3.bf16.msra.mxu1 %v10257_v53  ;;  %v4115_v13 = vld [vmem:[%s14650_s1 + $0x148] sm:$0xff]  ;;  %v15152_v53 = vld [vmem:[#allocation86_spill] sm:$0xff] }
 0x2f6   :  { %10262 = vmatprep.subr.bf16.mxu1 %v10261_v60 }
 0x2f8   :  { %9641 = vmatmul.mubr.msk.f32.gmra.mrb[4].mxu1 %vm574_vm3, %v12583_v25  ;;  %v15114_v25 = vld [vmem:[#allocation29_spill] sm:$0xff] }
 0x2f9   :  { %9643 = vmatprep.mubr.msk.f32.mxu1 %vm574_vm3, %v12587_v18  ;;  %v15115_v18 = vld [vmem:[#allocation40_spill] sm:$0xff] }
 0x2fc   :  { %9644 = vmatmul.mubr.msk.f32.gmra.mrb[6].mxu1 %vm574_vm3, %v12593_v43  ;;  %v15116_v43 = vld [vmem:[#allocation37_spill] sm:$0xff] }
 0x2fd   :  { %9646 = vmatprep.mubr.msk.f32.mxu1 %vm574_vm3, %v12597_v47  ;;  %v15117_v47 = vld [vmem:[#allocation50_spill] sm:$0xff] }
 0x300   :  { %9647 = vmatmul.mubr.msk.f32.gmra.mrb[8].mxu1 %vm574_vm3, %v12607_v48  ;;  %v15118_v48 = vld [vmem:[#allocation45_spill] sm:$0xff] }
 0x301   :  { %9649 = vmatprep.mubr.msk.f32.mxu1 %vm574_vm3, %v12611_v12  ;;  %v15119_v12 = vld [vmem:[#allocation60_spill] sm:$0xff] }
 0x304   :  { %9650 = vmatmul.mubr.msk.f32.gmra.mrb[10].mxu1 %vm574_vm3, %v12619_v36  ;;  %v15107_v36 = vld [vmem:[#allocation11_spill] sm:$0xff] }
 0x305   :  { %9652 = vmatprep.mubr.msk.f32.mxu1 %vm574_vm3, %v12623_v2  ;;  %v10265_v2 = vpack.c.bf16 %v4116_v21, %v4115_v13  ;;  %v15157_v13 = vld [vmem:[#allocation115_spill] sm:$0xff]  ;;  %v15158_v21 = vld [vmem:[#allocation116_spill] sm:$0xff] }
 0x308   :  { %9653 = vmatmul.mubr.msk.f32.gmra.mrb[12].mxu1 %vm574_vm3, %v12627_v38  ;;  %v15120_v38 = vld [vmem:[#allocation55_spill] sm:$0xff] }
 0x309   :  { %9655 = vmatprep.mubr.msk.f32.mxu1 %vm574_vm3, %v12631_v17  ;;  %v15121_v17 = vld [vmem:[#allocation70_spill] sm:$0xff] }
 0x30c   :  { %9656 = vmatmul.mubr.msk.f32.gmra.mrb[14].mxu1 %vm574_vm3, %v12637_v61  ;;  %v15122_v61 = vld [vmem:[#allocation65_spill] sm:$0xff] }
 0x30d   :  { %9658 = vmatprep.mubr.msk.f32.mxu1 %vm574_vm3, %v15105_v62  ;;  %v15156_v62 = vld [vmem:[#allocation105_spill] sm:$0xff] }
 0x310   :  { %9659 = vmatmul.mubr.msk.f32.gmra.mrb[16].mxu1 %vm574_vm3, %v12650_v9  ;;  %v15123_v9 = vld [vmem:[#allocation75_spill] sm:$0xff] }
 0x311   :  { %9661 = vmatprep.mubr.msk.f32.mxu1 %vm574_vm3, %v12659_v28  ;;  %v15110_v28 = vld [vmem:[#allocation13_spill] sm:$0xff] }
 0x314   :  { %9662 = vmatmul.mubr.msk.f32.gmra.mrb[18].mxu1 %vm574_vm3, %v12663_v26  ;;  %v15106_v26 = vld [vmem:[#allocation5_spill] sm:$0xff] }
 0x315   :  { %9664 = vmatprep.mubr.msk.f32.mxu1 %vm574_vm3, %v12667_v55  ;;  %v15124_v55 = vld [vmem:[#allocation89_spill] sm:$0xff] }
 0x318   :  { %9665 = vmatmul.mubr.msk.f32.gmra.mrb[20].mxu1 %vm574_vm3, %v12671_v10  ;;  %v15111_v10 = vld [vmem:[#allocation24_spill] sm:$0xff] }
 0x319   :  { %9667 = vmatprep.mubr.msk.f32.mxu1 %vm574_vm3, %v12677_v5  ;;  %v15125_v5 = vld [vmem:[#allocation84_spill] sm:$0xff] }
 0x31c   :  { %9668 = vmatmul.mubr.msk.f32.gmra.mrb[22].mxu1 %vm574_vm3, %v12681_v6  ;;  %v15126_v6 = vld [vmem:[#allocation99_spill] sm:$0xff] }
 0x31d   :  { %9670 = vmatprep.mubr.msk.f32.mxu1 %vm574_vm3, %v12685_v22  ;;  %v15127_v22 = vld [vmem:[#allocation94_spill] sm:$0xff] }
 0x320   :  { %9671 = vmatmul.mubr.msk.f32.gmra.mrb[24].mxu1 %vm574_vm3, %v12694_v20  ;;  %v15128_v20 = vld [vmem:[#allocation108_spill] sm:$0xff] }
 0x321   :  { %9673 = vmatprep.mubr.msk.f32.mxu1 %vm574_vm3, %v12701_v14  ;;  %v15129_v14 = vld [vmem:[#allocation103_spill] sm:$0xff] }
 0x324   :  { %9674 = vmatmul.mubr.msk.f32.gmra.mrb[26].mxu1 %vm574_vm3, %v12705_v54  ;;  %v15108_v54 = vld [vmem:[#allocation7_spill] sm:$0xff] }
 0x325   :  { %9676 = vmatprep.mubr.msk.f32.mxu1 %vm574_vm3, %v12709_v37  ;;  %v15109_v37 = vld [vmem:[#allocation16_spill] sm:$0xff] }
 0x328   :  { %9677 = vmatmul.mubr.msk.f32.gmra.mrb[28].mxu1 %vm574_vm3, %v12713_v32  ;;  %v15131_v32 = vld [vmem:[#allocation122_spill] sm:$0xff] }
 0x329   :  { %9679 = vmatprep.mubr.msk.f32.mxu1 %vm574_vm3, %v12719_v52  ;;  %v15132_v52 = vld [vmem:[#allocation138_spill] sm:$0xff] }
 0x32c   :  { %9680 = vmatmul.mubr.msk.f32.gmra.mrb[30].mxu1 %vm574_vm3, %v12725_v56  ;;  %v15133_v56 = vld [vmem:[#allocation133_spill] sm:$0xff] }
 0x32d   :  { %9690 = vmatprep.mubr.msk.f32.mxu1 %vm574_vm3, %v15106_v26  ;;  %v15159_v26 = vld [vmem:[#allocation123_spill] sm:$0xff] }
 0x330   :  { %9691 = vmatmul.mubr.msk.f32.vlgmr.msra.gmra.mrb[0].mxu1 %vm574_vm3, %v15107_v36  ;;  %v15161_v36 = vld [vmem:[#allocation134_spill] sm:$0xff] }
 0x331   :  { %9693 = vmatprep.mubr.msk.f32.mxu1 %vm574_vm3, %v15108_v54  ;;  %10264 = vmatpush3.bf16.msra.mxu1 %v10261_v60  ;;  %v15155_v60 = vld [vmem:[#allocation104_spill] sm:$0xff]  ;;  %v15162_v54 = vld [vmem:[#allocation135_spill] sm:$0xff] }
 0x332   :  { %10266 = vmatprep.subr.bf16.mxu1 %v10265_v2 }
 0x334   :  { %9694 = vmatmul.mubr.msk.f32.gmra.mrb[2].mxu1 %vm574_vm3, %v15109_v37  ;;  %v15163_v37 = vld [vmem:[#allocation143_spill] sm:$0xff] }
 0x335   :  { %9696 = vmatprep.mubr.msk.f32.mxu1 %vm574_vm3, %v15110_v28  ;;  %10268 = vmatpush3.bf16.msra.mxu1 %v10265_v2  ;;  %v15160_v2 = vld [vmem:[#allocation124_spill] sm:$0xff] }
 0x336   :  { %v15164_v28 = vld [vmem:[#allocation144_spill] sm:$0xff] }
 0x338   :  { %9697 = vmatmul.mubr.msk.f32.gmra.mrb[4].mxu1 %vm574_vm3, %v15111_v10  ;;  %v15165_v10 = vld [vmem:[#allocation141_spill] sm:$0xff] }
 0x339   :  { %9699 = vmatprep.mubr.msk.f32.mxu1 %vm574_vm3, %v15112_v34  ;;  %v15166_v34 = vld [vmem:[#allocation8_spill] sm:$0xff] }
 0x33c   :  { %9700 = vmatmul.mubr.msk.f32.gmra.mrb[6].mxu1 %vm574_vm3, %v15113_v41  ;;  %v13331_v41 = vld [vmem:[%s14650_s1 + $0x158] ss:$0 sm:$0xff] }
 0x33d   :  { %9702 = vmatprep.mubr.msk.f32.mxu1 %vm574_vm3, %v15114_v25  ;;  %v743_v25 = vadd.f32 %v12853_v45, %v13331_v41 }
 0x340   :  { %9703 = vmatmul.mubr.msk.f32.gmra.mrb[8].mxu1 %vm574_vm3, %v15115_v18  ;;  %v738_v18 = vadd.f32 %v13331_v41, %v12857_v49  ;;  %v15167_v49 = vld [vmem:[#allocation78_spill] sm:$0xff] }
 0x341   :  { %9705 = vmatprep.mubr.msk.f32.mxu1 %vm574_vm3, %v15116_v43 }
 0x344   :  { %9706 = vmatmul.mubr.msk.f32.gmra.mrb[10].mxu1 %vm574_vm3, %v15117_v47 }
 0x345   :  { %9708 = vmatprep.mubr.msk.f32.mxu1 %vm574_vm3, %v15118_v48 }
 0x348   :  { %9709 = vmatmul.mubr.msk.f32.gmra.mrb[12].mxu1 %vm574_vm3, %v15119_v12 }
 0x349   :  { %9711 = vmatprep.mubr.msk.f32.mxu1 %vm574_vm3, %v15120_v38  ;;  %v753_v38 = vadd.f32 %v12861_v42, %v13331_v41 }
 0x34c   :  { %9712 = vmatmul.mubr.msk.f32.gmra.mrb[14].mxu1 %vm574_vm3, %v15121_v17 }
 0x34d   :  { %9714 = vmatprep.mubr.msk.f32.mxu1 %vm574_vm3, %v15122_v61  ;;  %v748_v61 = vadd.f32 %v13331_v41, %v12865_v31 }
 0x350   :  { %9715 = vmatmul.mubr.msk.f32.gmra.mrb[16].mxu1 %vm574_vm3, %v11756_v46  ;;  %v15130_v46 = vld [vmem:[#allocation127_spill] sm:$0xff] }
 0x351   :  { %9717 = vmatprep.mubr.msk.f32.mxu1 %vm574_vm3, %v15123_v9 }
 0x354   :  { %9718 = vmatmul.mubr.msk.f32.gmra.mrb[18].mxu1 %vm574_vm3, %v15124_v55 }
 0x355   :  { %9720 = vmatprep.mubr.msk.f32.mxu1 %vm574_vm3, %v15125_v5 }
 0x358   :  { %9721 = vmatmul.mubr.msk.f32.gmra.mrb[20].mxu1 %vm574_vm3, %v15126_v6 }
 0x359   :  { %9723 = vmatprep.mubr.msk.f32.mxu1 %vm574_vm3, %v15127_v22 }
 0x35c   :  { %9724 = vmatmul.mubr.msk.f32.gmra.mrb[22].mxu1 %vm574_vm3, %v15128_v20 }
 0x35d   :  { %9726 = vmatprep.mubr.msk.f32.mxu1 %vm574_vm3, %v15129_v14  ;;  %v763_v14 = vadd.f32 %v15167_v49, %v13331_v41 }
 0x360   :  { %9727 = vmatmul.mubr.msk.f32.gmra.mrb[24].mxu1 %vm574_vm3, %v11966_v29  ;;  %v15136_v29 = vld [vmem:[#allocation15_spill] sm:$0xff] }
 0x361   :  { %9729 = vmatprep.mubr.msk.f32.mxu1 %vm574_vm3, %v11948_v44  ;;  %v15137_v44 = vld [vmem:[#allocation22_spill] sm:$0xff] }
 0x364   :  { %9730 = vmatmul.mubr.msk.f32.gmra.mrb[26].mxu1 %vm574_vm3, %v15130_v46 }
 0x365   :  { %9732 = vmatprep.mubr.msk.f32.mxu1 %vm574_vm3, %v15131_v32  ;;  %v15168_v32 = vld [vmem:[#allocation79_spill] sm:$0xff] }
 0x368   :  { %9733 = vmatmul.mubr.msk.f32.gmra.mrb[28].mxu1 %vm574_vm3, %v15132_v52  ;;  %v758_v52 = vadd.f32 %v13331_v41, %v15168_v32 }
 0x369   :  { %9735 = vmatprep.mubr.msk.f32.mxu1 %vm574_vm3, %v15133_v56 }
 0x36c   :  { %9736 = vmatmul.mubr.msk.f32.gmra.mrb[30].mxu1 %vm574_vm3, %v15134_v57 }
 0x36d   :  { %9746 = vmatprep.mubr.msk.f32.mxu1 %vm574_vm3, %v15135_v33 }
 0x370   :  { %9747 = vmatmul.mubr.msk.f32.vlgmr.msra.gmra.mrb[0].mxu1 %vm574_vm3, %v15136_v29 }
 0x371   :  { %9749 = vmatprep.mubr.msk.f32.mxu1 %vm574_vm3, %v15137_v44 }
 0x374   :  { %9750 = vmatmul.mubr.msk.f32.gmra.mrb[2].mxu1 %vm574_vm3, %v15138_v0 }
 0x375   :  { %9752 = vmatprep.mubr.msk.f32.mxu1 %vm574_vm3, %v15139_v1 }
 0x378   :  { %9753 = vmatmul.mubr.msk.f32.gmra.mrb[4].mxu1 %vm574_vm3, %v15140_v40 }
 0x379   :  { %9755 = vmatprep.mubr.msk.f32.mxu1 %vm574_vm3, %v15141_v63  ;;  %v15170_v63 = vld [vmem:[#allocation87_spill] sm:$0xff] }
 0x37c   :  { %9756 = vmatmul.mubr.msk.f32.gmra.mrb[6].mxu1 %vm574_vm3, %v15142_v11  ;;  %v773_v11 = vadd.f32 %v15170_v63, %v13331_v41  ;;  %v15177_v63 = vld [vmem:[#allocation118_spill] sm:$0xff] }
 0x37d   :  { %9758 = vmatprep.mubr.msk.f32.mxu1 %vm574_vm3, %v15143_v7 }
 0x380   :  { %9759 = vmatmul.mubr.msk.f32.gmra.mrb[8].mxu1 %vm574_vm3, %v15144_v51  ;;  %v15171_v51 = vld [vmem:[#allocation88_spill] sm:$0xff] }
 0x381   :  { %9761 = vmatprep.mubr.msk.f32.mxu1 %vm574_vm3, %v15145_v23  ;;  %v768_v23 = vadd.f32 %v13331_v41, %v15171_v51 }
 0x384   :  { %9762 = vmatmul.mubr.msk.f32.gmra.mrb[10].mxu1 %vm574_vm3, %v15146_v8 }
 0x385   :  { %9764 = vmatprep.mubr.msk.f32.mxu1 %vm574_vm3, %v15147_v19 }
 0x388   :  { %9765 = vmatmul.mubr.msk.f32.gmra.mrb[12].mxu1 %vm574_vm3, %v15148_v59 }
 0x389   :  { %9767 = vmatprep.mubr.msk.f32.mxu1 %vm574_vm3, %v15149_v16 }
 0x38c   :  { %9768 = vmatmul.mubr.msk.f32.gmra.mrb[14].mxu1 %vm574_vm3, %v15150_v24 }
 0x38d   :  { %9770 = vmatprep.mubr.msk.f32.mxu1 %vm574_vm3, %v15151_v3 }
 0x390   :  { %9771 = vmatmul.mubr.msk.f32.gmra.mrb[16].mxu1 %vm574_vm3, %v15152_v53 }
 0x391   :  { %9773 = vmatprep.mubr.msk.f32.mxu1 %vm574_vm3, %v15153_v35 }
 0x394   :  { %9774 = vmatmul.mubr.msk.f32.gmra.mrb[18].mxu1 %vm574_vm3, %v15154_v39 }
 0x395   :  { %9776 = vmatprep.mubr.msk.f32.mxu1 %vm574_vm3, %v15155_v60 }
 0x398   :  { %9777 = vmatmul.mubr.msk.f32.gmra.mrb[20].mxu1 %vm574_vm3, %v15156_v62 }
 0x399   :  { %9779 = vmatprep.mubr.msk.f32.mxu1 %vm574_vm3, %v15157_v13  ;;  %v15172_v13 = vld [vmem:[#allocation97_spill] sm:$0xff] }
 0x39c   :  { %9780 = vmatmul.mubr.msk.f32.gmra.mrb[22].mxu1 %vm574_vm3, %v15158_v21  ;;  %v783_v21 = vadd.f32 %v15172_v13, %v13331_v41 }
 0x39d   :  { %9782 = vmatprep.mubr.msk.f32.mxu1 %vm574_vm3, %v15159_v26 }
 0x3a0   :  { %9783 = vmatmul.mubr.msk.f32.gmra.mrb[24].mxu1 %vm574_vm3, %v15160_v2 }
 0x3a1   :  { %9785 = vmatprep.mubr.msk.f32.mxu1 %vm574_vm3, %v15161_v36  ;;  %v15173_v36 = vld [vmem:[#allocation98_spill] sm:$0xff] }
 0x3a4   :  { %9786 = vmatmul.mubr.msk.f32.gmra.mrb[26].mxu1 %vm574_vm3, %v15162_v54  ;;  %v778_v54 = vadd.f32 %v13331_v41, %v15173_v36 }
 0x3a5   :  { %9788 = vmatprep.mubr.msk.f32.mxu1 %vm574_vm3, %v15163_v37 }
 0x3a8   :  { %9789 = vmatmul.mubr.msk.f32.gmra.mrb[28].mxu1 %vm574_vm3, %v15164_v28 }
 0x3a9   :  { %9791 = vmatprep.mubr.msk.f32.mxu1 %vm574_vm3, %v15165_v10 }
 0x3ac   :  { %9792 = vmatmul.mubr.msk.f32.gmra.mrb[30].mxu1 %vm574_vm3, %v15166_v34 }
 0x443   :  { %v9748_v43 = vpop.f32.mrb[0].mxu1 }
 0x444   :  { %v10410_v47 = vadd.f32 %v9748_v43, %v743_v25  ;;  %v4183_v48 = vpop.f32.mrb[1].mxu1 }
 0x445   :  { %v10412_v12 = vadd.f32 %v4183_v48, %v738_v18 }
 0x446   :  { %v4375_v17 = vmax.f32 %v10410_v47, 0.0 }
 0x447   :  { %v4374_v9 = vmax.f32 %v10412_v12, 0.0  ;;  %v9751_v55 = vpop.f32.mrb[2].mxu1 }
 0x448   :  { %v4407_v5 = vrot.slane %v4375_v17, 1  ;;  %v10414_v6 = vadd.f32 %v9751_v55, %v753_v38  ;;  %v4193_v22 = vpop.f32.mrb[3].mxu1 }
 0x449   :  { %v13341_v45 = vrot.slane %v4374_v9, 1  ;;  %v10416_v20 = vadd.f32 %v4193_v22, %v748_v61 }
 0x44a   :  { %v4377_v46 = vmax.f32 %v10414_v6, 0.0 }
 0x44b   :  { %v4468_v56 = vsel %vm930_vm0, %v13341_v45, %v4407_v5  ;;  %v4376_v31 = vmax.f32 %v10416_v20, 0.0  ;;  %v9754_v57 = vpop.f32.mrb[4].mxu1 }
 0x44c   :  { %v13350_v33 = vmax.f32 %v4374_v9, %v4468_v56  ;;  %v4409_v29 = vrot.slane %v4377_v46, 1  ;;  %v10418_v44 = vadd.f32 %v9754_v57, %v763_v14  ;;  %v4203_v0 = vpop.f32.mrb[5].mxu1 }
 0x44d   :  { %v4408_v1 = vrot.slane %v4376_v31, 1  ;;  %v10420_v40 = vadd.f32 %v4203_v0, %v758_v52 }
 0x44e   :  { %v4379_v7 = vmax.f32 %v10418_v44, 0.0  ;;  %v15176_v44 = vld [vmem:[#allocation117_spill] sm:$0xff] }
 0x44f   :  { %v4466_v8 = vsel %vm930_vm0, %v4408_v1, %v4409_v29  ;;  %v4467_v19 = vsel %vm930_vm0, %v4407_v5, %v4408_v1  ;;  %v4378_v59 = vmax.f32 %v10420_v40, 0.0  ;;  %v9757_v16 = vpop.f32.mrb[6].mxu1  ;;  %v15175_v5 = vld [vmem:[#allocation107_spill] sm:$0xff]  ;;  %v803_v0 = vadd.f32 %v15176_v44, %v13331_v41 }
 0x450   :  { %v13360_v24 = vmax.f32 %v4375_v17, %v4467_v19  ;;  %v13362_v3 = vmax.f32 %v4376_v31, %v4466_v8  ;;  %v4411_v53 = vrot.slane %v4379_v7, 1  ;;  %v10422_v35 = vadd.f32 %v9757_v16, %v773_v11  ;;  %v4213_v39 = vpop.f32.mrb[7].mxu1  ;;  %v15174_v17 = vld [vmem:[#allocation106_spill] sm:$0xff] }
 0x451   :  { %v4410_v60 = vrot.slane %v4378_v59, 1  ;;  %v10424_v62 = vadd.f32 %v4213_v39, %v768_v23  ;;  %v793_v61 = vadd.f32 %v15174_v17, %v13331_v41  ;;  %v788_v6 = vadd.f32 %v13331_v41, %v15175_v5  ;;  %v15180_v5 = vld [vmem:[#allocation136_spill] sm:$0xff] }
 0x452   :  { %v4381_v26 = vmax.f32 %v10422_v35, 0.0  ;;  %v10271_v2 = vpack.c.bf16 %v13360_v24, %v13350_v33  ;;  %v798_v11 = vadd.f32 %v13331_v41, %v15177_v63 }
 0x453   :  { %v4464_v37 = vsel %vm930_vm0, %v4410_v60, %v4411_v53  ;;  %v4465_v28 = vsel %vm930_vm0, %v4409_v29, %v4410_v60  ;;  %v4380_v10 = vmax.f32 %v10424_v62, 0.0  ;;  %v9760_v34 = vpop.f32.mrb[8].mxu1  ;;  %v15178_v62 = vld [vmem:[#allocation125_spill] sm:$0xff] }
 0x454   :  { %v13374_v25 = vmax.f32 %v4377_v46, %v4465_v28  ;;  %v13376_v18 = vmax.f32 %v4378_v59, %v4464_v37  ;;  %v4413_v43 = vrot.slane %v4381_v26, 1  ;;  %v10426_v47 = vadd.f32 %v9760_v34, %v783_v21  ;;  %v4223_v48 = vpop.f32.mrb[9].mxu1 }
 0x455   :  { %v4412_v12 = vrot.slane %v4380_v10, 1  ;;  %v10428_v38 = vadd.f32 %v4223_v48, %v778_v54  ;;  %v813_v13 = vadd.f32 %v15178_v62, %v13331_v41  ;;  %v15179_v54 = vld [vmem:[#allocation126_spill] sm:$0xff] }
 0x456   :  { %v4383_v9 = vmax.f32 %v10426_v47, 0.0  ;;  %v10275_v55 = vpack.c.bf16 %v13374_v25, %v13362_v3  ;;  %v808_v37 = vadd.f32 %v13331_v41, %v15179_v54 }
 0x457   :  { %v4462_v22 = vsel %vm930_vm0, %v4412_v12, %v4413_v43  ;;  %v4463_v20 = vsel %vm930_vm0, %v4411_v53, %v4412_v12  ;;  %v4382_v49 = vmax.f32 %v10428_v38, 0.0  ;;  %v9763_v14 = vpop.f32.mrb[10].mxu1 }
 0x458   :  { %v13388_v46 = vmax.f32 %v4379_v7, %v4463_v20  ;;  %v13390_v32 = vmax.f32 %v4380_v10, %v4462_v22  ;;  %v4415_v52 = vrot.slane %v4383_v9, 1  ;;  %v10430_v56 = vadd.f32 %v9763_v14, %v793_v61  ;;  %v4233_v31 = vpop.f32.mrb[11].mxu1 }
 0x459   :  { %v4414_v57 = vrot.slane %v4382_v49, 1  ;;  %v10432_v29 = vadd.f32 %v4233_v31, %v788_v6  ;;  %v823_v6 = vadd.f32 %v15180_v5, %v13331_v41 }
 0x45a   :  { %v4385_v1 = vmax.f32 %v10430_v56, 0.0  ;;  %v10279_v40 = vpack.c.bf16 %v13388_v46, %v13376_v18 }
 0x45b   :  { %v4460_v7 = vsel %vm930_vm0, %v4414_v57, %v4415_v52  ;;  %v4461_v51 = vsel %vm930_vm0, %v4413_v43, %v4414_v57  ;;  %v4384_v23 = vmax.f32 %v10432_v29, 0.0  ;;  %v9766_v8 = vpop.f32.mrb[12].mxu1 }
 0x45c   :  { %v13402_v19 = vmax.f32 %v4381_v26, %v4461_v51  ;;  %v13404_v59 = vmax.f32 %v4382_v49, %v4460_v7  ;;  %v4417_v16 = vrot.slane %v4385_v1, 1  ;;  %v10434_v53 = vadd.f32 %v9766_v8, %v803_v0  ;;  %v4243_v35 = vpop.f32.mrb[13].mxu1  ;;  %v15181_v49 = vld [vmem:[#allocation137_spill] sm:$0xff] }
 0x45d   :  { %v4416_v39 = vrot.slane %v4384_v23, 1  ;;  %v10436_v60 = vadd.f32 %v4243_v35, %v798_v11  ;;  %v818_v14 = vadd.f32 %v13331_v41, %v15181_v49  ;;  %v833_v51 = vadd.f32 %v12925_v27, %v13331_v41 }
 0x45e   :  { %v4387_v21 = vmax.f32 %v10434_v53, 0.0  ;;  %v10283_v36 = vpack.c.bf16 %v13402_v19, %v13390_v32  ;;  %v15182_v53 = vld [vmem:[#allocation9_spill] sm:$0xff] }
 0x45f   :  { %v4458_v26 = vsel %vm930_vm0, %v4416_v39, %v4417_v16  ;;  %v4459_v28 = vsel %vm930_vm0, %v4415_v52, %v4416_v39  ;;  %v4386_v10 = vmax.f32 %v10436_v60, 0.0  ;;  %v9769_v34 = vpop.f32.mrb[14].mxu1 }
 0x460   :  { %v13416_v43 = vmax.f32 %v4383_v9, %v4459_v28  ;;  %v13418_v47 = vmax.f32 %v4384_v23, %v4458_v26  ;;  %v4419_v48 = vrot.slane %v4387_v21, 1  ;;  %v10438_v12 = vadd.f32 %v9769_v34, %v813_v13  ;;  %v4253_v38 = vpop.f32.mrb[15].mxu1 }
 0x461   :  { %v4418_v17 = vrot.slane %v4386_v10, 1  ;;  %v10440_v61 = vadd.f32 %v4253_v38, %v808_v37 }
 0x462   :  { %v4389_v22 = vmax.f32 %v10438_v12, 0.0  ;;  %v10287_v20 = vpack.c.bf16 %v13416_v43, %v13404_v59 }
 0x463   :  { %v4456_v9 = vsel %vm930_vm0, %v4418_v17, %v4419_v48  ;;  %v4457_v52 = vsel %vm930_vm0, %v4417_v16, %v4418_v17  ;;  %v4388_v56 = vmax.f32 %v10440_v61, 0.0  ;;  %v9772_v31 = vpop.f32.mrb[16].mxu1  ;;  %v828_v16 = vadd.f32 %v13331_v41, %v15182_v53  ;;  %v15184_v17 = vld [vmem:[#allocation18_spill] sm:$0xff] }
 0x464   :  { %v13430_v57 = vmax.f32 %v4385_v1, %v4457_v52  ;;  %v13432_v29 = vmax.f32 %v4386_v10, %v4456_v9  ;;  %v4421_v44 = vrot.slane %v4389_v22, 1  ;;  %v10442_v0 = vadd.f32 %v9772_v31, %v823_v6  ;;  %v4263_v63 = vpop.f32.mrb[17].mxu1  ;;  %v15183_v10 = vld [vmem:[#allocation17_spill] sm:$0xff]  ;;  %v15186_v53 = vld [vmem:[#allocation26_spill] sm:$0xff] }
 0x465   :  { %v4420_v11 = vrot.slane %v4388_v56, 1  ;;  %v10444_v7 = vadd.f32 %v4263_v63, %v818_v14  ;;  %v843_v34 = vadd.f32 %v15183_v10, %v13331_v41  ;;  %v15185_v63 = vld [vmem:[#allocation25_spill] sm:$0xff] }
 0x466   :  { %v4391_v23 = vmax.f32 %v10442_v0, 0.0  ;;  %v10291_v8 = vpack.c.bf16 %v13430_v57, %v13418_v47  ;;  %v15193_v47 = vmov 1.0   ;;  %v4525_v57 = vpop.permute.xlu0 %4524 }
 0x467   :  { %v4454_v1 = vsel %vm930_vm0, %v4420_v11, %v4421_v44  ;;  %v4455_v35 = vsel %vm930_vm0, %v4419_v48, %v4420_v11  ;;  %v4390_v39 = vmax.f32 %v10444_v7, 0.0  ;;  %v9775_v60 = vpop.f32.mrb[18].mxu1  ;;  %v838_v48 = vadd.f32 %v13331_v41, %v15184_v17 }
 0x468   :  { %v13444_v62 = vmax.f32 %v4387_v21, %v4455_v35  ;;  %v13446_v13 = vmax.f32 %v4388_v56, %v4454_v1  ;;  %v4423_v27 = vrot.slane %v4391_v23, 1  ;;  %v10446_v54 = vadd.f32 %v9775_v60, %v833_v51  ;;  %v4273_v37 = vpop.f32.mrb[19].mxu1 }
 0x469   :  { %v4422_v26 = vrot.slane %v4390_v39, 1  ;;  %v10448_v28 = vadd.f32 %v4273_v37, %v828_v16  ;;  %v853_v11 = vadd.f32 %v15185_v63, %v13331_v41 }
 0x46a   :  { %v4393_v12 = vmax.f32 %v10446_v54, 0.0  ;;  %v10295_v38 = vpack.c.bf16 %v13444_v62, %v13432_v29 }
 0x46b   :  { %v4452_v21 = vsel %vm930_vm0, %v4422_v26, %v4423_v27  ;;  %v4453_v61 = vsel %vm930_vm0, %v4421_v44, %v4422_v26  ;;  %v4392_v5 = vmax.f32 %v10448_v28, 0.0  ;;  %v9778_v6 = vpop.f32.mrb[20].mxu1  ;;  %v848_v44 = vadd.f32 %v13331_v41, %v15186_v53 }
 0x46c   :  { %v13458_v49 = vmax.f32 %v4389_v22, %v4453_v61  ;;  %v4486_v14 = vmax.f32 %v4390_v39, %v4452_v21  ;;  %v4425_v9 = vrot.slane %v4393_v12, 1  ;;  %v10450_v52 = vadd.f32 %v9778_v6, %v843_v34  ;;  %v4283_v56 = vpop.f32.mrb[21].mxu1  ;;  %v15187_v34 = vld [vmem:[#allocation33_spill] sm:$0xff]  ;;  %v15188_v61 = vld [vmem:[#allocation34_spill] sm:$0xff] }
 0x46d   :  { %v4424_v31 = vrot.slane %v4392_v5, 1  ;;  %v10452_v0 = vadd.f32 %v4283_v56, %v838_v48  ;;  %v863_v17 = vadd.f32 %v15187_v34, %v13331_v41  ;;  %v858_v6 = vadd.f32 %v13331_v41, %v15188_v61 }
 0x46e   :  { %v4395_v7 = vmax.f32 %v10450_v52, 0.0  ;;  %v10299_v51 = vpack.c.bf16 %v13458_v49, %v13446_v13 }
 0x46f   :  { %v4450_v22 = vsel %vm930_vm0, %v4424_v31, %v4425_v9  ;;  %v4394_v16 = vmax.f32 %v10452_v0, 0.0  ;;  %v9781_v1 = vpop.f32.mrb[22].mxu1  ;;  %v4451_v35 = vsel %vm930_vm0, %v4423_v27, %v4424_v31 }
 0x470   :  { %v4488_v39 = vmax.f32 %v4392_v5, %v4450_v22  ;;  %v4427_v60 = vrot.slane %v4395_v7, 1  ;;  %v10454_v54 = vadd.f32 %v9781_v1, %v853_v11  ;;  %v4293_v37 = vpop.f32.mrb[23].mxu1  ;;  %v4487_v26 = vmax.f32 %v4391_v23, %v4451_v35 }
 0x471   :  { %v4426_v28 = vrot.slane %v4394_v16, 1  ;;  %v10456_v10 = vadd.f32 %v4293_v37, %v848_v44 }
 0x472   :  { %v4397_v48 = vmax.f32 %v10454_v54, 0.0  ;;  %v10269_v21 = vpack.c.bf16 %v4487_v26, %v4486_v14  ;;  %v15189_v14 = vld [vmem:[#allocation41_spill] sm:$0xff] }
 0x473   :  { %v4448_v52 = vsel %vm930_vm0, %v4426_v28, %v4427_v60  ;;  %v4396_v56 = vmax.f32 %v10456_v10, 0.0  ;;  %v9784_v27 = vpop.f32.mrb[24].mxu1  ;;  %v4449_v5 = vsel %vm930_vm0, %v4425_v9, %v4426_v28  ;;  %v873_v22 = vadd.f32 %v15189_v14, %v13331_v41 }
 0x474   :  { %v4490_v31 = vmax.f32 %v4394_v16, %v4448_v52  ;;  %v4429_v23 = vrot.slane %v4397_v48, 1  ;;  %v10458_v0 = vadd.f32 %v9784_v27, %v863_v17  ;;  %v4303_v63 = vpop.f32.mrb[25].mxu1  ;;  %10270 = vmatprep.subr.bf16.mxu0 %v10269_v21  ;;  %v4489_v11 = vmax.f32 %v4393_v12, %v4449_v5 }
 0x475   :  { %v4428_v53 = vrot.slane %v4396_v56, 1  ;;  %v10460_v44 = vadd.f32 %v4303_v63, %v858_v6  ;;  %10272 = vmatpush3.bf16.msra.mxu0 %v10271_v2  ;;  %v868_v9 = vadd.f32 %v13331_v41, %v12974_v50  ;;  %v883_v50 = vadd.f32 %v12978_v58, %v13331_v41 }
 0x476   :  { %v4399_v1 = vmax.f32 %v10458_v0, 0.0  ;;  %v10273_v35 = vpack.c.bf16 %v4489_v11, %v4488_v39 }
 0x477   :  { %v4446_v16 = vsel %vm930_vm0, %v4428_v53, %v4429_v23  ;;  %v4398_v54 = vmax.f32 %v10460_v44, 0.0  ;;  %v9787_v37 = vpop.f32.mrb[26].mxu1  ;;  %v4447_v12 = vsel %vm930_vm0, %v4427_v60, %v4428_v53  ;;  %v878_v60 = vadd.f32 %v13331_v41, %v12982_v15 }
 0x478   :  { %v4492_v26 = vmax.f32 %v4396_v56, %v4446_v16  ;;  %v4431_v28 = vrot.slane %v4399_v1, 1  ;;  %v10462_v33 = vadd.f32 %v9787_v37, %v873_v22  ;;  %v4313_v24 = vpop.f32.mrb[27].mxu1  ;;  %10274 = vmatprep.subr.bf16.mxu0 %v10273_v35  ;;  %v4491_v2 = vmax.f32 %v4395_v7, %v4447_v12 }
 0x479   :  { %v4430_v10 = vrot.slane %v4398_v54, 1  ;;  %v10464_v34 = vadd.f32 %v4313_v24, %v868_v9  ;;  %10276 = vmatpush3.bf16.msra.mxu0 %v10275_v55  ;;  %v893_v15 = vadd.f32 %v12986_v4, %v13331_v41  ;;  %v15191_v24 = vld [vmem:[#allocation2_spill] sm:$0xff] }
 0x47a   :  { %v4401_v39 = vmax.f32 %v10462_v33, 0.0  ;;  %v10277_v17 = vpack.c.bf16 %v4491_v2, %v4490_v31  ;;  %v15192_v2 = vld [vmem:[#allocation4_spill] sm:$0xff]  ;;  %vm4563_vm15 = vcmp.eq.s32.totalorder %v15191_v24, %v4525_v57 }
 0x47b   :  { %v4444_v21 = vsel %vm930_vm0, %v4430_v10, %v4431_v28  ;;  %v4400_v61 = vmax.f32 %v10464_v34, 0.0  ;;  %v9790_v6 = vpop.f32.mrb[28].mxu1  ;;  %v4445_v7 = vsel %vm930_vm0, %v4429_v23, %v4430_v10  ;;  %v888_v23 = vadd.f32 %v13331_v41, %v12990_v30 }
 0x47c   :  { %v4494_v52 = vmax.f32 %v4398_v54, %v4444_v21  ;;  %v4433_v56 = vrot.slane %v4401_v39, 1  ;;  %v10466_v3 = vadd.f32 %v9790_v6, %v883_v50  ;;  %v4323_v25 = vpop.f32.mrb[29].mxu1  ;;  %10278 = vmatprep.subr.bf16.mxu0 %v10277_v17  ;;  %v4493_v55 = vmax.f32 %v4397_v48, %v4445_v7  ;;  %v4778_v17 = vld [vmem:[%s14650_s1 + $0x160] sm:$0xff]  ;;  %v4995_v6 = vld [vmem:[%s14650_s1 + $0x170] sm:$0xff]  ;;  %v4996_v7 = vld [vmem:[%s14650_s1 + $0x178] sm:$0x3] }
 0x47d   :  { %v4432_v58 = vrot.slane %v4400_v61, 1  ;;  %v10468_v27 = vadd.f32 %v4323_v25, %v878_v60  ;;  %10280 = vmatpush3.bf16.msra.mxu0 %v10279_v40  ;;  %vm4564_vm14 = vcmp.eq.s32.totalorder %v15192_v2, %v4525_v57  ;;  %v4779_v60 = vld [vmem:[%s14650_s1 + $0x168] sm:$0x3] }
 0x47e   :  { %v4403_v5 = vmax.f32 %v10466_v3, 0.0  ;;  %v10281_v31 = vpack.c.bf16 %v4493_v55, %v4492_v26  ;;  %v10301_v21 = vpack.c.bf16 %v4779_v60, %v4778_v17  ;;  %v5219_v55 = vld [vmem:[%s14650_s1 + $0x180] sm:$0xff] }
 0x47f   :  { %v4442_v0 = vsel %vm930_vm0, %v4432_v58, %v4433_v56  ;;  %v4402_v63 = vmax.f32 %v10468_v27, 0.0  ;;  %v9793_v11 = vpop.f32.mrb[30].mxu1  ;;  %v4443_v48 = vsel %vm930_vm0, %v4431_v28, %v4432_v58  ;;  %v5220_v58 = vld [vmem:[%s14650_s1 + $0x188] sm:$0x3] }
 0x480   :  { %v4496_v53 = vmax.f32 %v4400_v61, %v4442_v0  ;;  %v4435_v44 = vrot.slane %v4403_v5, 1  ;;  %v10470_v18 = vadd.f32 %v9793_v11, %v893_v15  ;;  %v4333_v46 = vpop.f32.mrb[31].mxu1  ;;  %10282 = vmatprep.subr.bf16.mxu0 %v10281_v31  ;;  %v4495_v40 = vmax.f32 %v4399_v1, %v4443_v48  ;;  %v7577_v61 = vld [vmem:[%s14650_s1 + $0x250] sm:$0xff] }
 0x481   :  { %v4434_v4 = vrot.slane %v4402_v63, 1  ;;  %v10472_v14 = vadd.f32 %v4333_v46, %v888_v23  ;;  %10284 = vmatpush3.bf16.msra.mxu0 %v10283_v36  ;;  %v13625_v23 = vpack.c.bf16 %v5220_v58, %v5219_v55 }
 0x482   :  { %v4405_v30 = vmax.f32 %v10470_v18, 0.0  ;;  %v10285_v41 = vpack.c.bf16 %v4495_v40, %v4494_v52  ;;  %v10307_v52 = vpack.c.bf16 %v4996_v7, %v4995_v6 }
 0x483   :  { %v4440_v22 = vsel %vm930_vm0, %v4434_v4, %v4435_v44  ;;  %v4404_v35 = vmax.f32 %v10472_v14, 0.0  ;;  %v4441_v9 = vsel %vm930_vm0, %v4433_v56, %v4434_v4 }
 0x484   :  { %v4498_v16 = vmax.f32 %v4402_v63, %v4440_v22  ;;  %v4437_v54 = vrot.slane %v4405_v30, 1  ;;  %10286 = vmatprep.subr.bf16.mxu0 %v10285_v41  ;;  %v4497_v37 = vmax.f32 %v4401_v39, %v4441_v9 }
 0x485   :  { %v4436_v1 = vrot.slane %v4404_v35, 1  ;;  %10288 = vmatpush3.bf16.msra.mxu0 %v10287_v20  ;;  %v15190_v20 = vld [vmem:[#allocation114_spill] sm:$0xff] }
 0x486   :  { %v4469_v32 = vsel %vm930_vm0, %v4437_v54, %v13341_v45  ;;  %v10289_v19 = vpack.c.bf16 %v4497_v37, %v4496_v53  ;;  %v4522_v45 = vpop.permute.xlu1 %4521  ;;  %vm4559_vm11 = vcmp.eq.s32.totalorder %v15191_v24, %v15190_v20 }
 0x487   :  { %v4501_v36 = vmax.f32 %v4405_v30, %v4469_v32  ;;  %v4438_v12 = vsel %vm930_vm0, %v4436_v1, %v4437_v54  ;;  %v4439_v26 = vsel %vm930_vm0, %v4435_v44, %v4436_v1  ;;  %vm4562_vm12 = vcmp.eq.s32.totalorder %v15192_v2, %v4522_v45 }
 0x488   :  { %v4500_v28 = vmax.f32 %v4404_v35, %v4438_v12  ;;  %10290 = vmatprep.subr.bf16.mxu0 %v10289_v19  ;;  %v4499_v33 = vmax.f32 %v4403_v5, %v4439_v26  ;;  %vm4561_vm13 = vcmp.eq.s32.totalorder %v15191_v24, %v4522_v45 }
 0x489   :  { %10292 = vmatpush3.bf16.msra.mxu0 %v10291_v8  ;;  %v4531_v8 = vpop.permute.xlu0 %4530 }
 0x48a   :  { %v10293_v59 = vpack.c.bf16 %v4499_v33, %v4498_v16  ;;  %v10297_v43 = vpack.c.bf16 %v4501_v36, %v4500_v28  ;;  %v4528_v29 = vpop.permute.xlu1 %4527  ;;  %vm4568_vm3 = vcmp.eq.s32.totalorder %v15192_v2, %v4531_v8  ;;  %vm4567_vm8 = vcmp.eq.s32.totalorder %v15191_v24, %v4531_v8 }
 0x48b   :  { %vm4566_vm1 = vcmp.eq.s32.totalorder %v15192_v2, %v4528_v29  ;;  %vm4565_vm2 = vcmp.eq.s32.totalorder %v15191_v24, %v4528_v29 }
 0x48c   :  { %10294 = vmatprep.subr.bf16.mxu0 %v10293_v59 }
 0x48d   :  { %10296 = vmatpush3.bf16.msra.mxu0 %v10295_v38  ;;  %v4537_v13 = vpop.permute.xlu0 %4536 }
 0x48e   :  { %10298 = vmatprep.subr.bf16.mxu0 %v10297_v43  ;;  %v4534_v62 = vpop.permute.xlu1 %4533 }
 0x491   :  { %10300 = vmatpush3.bf16.msra.mxu0 %v10299_v51  ;;  %v4543_v49 = vpop.permute.xlu0 %4542 }
 0x492   :  { %v4540_v38 = vpop.permute.xlu1 %4539 }
 0x494   :  { %8302 = vmatmul.mubr.msk.f32.vlgmr.msra.gmra.mrb[64].mxu0 %vm4559_vm11, %v15193_v47  ;;  %vm4570_vm11 = vcmp.eq.s32.totalorder %v15192_v2, %v4534_v62 }
 0x495   :  { %8303 = vmatprep.mubr.msk.f32.mxu0 %vm4562_vm12, %v15193_v47  ;;  %vm4569_vm12 = vcmp.eq.s32.totalorder %v15191_v24, %v4534_v62  ;;  %v4549_v10 = vpop.permute.xlu0 %4548 }
 0x496   :  { %v4546_v51 = vpop.permute.xlu1 %4545 }
 0x498   :  { %8304 = vmatmul.mubr.msk.f32.gmra.mrb[66].mxu0 %vm4561_vm13, %v15193_v47  ;;  %vm4572_vm13 = vcmp.eq.s32.totalorder %v15192_v2, %v4537_v13 }
 0x499   :  { %8305 = vmatprep.mubr.msk.f32.mxu0 %vm4564_vm14, %v15193_v47  ;;  %vm4571_vm14 = vcmp.eq.s32.totalorder %v15191_v24, %v4537_v13  ;;  %v4555_v50 = vpop.permute.xlu0 %4554 }
 0x49a   :  { %v4552_v34 = vpop.permute.xlu1 %4551 }
 0x49c   :  { %8306 = vmatmul.mubr.msk.f32.gmra.mrb[68].mxu0 %vm4563_vm15, %v15193_v47  ;;  %vm4574_vm15 = vcmp.eq.s32.totalorder %v15192_v2, %v4540_v38 }
 0x49d   :  { %8307 = vmatprep.mubr.msk.f32.mxu0 %vm4566_vm1, %v15193_v47  ;;  %vm4573_vm1 = vcmp.eq.s32.totalorder %v15191_v24, %v4540_v38 }
 0x49e   :  { %v4558_v39 = vpop.permute.xlu1 %4557 }
 0x4a0   :  { %8308 = vmatmul.mubr.msk.f32.gmra.mrb[70].mxu0 %vm4565_vm2, %v15193_v47  ;;  %vm4576_vm2 = vcmp.eq.s32.totalorder %v15192_v2, %v4543_v49 }
 0x4a1   :  { %8309 = vmatprep.mubr.msk.f32.mxu0 %vm4568_vm3, %v15193_v47  ;;  %vm4575_vm3 = vcmp.eq.s32.totalorder %v15191_v24, %v4543_v49 }
 0x4a4   :  { %8310 = vmatmul.mubr.msk.f32.gmra.mrb[72].mxu0 %vm4567_vm8, %v15193_v47  ;;  %vm4578_vm8 = vcmp.eq.s32.totalorder %v15192_v2, %v4546_v51 }
 0x4a5   :  { %8311 = vmatprep.mubr.msk.f32.mxu0 %vm4570_vm11, %v15193_v47  ;;  %vm4577_vm11 = vcmp.eq.s32.totalorder %v15191_v24, %v4546_v51 }
 0x4a8   :  { %8312 = vmatmul.mubr.msk.f32.gmra.mrb[74].mxu0 %vm4569_vm12, %v15193_v47  ;;  %vm4580_vm12 = vcmp.eq.s32.totalorder %v15192_v2, %v4549_v10 }
 0x4a9   :  { %8313 = vmatprep.mubr.msk.f32.mxu0 %vm4572_vm13, %v15193_v47  ;;  %vm4579_vm13 = vcmp.eq.s32.totalorder %v15191_v24, %v4549_v10 }
 0x4ac   :  { %8314 = vmatmul.mubr.msk.f32.gmra.mrb[76].mxu0 %vm4571_vm14, %v15193_v47  ;;  %vm4582_vm14 = vcmp.eq.s32.totalorder %v15192_v2, %v4552_v34 }
 0x4ad   :  { %8315 = vmatprep.mubr.msk.f32.mxu0 %vm4574_vm15, %v15193_v47  ;;  %vm4581_vm15 = vcmp.eq.s32.totalorder %v15191_v24, %v4552_v34 }
 0x4b0   :  { %8316 = vmatmul.mubr.msk.f32.gmra.mrb[78].mxu0 %vm4573_vm1, %v15193_v47  ;;  %vm4584_vm1 = vcmp.eq.s32.totalorder %v15192_v2, %v4555_v50 }
 0x4b1   :  { %8317 = vmatprep.mubr.msk.f32.mxu0 %vm4576_vm2, %v15193_v47  ;;  %vm4583_vm2 = vcmp.eq.s32.totalorder %v15191_v24, %v4555_v50 }
 0x4b4   :  { %8318 = vmatmul.mubr.msk.f32.gmra.mrb[80].mxu0 %vm4575_vm3, %v15193_v47  ;;  %vm4586_vm3 = vcmp.eq.s32.totalorder %v15192_v2, %v4558_v39 }
 0x4b5   :  { %8319 = vmatprep.mubr.msk.f32.mxu0 %vm4578_vm8, %v15193_v47  ;;  %vm4585_vm8 = vcmp.eq.s32.totalorder %v15191_v24, %v4558_v39 }
 0x4b8   :  { %8320 = vmatmul.mubr.msk.f32.gmra.mrb[82].mxu0 %vm4577_vm11, %v15193_v47  ;;  %vm4828_vm11 = vcmask 1041408  }
 0x4b9   :  { %8321 = vmatprep.mubr.msk.f32.mxu0 %vm4580_vm12, %v15193_v47  ;;  %vm10934_vm12 = vmmov 1  }
 0x4bc   :  { %8322 = vmatmul.mubr.msk.f32.gmra.mrb[84].mxu0 %vm4579_vm13, %v15193_v47  ;;  %vm13598_vm13 = vmpackc.low %vm4828_vm11, %vm10934_vm12  ;;  %vm7882_vm11 = vcmask 125952  }
 0x4bd   :  { %8323 = vmatprep.mubr.msk.f32.mxu0 %vm4582_vm14, %v15193_v47  ;;  %10303 = vmatprep.subr.msk.bf16.mxu0 %vm13598_vm13, %v10301_v21  ;;  %vm4785_vm14 = vcmask 80896  }
 0x4be   :  { %10306 = vmatpush3.bf16.msk.msra.mxu0 %vm13598_vm13, %v10301_v21 }
 0x4bf   :  { %10309 = vmatprep.subr.msk.bf16.mxu0 %vm13598_vm13, %v10307_v52 }
 0x4c0   :  { %8324 = vmatmul.mubr.msk.f32.gmra.mrb[86].mxu0 %vm4581_vm15, %v15193_v47 }
 0x4c1   :  { %8325 = vmatprep.mubr.msk.f32.mxu0 %vm4584_vm1, %v15193_v47 }
 0x4c4   :  { %8326 = vmatmul.mubr.msk.f32.gmra.mrb[88].mxu0 %vm4583_vm2, %v15193_v47 }
 0x4c5   :  { %8327 = vmatprep.mubr.msk.f32.mxu0 %vm4586_vm3, %v15193_v47 }
 0x4c8   :  { %8328 = vmatmul.mubr.msk.f32.gmra.mrb[90].mxu0 %vm4585_vm8, %v15193_v47  ;;  %vm7579_vm8 = vcmask 130048  }
 0x567   :  { %v8934_v56 = vpop.f32.mrb[64].mxu0 }
 0x568   :  { %v8935_v3 = vpop.f32.mrb[65].mxu0 }
 0x569   :  { %v13614_v25 = vadd.f32 %v8935_v3, %v8934_v56 }
 0x56b   :  { %v8937_v27 = vpop.f32.mrb[66].mxu0  ;;  %9798 = vmatprep.mubr.msk.f32.mxu0 %vm4785_vm14, %v13614_v25  ;;  %v14737_v31 = vrot.slane %v13614_v25, 1  ;;  %v14736_v0 = vrot.slane %v13614_v25, 2  ;;  %v14735_v63 = vrot.slane %v13614_v25, 3  ;;  %v14734_v11 = vrot.slane %v13614_v25, 4 }
 0x56c   :  { %v8938_v15 = vpop.f32.mrb[67].mxu0  ;;  %v14733_v48 = vrot.slane %v13614_v25, 5  ;;  %v14732_v53 = vrot.slane %v13614_v25, 6  ;;  %v14731_v22 = vrot.slane %v13614_v25, 7 }
 0x56d   :  { %v8939_v5 = vadd.f32 %v8938_v15, %v8937_v27 }
 0x56f   :  { %v8940_v44 = vpop.f32.mrb[68].mxu0  ;;  %9799 = vmatmul.mubr.msk.f32.vlgmr.msra.gmra.mrb[92].mxu0 %vm4785_vm14, %v8939_v5  ;;  %v4968_v18 = vrot.slane %v8939_v5, 1  ;;  %v5192_v46 = vrot.slane %v8939_v5, 2  ;;  %v5416_v40 = vrot.slane %v8939_v5, 3  ;;  %v5640_v4 = vrot.slane %v8939_v5, 4 }
 0x570   :  { %v8941_v14 = vpop.f32.mrb[69].mxu0  ;;  %10312 = vmatpush3.bf16.msk.msra.mxu0 %vm13598_vm13, %v10307_v52  ;;  %v5864_v30 = vrot.slane %v8939_v5, 5  ;;  %v6088_v41 = vrot.slane %v8939_v5, 6  ;;  %v6312_v35 = vrot.slane %v8939_v5, 7 }
 0x571   :  { %v8942_v9 = vadd.f32 %v8941_v14, %v8940_v44  ;;  %v13640_v16 = vsel %vm930_vm0, %v14737_v31, %v4968_v18  ;;  %10315 = vmatprep.subr.msk.bf16.mxu0 %vm13598_vm13, %v13625_v23  ;;  %v13649_v54 = vsel %vm1352_vm4, %v14736_v0, %v5192_v46  ;;  %v13655_v37 = vsel %vm1774_vm5, %v14735_v63, %v5416_v40 }
 0x572   :  { %v13661_v1 = vsel %vm2196_vm6, %v14734_v11, %v5640_v4  ;;  %v13667_v32 = vsel %vm2618_vm7, %v14733_v48, %v5864_v30  ;;  %v13673_v19 = vsel %vm3040_vm9, %v14732_v53, %v6088_v41  ;;  %v13679_v36 = vsel %vm3462_vm10, %v14731_v22, %v6312_v35 }
 0x573   :  { %15196 = vst [vmem:[#allocation42_spill] sm:$0xff] %v13667_v32  ;;  %15197 = vst [vmem:[#allocation51_spill] sm:$0xff] %v13673_v19  ;;  %v8943_v12 = vpop.f32.mrb[70].mxu0  ;;  %9801 = vmatprep.mubr.msk.f32.mxu0 %vm4785_vm14, %v8942_v9  ;;  %v4969_v26 = vrot.slane %v8942_v9, 1  ;;  %v5193_v28 = vrot.slane %v8942_v9, 2  ;;  %v5417_v33 = vrot.slane %v8942_v9, 3 }
 0x574   :  { %15198 = vst [vmem:[#allocation52_spill] sm:$0xff] %v13679_v36  ;;  %v5641_v59 = vrot.slane %v8942_v9, 4  ;;  %v8944_v43 = vpop.f32.mrb[71].mxu0  ;;  %v5865_v45 = vrot.slane %v8942_v9, 5  ;;  %v6089_v20 = vrot.slane %v8942_v9, 6  ;;  %v6313_v2 = vrot.slane %v8942_v9, 7 }
 0x575   :  { %v8945_v47 = vadd.f32 %v8944_v43, %v8943_v12  ;;  %v13684_v57 = vsel %vm930_vm0, %v4968_v18, %v4969_v26  ;;  %v13688_v29 = vsel %vm1352_vm4, %v5192_v46, %v5193_v28  ;;  %v13692_v8 = vsel %vm1774_vm5, %v5416_v40, %v5417_v33 }
 0x576   :  { %v13696_v62 = vsel %vm2196_vm6, %v5640_v4, %v5641_v59  ;;  %v13700_v13 = vsel %vm2618_vm7, %v5864_v30, %v5865_v45  ;;  %v13704_v38 = vsel %vm3040_vm9, %v6088_v41, %v6089_v20  ;;  %v13709_v21 = vsel %vm3462_vm10, %v6312_v35, %v6313_v2 }
 0x577   :  { %15199 = vst [vmem:[#allocation61_spill] sm:$0xff] %v13696_v62  ;;  %15200 = vst [vmem:[#allocation62_spill] sm:$0xff] %v13700_v13  ;;  %v8946_v49 = vpop.f32.mrb[72].mxu0  ;;  %9802 = vmatmul.mubr.msk.f32.gmra.mrb[94].mxu0 %vm4785_vm14, %v8945_v47  ;;  %v4970_v51 = vrot.slane %v8945_v47, 1  ;;  %v5194_v10 = vrot.slane %v8945_v47, 2  ;;  %v5418_v34 = vrot.slane %v8945_v47, 3 }
 0x578   :  { %15201 = vst [vmem:[#allocation71_spill] sm:$0xff] %v13704_v38  ;;  %v5642_v50 = vrot.slane %v8945_v47, 4  ;;  %v8947_v39 = vpop.f32.mrb[73].mxu0  ;;  %v5866_v17 = vrot.slane %v8945_v47, 5  ;;  %v6090_v60 = vrot.slane %v8945_v47, 6  ;;  %15202 = vst [vmem:[#allocation72_spill] sm:$0xff] %v13709_v21 }
 0x579   :  { %v6314_v6 = vrot.slane %v8945_v47, 7  ;;  %v8948_v7 = vadd.f32 %v8947_v39, %v8946_v49  ;;  %v13713_v52 = vsel %vm930_vm0, %v4969_v26, %v4970_v51  ;;  %v13717_v56 = vsel %vm1352_vm4, %v5193_v28, %v5194_v10 }
 0x57a   :  { %v13721_v3 = vsel %vm1774_vm5, %v5417_v33, %v5418_v34  ;;  %v13725_v55 = vsel %vm2196_vm6, %v5641_v59, %v5642_v50  ;;  %v13729_v58 = vsel %vm2618_vm7, %v5865_v45, %v5866_v17  ;;  %v13733_v27 = vsel %vm3040_vm9, %v6089_v20, %v6090_v60 }
 0x57b   :  { %15203 = vst [vmem:[#allocation80_spill] sm:$0xff] %v13725_v55  ;;  %15204 = vst [vmem:[#allocation81_spill] sm:$0xff] %v13729_v58  ;;  %v13737_v15 = vsel %vm3462_vm10, %v6313_v2, %v6314_v6  ;;  %v8949_v5 = vpop.f32.mrb[74].mxu0  ;;  %9804 = vmatprep.mubr.msk.f32.mxu0 %vm4785_vm14, %v8948_v7  ;;  %v4971_v44 = vrot.slane %v8948_v7, 1  ;;  %v5195_v18 = vrot.slane %v8948_v7, 2  ;;  %v5419_v46 = vrot.slane %v8948_v7, 3 }
 0x57c   :  { %15205 = vst [vmem:[#allocation90_spill] sm:$0xff] %v13733_v27  ;;  %15206 = vst [vmem:[#allocation91_spill] sm:$0xff] %v13737_v15  ;;  %v5643_v40 = vrot.slane %v8948_v7, 4  ;;  %v8950_v4 = vpop.f32.mrb[75].mxu0  ;;  %v5867_v14 = vrot.slane %v8948_v7, 5  ;;  %v6091_v30 = vrot.slane %v8948_v7, 6 }
 0x57d   :  { %v6315_v41 = vrot.slane %v8948_v7, 7  ;;  %v8951_v35 = vadd.f32 %v8950_v4, %v8949_v5  ;;  %v13742_v9 = vsel %vm930_vm0, %v4970_v51, %v4971_v44  ;;  %v13746_v12 = vsel %vm1352_vm4, %v5194_v10, %v5195_v18 }
 0x57e   :  { %v13750_v26 = vsel %vm1774_vm5, %v5418_v34, %v5419_v46  ;;  %v13754_v28 = vsel %vm2196_vm6, %v5642_v50, %v5643_v40  ;;  %v13758_v33 = vsel %vm2618_vm7, %v5866_v17, %v5867_v14  ;;  %v13762_v59 = vsel %vm3040_vm9, %v6090_v60, %v6091_v30 }
 0x57f   :  { %15207 = vst [vmem:[#allocation100_spill] sm:$0xff] %v13754_v28  ;;  %15208 = vst [vmem:[#allocation101_spill] sm:$0xff] %v13758_v33  ;;  %v13766_v43 = vsel %vm3462_vm10, %v6314_v6, %v6315_v41  ;;  %v8952_v45 = vpop.f32.mrb[76].mxu0  ;;  %9805 = vmatmul.mubr.msk.f32.gmra.mrb[96].mxu0 %vm4785_vm14, %v8951_v35  ;;  %v4972_v20 = vrot.slane %v8951_v35, 1  ;;  %v5196_v2 = vrot.slane %v8951_v35, 2  ;;  %v5420_v47 = vrot.slane %v8951_v35, 3 }
 0x580   :  { %15209 = vst [vmem:[#allocation109_spill] sm:$0xff] %v13762_v59  ;;  %15210 = vst [vmem:[#allocation110_spill] sm:$0xff] %v13766_v43  ;;  %v5644_v49 = vrot.slane %v8951_v35, 4  ;;  %v8953_v51 = vpop.f32.mrb[77].mxu0  ;;  %v5868_v10 = vrot.slane %v8951_v35, 5  ;;  %v6092_v34 = vrot.slane %v8951_v35, 6 }
 0x581   :  { %v6316_v50 = vrot.slane %v8951_v35, 7  ;;  %v8954_v39 = vadd.f32 %v8953_v51, %v8952_v45  ;;  %v13771_v17 = vsel %vm930_vm0, %v4971_v44, %v4972_v20  ;;  %v13775_v60 = vsel %vm1352_vm4, %v5195_v18, %v5196_v2 }
 0x582   :  { %v13779_v6 = vsel %vm1774_vm5, %v5419_v46, %v5420_v47  ;;  %v13783_v7 = vsel %vm2196_vm6, %v5643_v40, %v5644_v49  ;;  %v13787_v5 = vsel %vm2618_vm7, %v5867_v14, %v5868_v10  ;;  %v13791_v44 = vsel %vm3040_vm9, %v6091_v30, %v6092_v34 }
 0x583   :  { %15211 = vst [vmem:[#allocation119_spill] sm:$0xff] %v13783_v7  ;;  %15212 = vst [vmem:[#allocation120_spill] sm:$0xff] %v13787_v5  ;;  %v13795_v18 = vsel %vm3462_vm10, %v6315_v41, %v6316_v50  ;;  %v8955_v4 = vpop.f32.mrb[78].mxu0  ;;  %9807 = vmatprep.mubr.msk.f32.mxu0 %vm4785_vm14, %v8954_v39  ;;  %v4973_v46 = vrot.slane %v8954_v39, 1  ;;  %v5197_v35 = vrot.slane %v8954_v39, 2  ;;  %v5421_v45 = vrot.slane %v8954_v39, 3 }
 0x584   :  { %15213 = vst [vmem:[#allocation128_spill] sm:$0xff] %v13791_v44  ;;  %15214 = vst [vmem:[#allocation129_spill] sm:$0xff] %v13795_v18  ;;  %v5645_v40 = vrot.slane %v8954_v39, 4  ;;  %v8956_v51 = vpop.f32.mrb[79].mxu0  ;;  %v5869_v22 = vrot.slane %v8954_v39, 5  ;;  %v6093_v53 = vrot.slane %v8954_v39, 6 }
 0x585   :  { %v6317_v14 = vrot.slane %v8954_v39, 7  ;;  %v8957_v48 = vadd.f32 %v8956_v51, %v8955_v4  ;;  %v13800_v30 = vsel %vm930_vm0, %v4972_v20, %v4973_v46  ;;  %v13804_v41 = vsel %vm1352_vm4, %v5196_v2, %v5197_v35 }
 0x586   :  { %v13808_v11 = vsel %vm1774_vm5, %v5420_v47, %v5421_v45  ;;  %v13812_v63 = vsel %vm2196_vm6, %v5644_v49, %v5645_v40  ;;  %v13816_v39 = vsel %vm2618_vm7, %v5868_v10, %v5869_v22  ;;  %v13820_v20 = vsel %vm3040_vm9, %v6092_v34, %v6093_v53 }
 0x587   :  { %15215 = vst [vmem:[#allocation139_spill] sm:$0xff] %v13812_v63  ;;  %15216 = vst [vmem:[#allocation140_spill] sm:$0xff] %v13816_v39  ;;  %v13824_v2 = vsel %vm3462_vm10, %v6316_v50, %v6317_v14  ;;  %v8958_v4 = vpop.f32.mrb[80].mxu0  ;;  %9808 = vmatmul.mubr.msk.f32.gmra.mrb[98].mxu0 %vm4785_vm14, %v8957_v48  ;;  %v4974_v47 = vrot.slane %v8957_v48, 1  ;;  %v5198_v51 = vrot.slane %v8957_v48, 2  ;;  %v5422_v0 = vrot.slane %v8957_v48, 3 }
 0x588   :  { %15217 = vst [vmem:[#allocation145_spill] sm:$0xff] %v13820_v20  ;;  %15218 = vst [vmem:[#allocation146_spill] sm:$0xff] %v13824_v2  ;;  %v5646_v49 = vrot.slane %v8957_v48, 4  ;;  %v8959_v31 = vpop.f32.mrb[81].mxu0  ;;  %v5870_v24 = vrot.slane %v8957_v48, 5  ;;  %v6094_v18 = vrot.slane %v8957_v48, 6 }
 0x589   :  { %v6318_v10 = vrot.slane %v8957_v48, 7  ;;  %v8960_v43 = vadd.f32 %v8959_v31, %v8958_v4  ;;  %v13829_v34 = vsel %vm930_vm0, %v4973_v46, %v4974_v47  ;;  %v13833_v50 = vsel %vm1352_vm4, %v5197_v35, %v5198_v51 }
 0x58a   :  { %v13837_v2 = vsel %vm1774_vm5, %v5421_v45, %v5422_v0  ;;  %v13841_v15 = vsel %vm2196_vm6, %v5645_v40, %v5646_v49  ;;  %v13845_v48 = vsel %vm2618_vm7, %v5869_v22, %v5870_v24  ;;  %v13849_v31 = vsel %vm3040_vm9, %v6093_v53, %v6094_v18 }
 0x58b   :  { %15219 = vst [vmem:[#allocation10_spill] sm:$0xff] %v13841_v15  ;;  %15220 = vst [vmem:[#allocation19_spill] sm:$0xff] %v13845_v48  ;;  %v13853_v46 = vsel %vm3462_vm10, %v6317_v14, %v6318_v10  ;;  %v8961_v35 = vpop.f32.mrb[82].mxu0  ;;  %9810 = vmatprep.mubr.msk.f32.mxu0 %vm4785_vm14, %v8960_v43  ;;  %v4975_v45 = vrot.slane %v8960_v43, 1  ;;  %v5199_v4 = vrot.slane %v8960_v43, 2  ;;  %v5423_v21 = vrot.slane %v8960_v43, 3 }
 0x58c   :  { %15221 = vst [vmem:[#allocation20_spill] sm:$0xff] %v13849_v31  ;;  %15222 = vst [vmem:[#allocation27_spill] sm:$0xff] %v13853_v46  ;;  %v5647_v40 = vrot.slane %v8960_v43, 4  ;;  %v8962_v36 = vpop.f32.mrb[83].mxu0  ;;  %v5871_v20 = vrot.slane %v8960_v43, 5  ;;  %v6095_v44 = vrot.slane %v8960_v43, 6 }
 0x58d   :  { %v6319_v22 = vrot.slane %v8960_v43, 7  ;;  %v8963_v59 = vadd.f32 %v8962_v36, %v8961_v35  ;;  %v13858_v53 = vsel %vm930_vm0, %v4974_v47, %v4975_v45  ;;  %v13862_v14 = vsel %vm1352_vm4, %v5198_v51, %v5199_v4 }
 0x58e   :  { %v13866_v46 = vsel %vm1774_vm5, %v5422_v0, %v5423_v21  ;;  %v13870_v31 = vsel %vm2196_vm6, %v5646_v49, %v5647_v40  ;;  %v13874_v43 = vsel %vm2618_vm7, %v5870_v24, %v5871_v20  ;;  %v13878_v36 = vsel %vm3040_vm9, %v6094_v18, %v6095_v44 }
 0x58f   :  { %15223 = vst [vmem:[#allocation28_spill] sm:$0xff] %v13870_v31  ;;  %15224 = vst [vmem:[#allocation35_spill] sm:$0xff] %v13874_v43  ;;  %v13882_v47 = vsel %vm3462_vm10, %v6318_v10, %v6319_v22  ;;  %v8964_v51 = vpop.f32.mrb[84].mxu0  ;;  %9811 = vmatmul.mubr.msk.f32.gmra.mrb[100].mxu0 %vm4785_vm14, %v8963_v59  ;;  %v4976_v0 = vrot.slane %v8963_v59, 1  ;;  %v5200_v35 = vrot.slane %v8963_v59, 2  ;;  %v5424_v27 = vrot.slane %v8963_v59, 3 }
 0x590   :  { %15225 = vst [vmem:[#allocation36_spill] sm:$0xff] %v13878_v36  ;;  %15226 = vst [vmem:[#allocation43_spill] sm:$0xff] %v13882_v47  ;;  %v5648_v49 = vrot.slane %v8963_v59, 4  ;;  %v8965_v38 = vpop.f32.mrb[85].mxu0  ;;  %v5872_v19 = vrot.slane %v8963_v59, 5  ;;  %v6096_v48 = vrot.slane %v8963_v59, 6 }
 0x591   :  { %v6320_v24 = vrot.slane %v8963_v59, 7  ;;  %v8966_v43 = vadd.f32 %v8965_v38, %v8964_v51  ;;  %v13887_v18 = vsel %vm930_vm0, %v4975_v45, %v4976_v0  ;;  %v13891_v10 = vsel %vm1352_vm4, %v5199_v4, %v5200_v35 }
 0x592   :  { %v13895_v47 = vsel %vm1774_vm5, %v5423_v21, %v5424_v27  ;;  %v13899_v36 = vsel %vm2196_vm6, %v5647_v40, %v5648_v49  ;;  %v13903_v59 = vsel %vm2618_vm7, %v5871_v20, %v5872_v19  ;;  %v13907_v38 = vsel %vm3040_vm9, %v6095_v44, %v6096_v48 }
 0x593   :  { %15227 = vst [vmem:[#allocation44_spill] sm:$0xff] %v13899_v36  ;;  %15228 = vst [vmem:[#allocation53_spill] sm:$0xff] %v13903_v59  ;;  %v8967_v45 = vpop.f32.mrb[86].mxu0  ;;  %9813 = vmatprep.mubr.msk.f32.mxu0 %vm4785_vm14, %v8966_v43  ;;  %v4977_v4 = vrot.slane %v8966_v43, 1  ;;  %v5201_v51 = vrot.slane %v8966_v43, 2  ;;  %v5425_v39 = vrot.slane %v8966_v43, 3  ;;  %v13912_v40 = vsel %vm3462_vm10, %v6319_v22, %v6320_v24 }
 0x594   :  { %15229 = vst [vmem:[#allocation54_spill] sm:$0xff] %v13907_v38  ;;  %v5649_v21 = vrot.slane %v8966_v43, 4  ;;  %v8968_v5 = vpop.f32.mrb[87].mxu0  ;;  %v5873_v33 = vrot.slane %v8966_v43, 5  ;;  %v6097_v58 = vrot.slane %v8966_v43, 6  ;;  %15230 = vst [vmem:[#allocation63_spill] sm:$0xff] %v13912_v40 }
 0x595   :  { %v6321_v20 = vrot.slane %v8966_v43, 7  ;;  %v8969_v59 = vadd.f32 %v8968_v5, %v8967_v45  ;;  %v13916_v44 = vsel %vm930_vm0, %v4976_v0, %v4977_v4  ;;  %v13920_v38 = vsel %vm1352_vm4, %v5200_v35, %v5201_v51 }
 0x596   :  { %v13924_v13 = vsel %vm1774_vm5, %v5424_v27, %v5425_v39  ;;  %v13928_v32 = vsel %vm2196_vm6, %v5648_v49, %v5649_v21  ;;  %v13932_v22 = vsel %vm2618_vm7, %v5872_v19, %v5873_v33  ;;  %v13936_v5 = vsel %vm3040_vm9, %v6096_v48, %v6097_v58 }
 0x597   :  { %15231 = vst [vmem:[#allocation64_spill] sm:$0xff] %v13928_v32  ;;  %15232 = vst [vmem:[#allocation73_spill] sm:$0xff] %v13932_v22  ;;  %v13940_v43 = vsel %vm3462_vm10, %v6320_v24, %v6321_v20  ;;  %v8970_v0 = vpop.f32.mrb[88].mxu0  ;;  %9814 = vmatmul.mubr.msk.f32.gmra.mrb[102].mxu0 %vm4785_vm14, %v8969_v59  ;;  %v4978_v27 = vrot.slane %v8969_v59, 1  ;;  %v5202_v35 = vrot.slane %v8969_v59, 2  ;;  %v5426_v45 = vrot.slane %v8969_v59, 3 }
 0x598   :  { %15233 = vst [vmem:[#allocation74_spill] sm:$0xff] %v13936_v5  ;;  %15234 = vst [vmem:[#allocation82_spill] sm:$0xff] %v13940_v43  ;;  %v5650_v49 = vrot.slane %v8969_v59, 4  ;;  %v8971_v40 = vpop.f32.mrb[89].mxu0  ;;  %v5874_v32 = vrot.slane %v8969_v59, 5  ;;  %v6098_v36 = vrot.slane %v8969_v59, 6 }
 0x599   :  { %v6322_v19 = vrot.slane %v8969_v59, 7  ;;  %v8972_v22 = vadd.f32 %v8971_v40, %v8970_v0  ;;  %v4983_v48 = vsel %vm930_vm0, %v4977_v4, %v4978_v27  ;;  %v13947_v5 = vsel %vm1352_vm4, %v5201_v51, %v5202_v35 }
 0x59a   :  { %v13951_v24 = vsel %vm1774_vm5, %v5425_v39, %v5426_v45  ;;  %v13955_v43 = vsel %vm2196_vm6, %v5649_v21, %v5650_v49  ;;  %v13959_v31 = vsel %vm2618_vm7, %v5873_v33, %v5874_v32  ;;  %v13963_v59 = vsel %vm3040_vm9, %v6097_v58, %v6098_v36 }
 0x59b   :  { %15235 = vst [vmem:[#allocation83_spill] sm:$0xff] %v13955_v43  ;;  %15236 = vst [vmem:[#allocation92_spill] sm:$0xff] %v13959_v31  ;;  %v13967_v4 = vsel %vm3462_vm10, %v6321_v20, %v6322_v19  ;;  %v8973_v51 = vpop.f32.mrb[90].mxu0  ;;  %9816 = vmatprep.mubr.msk.f32.mxu0 %vm4785_vm14, %v8972_v22  ;;  %v4979_v39 = vrot.slane %v8972_v22, 1  ;;  %v5203_v40 = vrot.slane %v8972_v22, 2  ;;  %v5427_v0 = vrot.slane %v8972_v22, 3 }
 0x59c   :  { %15237 = vst [vmem:[#allocation93_spill] sm:$0xff] %v13963_v59  ;;  %15238 = vst [vmem:[#allocation102_spill] sm:$0xff] %v13967_v4  ;;  %v5651_v21 = vrot.slane %v8972_v22, 4  ;;  %v8974_v43 = vpop.f32.mrb[91].mxu0  ;;  %v5875_v15 = vrot.slane %v8972_v22, 5  ;;  %v6099_v63 = vrot.slane %v8972_v22, 6 }
 0x59d   :  { %v6323_v33 = vrot.slane %v8972_v22, 7  ;;  %v8975_v31 = vadd.f32 %v8974_v43, %v8973_v51  ;;  %v4982_v58 = vsel %vm930_vm0, %v4978_v27, %v4979_v39  ;;  %v13974_v59 = vsel %vm1352_vm4, %v5202_v35, %v5203_v40  ;;  %v5443_v20 = vld [vmem:[%s14650_s1 + $0x190] sm:$0xff]  ;;  %v5444_v4 = vld [vmem:[%s14650_s1 + $0x198] sm:$0x3] }
 0x59e   :  { %v13984_v7 = vsel %vm1774_vm5, %v5426_v45, %v5427_v0  ;;  %v13988_v22 = vsel %vm2196_vm6, %v5650_v49, %v5651_v21  ;;  %v13992_v43 = vsel %vm2618_vm7, %v5874_v32, %v5875_v15  ;;  %v13996_v27 = vsel %vm3040_vm9, %v6098_v36, %v6099_v63 }
 0x59f   :  { %15239 = vst [vmem:[#allocation111_spill] sm:$0xff] %v13988_v22  ;;  %15240 = vst [vmem:[#allocation112_spill] sm:$0xff] %v13992_v43  ;;  %v14000_v35 = vsel %vm3462_vm10, %v6322_v19, %v6323_v33  ;;  %9817 = vmatmul.mubr.msk.f32.gmra.mrb[104].mxu0 %vm4785_vm14, %v8975_v31  ;;  %v4980_v45 = vrot.slane %v8975_v31, 1  ;;  %v5204_v51 = vrot.slane %v8975_v31, 2  ;;  %v5428_v28 = vrot.slane %v8975_v31, 3 }
 0x5a0   :  { %15241 = vst [vmem:[#allocation113_spill] sm:$0xff] %v13996_v27  ;;  %15242 = vst [vmem:[#allocation121_spill] sm:$0xff] %v14000_v35  ;;  %v5652_v55 = vrot.slane %v8975_v31, 4  ;;  %9823 = vmatprep.mubr.msk.f32.mxu0 %vm4785_vm14, %v13640_v16  ;;  %v10319_v49 = vpack.c.bf16 %v5444_v4, %v5443_v20  ;;  %v5876_v32 = vrot.slane %v8975_v31, 5  ;;  %v6100_v43 = vrot.slane %v8975_v31, 6 }
 0x5a1   :  { %v6324_v22 = vrot.slane %v8975_v31, 7  ;;  %v4981_v36 = vsel %vm930_vm0, %v4979_v39, %v4980_v45  ;;  %v15243_v27 = vrot.slane %v13614_v25, 1  ;;  %v5205_v35 = vsel %vm1352_vm4, %v5203_v40, %v5204_v51 }
 0x5a2   :  { %v15244_v62 = vrot.slane %v13614_v25, 2  ;;  %v5429_v4 = vsel %vm1774_vm5, %v5427_v0, %v5428_v28  ;;  %v15245_v31 = vrot.slane %v13614_v25, 3  ;;  %v14027_v20 = vsel %vm2196_vm6, %v5651_v21, %v5652_v55 }
 0x5a3   :  { %v4994_v19 = vsel %vm930_vm0, %v4980_v45, %v15243_v27  ;;  %v15246_v40 = vrot.slane %v13614_v25, 4  ;;  %9824 = vmatmul.mubr.msk.f32.vlgmr.msra.gmra.mrb[92].mxu0 %vm4785_vm14, %v13684_v57  ;;  %v14049_v21 = vsel %vm3040_vm9, %v6099_v63, %v6100_v43  ;;  %v14064_v57 = vsel %vm3462_vm10, %v6323_v33, %v6324_v22  ;;  %v15274_v33 = vld [vmem:[#allocation71_spill] sm:$0xff] }
 0x5a4   :  { %v5218_v16 = vsel %vm1352_vm4, %v5204_v51, %v15244_v62  ;;  %v14023_v39 = vsel %vm1774_vm5, %v5428_v28, %v15245_v31  ;;  %v14039_v62 = vsel %vm2618_vm7, %v5875_v15, %v5876_v32  ;;  %v15247_v28 = vrot.slane %v13614_v25, 5  ;;  %9826 = vmatprep.mubr.msk.f32.mxu0 %vm4785_vm14, %v13713_v52  ;;  %10318 = vmatpush3.bf16.msk.msra.mxu0 %vm13598_vm13, %v13625_v23  ;;  %v5668_v23 = vld [vmem:[%s14650_s1 + $0x1a8] sm:$0x3]  ;;  %v15279_v51 = vld [vmem:[#allocation20_spill] sm:$0xff] }
 0x5a5   :  { %v14033_v27 = vsel %vm2196_vm6, %v5652_v55, %v15246_v40  ;;  %v15248_v55 = vrot.slane %v13614_v25, 6  ;;  %v15249_v63 = vrot.slane %v13614_v25, 7  ;;  %10321 = vmatprep.subr.msk.bf16.mxu0 %vm13598_vm13, %v10319_v49  ;;  %v5667_v25 = vld [vmem:[%s14650_s1 + $0x1a0] sm:$0xff]  ;;  %v15286_v31 = vld [vmem:[#allocation72_spill] sm:$0xff]  ;;  %v15289_v40 = vld [vmem:[#allocation129_spill] sm:$0xff] }
 0x5a6   :  { %v14045_v0 = vsel %vm2618_vm7, %v5876_v32, %v15247_v28  ;;  %v10325_v52 = vpack.c.bf16 %v5668_v23, %v5667_v25  ;;  %v15281_v32 = vld [vmem:[#allocation54_spill] sm:$0xff]  ;;  %v15292_v28 = vld [vmem:[#allocation43_spill] sm:$0xff]  ;;  %vm10936_vm7 = vmmov 0   ;;  %v15297_v25 = vmov 0.0  }
 0x5a7   :  { %v14055_v45 = vsel %vm3040_vm9, %v6100_v43, %v15248_v55  ;;  %v14070_v15 = vsel %vm3462_vm10, %v6324_v22, %v15249_v63  ;;  %9827 = vmatmul.mubr.msk.f32.gmra.mrb[94].mxu0 %vm4785_vm14, %v13742_v9  ;;  %v15252_v9 = vld [vmem:[#allocation100_spill] sm:$0xff]  ;;  %v15276_v22 = vld [vmem:[#allocation109_spill] sm:$0xff]  ;;  %v15295_v55 = vld [vmem:[#allocation102_spill] sm:$0xff]  ;;  %v10935_v63 = vmov 0.0|0.0   ;;  %vm6626_vm10 = vcmask 916480  }
 0x5a8   :  { %9829 = vmatprep.mubr.msk.f32.mxu0 %vm4785_vm14, %v13771_v17  ;;  %v15256_v17 = vld [vmem:[#allocation28_spill] sm:$0xff]  ;;  %v14305_v23 = vld [vmem:[%s14650_s1 + $0x1e0] ss:$0 sm:$0xff] }
 0x5a9   :  { %v15277_v43 = vld [vmem:[#allocation128_spill] sm:$0xff] }
 0x5ab   :  { %9830 = vmatmul.mubr.msk.f32.gmra.mrb[96].mxu0 %vm4785_vm14, %v13800_v30  ;;  %v15260_v30 = vld [vmem:[#allocation111_spill] sm:$0xff] }
 0x5ac   :  { %9832 = vmatprep.mubr.msk.f32.mxu0 %vm4785_vm14, %v13829_v34  ;;  %v15261_v34 = vld [vmem:[#allocation42_spill] sm:$0xff] }
 0x5af   :  { %9833 = vmatmul.mubr.msk.f32.gmra.mrb[98].mxu0 %vm4785_vm14, %v13858_v53  ;;  %v15263_v53 = vld [vmem:[#allocation81_spill] sm:$0xff] }
 0x5b0   :  { %9835 = vmatprep.mubr.msk.f32.mxu0 %vm4785_vm14, %v13887_v18  ;;  %v15266_v18 = vld [vmem:[#allocation140_spill] sm:$0xff] }
 0x5b3   :  { %9836 = vmatmul.mubr.msk.f32.gmra.mrb[100].mxu0 %vm4785_vm14, %v13916_v44  ;;  %v15269_v44 = vld [vmem:[#allocation53_spill] sm:$0xff] }
 0x5b4   :  { %9838 = vmatprep.mubr.msk.f32.mxu0 %vm4785_vm14, %v4983_v48  ;;  %v15271_v48 = vld [vmem:[#allocation92_spill] sm:$0xff] }
 0x5b7   :  { %9839 = vmatmul.mubr.msk.f32.gmra.mrb[102].mxu0 %vm4785_vm14, %v4982_v58  ;;  %v15275_v58 = vld [vmem:[#allocation90_spill] sm:$0xff] }
 0x5b8   :  { %9841 = vmatprep.mubr.msk.f32.mxu0 %vm4785_vm14, %v4981_v36  ;;  %v15282_v36 = vld [vmem:[#allocation74_spill] sm:$0xff] }
 0x5bb   :  { %9842 = vmatmul.mubr.msk.f32.gmra.mrb[104].mxu0 %vm4785_vm14, %v4994_v19  ;;  %v15283_v19 = vld [vmem:[#allocation93_spill] sm:$0xff] }
 0x5bc   :  { %9848 = vmatprep.mubr.msk.f32.mxu0 %vm4785_vm14, %v13649_v54  ;;  %v5891_v54 = vld [vmem:[%s14650_s1 + $0x1b0] sm:$0xff] }
 0x5bf   :  { %9849 = vmatmul.mubr.msk.f32.vlgmr.msra.gmra.mrb[92].mxu0 %vm4785_vm14, %v13688_v29  ;;  %v5892_v29 = vld [vmem:[%s14650_s1 + $0x1b8] sm:$0x3] }
 0x5c0   :  { %9851 = vmatprep.mubr.msk.f32.mxu0 %vm4785_vm14, %v13717_v56  ;;  %10324 = vmatpush3.bf16.msk.msra.mxu0 %vm13598_vm13, %v10319_v49  ;;  %v10331_v56 = vpack.c.bf16 %v5892_v29, %v5891_v54  ;;  %v15280_v49 = vld [vmem:[#allocation36_spill] sm:$0xff] }
 0x5c1   :  { %10327 = vmatprep.subr.msk.bf16.mxu0 %vm13598_vm13, %v10325_v52 }
 0x5c3   :  { %9852 = vmatmul.mubr.msk.f32.gmra.mrb[94].mxu0 %vm4785_vm14, %v13746_v12  ;;  %v15253_v12 = vld [vmem:[#allocation119_spill] sm:$0xff] }
 0x5c4   :  { %9854 = vmatprep.mubr.msk.f32.mxu0 %vm4785_vm14, %v13775_v60  ;;  %v15257_v60 = vld [vmem:[#allocation44_spill] sm:$0xff] }
 0x5c7   :  { %9855 = vmatmul.mubr.msk.f32.gmra.mrb[96].mxu0 %vm4785_vm14, %v13804_v41  ;;  %v6339_v41 = vld [vmem:[%s14650_s1 + $0x1d0] sm:$0xff] }
 0x5c8   :  { %9857 = vmatprep.mubr.msk.f32.mxu0 %vm4785_vm14, %v13833_v50 }
 0x5cb   :  { %9858 = vmatmul.mubr.msk.f32.gmra.mrb[98].mxu0 %vm4785_vm14, %v13862_v14  ;;  %v15264_v14 = vld [vmem:[#allocation101_spill] sm:$0xff] }
 0x5cc   :  { %9860 = vmatprep.mubr.msk.f32.mxu0 %vm4785_vm14, %v13891_v10  ;;  %v15267_v10 = vld [vmem:[#allocation19_spill] sm:$0xff] }
 0x5cf   :  { %9861 = vmatmul.mubr.msk.f32.gmra.mrb[100].mxu0 %vm4785_vm14, %v13920_v38  ;;  %v15268_v38 = vld [vmem:[#allocation35_spill] sm:$0xff] }
 0x5d0   :  { %9863 = vmatprep.mubr.msk.f32.mxu0 %vm4785_vm14, %v13947_v5  ;;  %v15270_v5 = vld [vmem:[#allocation73_spill] sm:$0xff] }
 0x5d3   :  { %9864 = vmatmul.mubr.msk.f32.gmra.mrb[102].mxu0 %vm4785_vm14, %v13974_v59  ;;  %v15273_v59 = vld [vmem:[#allocation51_spill] sm:$0xff] }
 0x5d4   :  { %9866 = vmatprep.mubr.msk.f32.mxu0 %vm4785_vm14, %v5205_v35  ;;  %v15278_v35 = vld [vmem:[#allocation145_spill] sm:$0xff] }
 0x5d7   :  { %9867 = vmatmul.mubr.msk.f32.gmra.mrb[104].mxu0 %vm4785_vm14, %v5218_v16  ;;  %v15284_v16 = vld [vmem:[#allocation113_spill] sm:$0xff] }
 0x5d8   :  { %9873 = vmatprep.mubr.msk.f32.mxu0 %vm4785_vm14, %v13655_v37  ;;  %v6116_v37 = vld [vmem:[%s14650_s1 + $0x1c8] sm:$0x3] }
 0x5db   :  { %9874 = vmatmul.mubr.msk.f32.vlgmr.msra.gmra.mrb[92].mxu0 %vm4785_vm14, %v13692_v8 }
 0x5dc   :  { %9876 = vmatprep.mubr.msk.f32.mxu0 %vm4785_vm14, %v13721_v3  ;;  %10330 = vmatpush3.bf16.msk.msra.mxu0 %vm13598_vm13, %v10325_v52  ;;  %v15251_v3 = vld [vmem:[#allocation80_spill] sm:$0xff] }
 0x5dd   :  { %10333 = vmatprep.subr.msk.bf16.mxu0 %vm13598_vm13, %v10331_v56 }
 0x5df   :  { %9877 = vmatmul.mubr.msk.f32.gmra.mrb[94].mxu0 %vm4785_vm14, %v13750_v26  ;;  %v15255_v26 = vld [vmem:[#allocation10_spill] sm:$0xff] }
 0x5e0   :  { %9879 = vmatprep.mubr.msk.f32.mxu0 %vm4785_vm14, %v13779_v6  ;;  %v15258_v6 = vld [vmem:[#allocation64_spill] sm:$0xff] }
 0x5e3   :  { %9880 = vmatmul.mubr.msk.f32.gmra.mrb[96].mxu0 %vm4785_vm14, %v13808_v11  ;;  %v6115_v11 = vld [vmem:[%s14650_s1 + $0x1c0] sm:$0xff] }
 0x5e4   :  { %9882 = vmatprep.mubr.msk.f32.mxu0 %vm4785_vm14, %v13837_v2  ;;  %v10337_v8 = vpack.c.bf16 %v6116_v37, %v6115_v11  ;;  %v6340_v2 = vld [vmem:[%s14650_s1 + $0x1d8] sm:$0x3] }
 0x5e5   :  { %v10343_v50 = vpack.c.bf16 %v6340_v2, %v6339_v41 }
 0x5e7   :  { %9883 = vmatmul.mubr.msk.f32.gmra.mrb[98].mxu0 %vm4785_vm14, %v13866_v46  ;;  %v15262_v46 = vld [vmem:[#allocation62_spill] sm:$0xff] }
 0x5e8   :  { %9885 = vmatprep.mubr.msk.f32.mxu0 %vm4785_vm14, %v13895_v47  ;;  %v15265_v47 = vld [vmem:[#allocation120_spill] sm:$0xff] }
 0x5eb   :  { %9886 = vmatmul.mubr.msk.f32.gmra.mrb[100].mxu0 %vm4785_vm14, %v13924_v13  ;;  %v15250_v13 = vld [vmem:[#allocation61_spill] sm:$0xff] }
 0x5ec   :  { %9888 = vmatprep.mubr.msk.f32.mxu0 %vm4785_vm14, %v13951_v24  ;;  %v15272_v24 = vld [vmem:[#allocation112_spill] sm:$0xff] }
 0x5ef   :  { %9889 = vmatmul.mubr.msk.f32.gmra.mrb[102].mxu0 %vm4785_vm14, %v13984_v7  ;;  %v15259_v7 = vld [vmem:[#allocation83_spill] sm:$0xff] }
 0x5f0   :  { %9891 = vmatprep.mubr.msk.f32.mxu0 %vm4785_vm14, %v5429_v4  ;;  %v15285_v4 = vld [vmem:[#allocation52_spill] sm:$0xff] }
 0x5f3   :  { %9892 = vmatmul.mubr.msk.f32.gmra.mrb[104].mxu0 %vm4785_vm14, %v14023_v39  ;;  %v15287_v39 = vld [vmem:[#allocation91_spill] sm:$0xff] }
 0x5f4   :  { %9898 = vmatprep.mubr.msk.f32.mxu0 %vm4785_vm14, %v13661_v1  ;;  %v15254_v1 = vld [vmem:[#allocation139_spill] sm:$0xff] }
 0x5f7   :  { %9899 = vmatmul.mubr.msk.f32.vlgmr.msra.gmra.mrb[92].mxu0 %vm4785_vm14, %v15250_v13 }
 0x5f8   :  { %9901 = vmatprep.mubr.msk.f32.mxu0 %vm4785_vm14, %v15251_v3  ;;  %10336 = vmatpush3.bf16.msk.msra.mxu0 %vm13598_vm13, %v10331_v56 }
 0x5f9   :  { %10339 = vmatprep.subr.msk.bf16.mxu0 %vm13598_vm13, %v10337_v8 }
 0x5fb   :  { %9902 = vmatmul.mubr.msk.f32.gmra.mrb[94].mxu0 %vm4785_vm14, %v15252_v9 }
 0x5fc   :  { %9904 = vmatprep.mubr.msk.f32.mxu0 %vm4785_vm14, %v15253_v12 }
 0x5ff   :  { %9905 = vmatmul.mubr.msk.f32.gmra.mrb[96].mxu0 %vm4785_vm14, %v15254_v1 }
 0x600   :  { %9907 = vmatprep.mubr.msk.f32.mxu0 %vm4785_vm14, %v15255_v26 }
 0x603   :  { %9908 = vmatmul.mubr.msk.f32.gmra.mrb[98].mxu0 %vm4785_vm14, %v15256_v17 }
 0x604   :  { %9910 = vmatprep.mubr.msk.f32.mxu0 %vm4785_vm14, %v15257_v60 }
 0x607   :  { %9911 = vmatmul.mubr.msk.f32.gmra.mrb[100].mxu0 %vm4785_vm14, %v15258_v6 }
 0x608   :  { %9913 = vmatprep.mubr.msk.f32.mxu0 %vm4785_vm14, %v15259_v7 }
 0x60b   :  { %9914 = vmatmul.mubr.msk.f32.gmra.mrb[102].mxu0 %vm4785_vm14, %v15260_v30 }
 0x60c   :  { %9916 = vmatprep.mubr.msk.f32.mxu0 %vm4785_vm14, %v14027_v20  ;;  %v15288_v20 = vld [vmem:[#allocation110_spill] sm:$0xff] }
 0x60f   :  { %9917 = vmatmul.mubr.msk.f32.gmra.mrb[104].mxu0 %vm4785_vm14, %v14033_v27  ;;  %v15290_v27 = vld [vmem:[#allocation146_spill] sm:$0xff] }
 0x610   :  { %9923 = vmatprep.mubr.msk.f32.mxu0 %vm4785_vm14, %v15261_v34 }
 0x613   :  { %9924 = vmatmul.mubr.msk.f32.vlgmr.msra.gmra.mrb[92].mxu0 %vm4785_vm14, %v15262_v46 }
 0x614   :  { %9926 = vmatprep.mubr.msk.f32.mxu0 %vm4785_vm14, %v15263_v53  ;;  %10342 = vmatpush3.bf16.msk.msra.mxu0 %vm13598_vm13, %v10337_v8 }
 0x615   :  { %10345 = vmatprep.subr.msk.bf16.mxu0 %vm13598_vm13, %v10343_v50 }
 0x617   :  { %9927 = vmatmul.mubr.msk.f32.gmra.mrb[94].mxu0 %vm4785_vm14, %v15264_v14 }
 0x618   :  { %9929 = vmatprep.mubr.msk.f32.mxu0 %vm4785_vm14, %v15265_v47 }
 0x61b   :  { %9930 = vmatmul.mubr.msk.f32.gmra.mrb[96].mxu0 %vm4785_vm14, %v15266_v18 }
 0x61c   :  { %9932 = vmatprep.mubr.msk.f32.mxu0 %vm4785_vm14, %v15267_v10 }
 0x61f   :  { %9933 = vmatmul.mubr.msk.f32.gmra.mrb[98].mxu0 %vm4785_vm14, %v15268_v38 }
 0x620   :  { %9935 = vmatprep.mubr.msk.f32.mxu0 %vm4785_vm14, %v15269_v44 }
 0x623   :  { %9936 = vmatmul.mubr.msk.f32.gmra.mrb[100].mxu0 %vm4785_vm14, %v15270_v5 }
 0x624   :  { %9938 = vmatprep.mubr.msk.f32.mxu0 %vm4785_vm14, %v15271_v48 }
 0x627   :  { %9939 = vmatmul.mubr.msk.f32.gmra.mrb[102].mxu0 %vm4785_vm14, %v15272_v24 }
 0x628   :  { %9941 = vmatprep.mubr.msk.f32.mxu0 %vm4785_vm14, %v14039_v62  ;;  %v15291_v62 = vld [vmem:[#allocation27_spill] sm:$0xff] }
 0x62b   :  { %9942 = vmatmul.mubr.msk.f32.gmra.mrb[104].mxu0 %vm4785_vm14, %v14045_v0  ;;  %v15293_v0 = vld [vmem:[#allocation63_spill] sm:$0xff] }
 0x62c   :  { %9948 = vmatprep.mubr.msk.f32.mxu0 %vm4785_vm14, %v15273_v59 }
 0x62f   :  { %9949 = vmatmul.mubr.msk.f32.vlgmr.msra.gmra.mrb[92].mxu0 %vm4785_vm14, %v15274_v33 }
 0x630   :  { %9951 = vmatprep.mubr.msk.f32.mxu0 %vm4785_vm14, %v15275_v58  ;;  %10348 = vmatpush3.bf16.msk.msra.mxu0 %vm13598_vm13, %v10343_v50 }
 0x631   :  { %10349 = vmatprep.subr.bf16.mxu0 %v10935_v63 }
 0x633   :  { %9952 = vmatmul.mubr.msk.f32.gmra.mrb[94].mxu0 %vm4785_vm14, %v15276_v22 }
 0x634   :  { %9954 = vmatprep.mubr.msk.f32.mxu0 %vm4785_vm14, %v15277_v43 }
 0x637   :  { %9955 = vmatmul.mubr.msk.f32.gmra.mrb[96].mxu0 %vm4785_vm14, %v15278_v35 }
 0x638   :  { %9957 = vmatprep.mubr.msk.f32.mxu0 %vm4785_vm14, %v15279_v51 }
 0x63b   :  { %9958 = vmatmul.mubr.msk.f32.gmra.mrb[98].mxu0 %vm4785_vm14, %v15280_v49 }
 0x63c   :  { %9960 = vmatprep.mubr.msk.f32.mxu0 %vm4785_vm14, %v15281_v32 }
 0x63f   :  { %9961 = vmatmul.mubr.msk.f32.gmra.mrb[100].mxu0 %vm4785_vm14, %v15282_v36 }
 0x640   :  { %9963 = vmatprep.mubr.msk.f32.mxu0 %vm4785_vm14, %v15283_v19 }
 0x643   :  { %9964 = vmatmul.mubr.msk.f32.gmra.mrb[102].mxu0 %vm4785_vm14, %v15284_v16 }
 0x644   :  { %9966 = vmatprep.mubr.msk.f32.mxu0 %vm4785_vm14, %v14049_v21  ;;  %v15294_v21 = vld [vmem:[#allocation82_spill] sm:$0xff] }
 0x647   :  { %9967 = vmatmul.mubr.msk.f32.gmra.mrb[104].mxu0 %vm4785_vm14, %v14055_v45  ;;  %v15296_v45 = vld [vmem:[#allocation121_spill] sm:$0xff] }
 0x648   :  { %9973 = vmatprep.mubr.msk.f32.mxu0 %vm4785_vm14, %v15285_v4 }
 0x64b   :  { %9974 = vmatmul.mubr.msk.f32.vlgmr.msra.gmra.mrb[92].mxu0 %vm4785_vm14, %v15286_v31 }
 0x64c   :  { %9976 = vmatprep.mubr.msk.f32.mxu0 %vm4785_vm14, %v15287_v39 }
 0x64f   :  { %9977 = vmatmul.mubr.msk.f32.gmra.mrb[94].mxu0 %vm4785_vm14, %v15288_v20 }
 0x650   :  { %9979 = vmatprep.mubr.msk.f32.mxu0 %vm4785_vm14, %v15289_v40 }
 0x653   :  { %9980 = vmatmul.mubr.msk.f32.gmra.mrb[96].mxu0 %vm4785_vm14, %v15290_v27 }
 0x654   :  { %9982 = vmatprep.mubr.msk.f32.mxu0 %vm4785_vm14, %v15291_v62 }
 0x657   :  { %9983 = vmatmul.mubr.msk.f32.gmra.mrb[98].mxu0 %vm4785_vm14, %v15292_v28 }
 0x658   :  { %9985 = vmatprep.mubr.msk.f32.mxu0 %vm4785_vm14, %v15293_v0 }
 0x65b   :  { %9986 = vmatmul.mubr.msk.f32.gmra.mrb[100].mxu0 %vm4785_vm14, %v15294_v21 }
 0x65c   :  { %9988 = vmatprep.mubr.msk.f32.mxu0 %vm4785_vm14, %v15295_v55 }
 0x65f   :  { %9989 = vmatmul.mubr.msk.f32.gmra.mrb[102].mxu0 %vm4785_vm14, %v15296_v45 }
 0x660   :  { %9991 = vmatprep.mubr.msk.f32.mxu0 %vm4785_vm14, %v14064_v57 }
 0x663   :  { %9992 = vmatmul.mubr.msk.f32.gmra.mrb[104].mxu0 %vm4785_vm14, %v14070_v15 }
 0x664   :  { %10022 = vmatprep.mubr.msk.f32.mxu0 %vm10936_vm7, %v15297_v25 }
 0x71e   :  { %v9975_v52 = vpop.f32.mrb[92].mxu0 }
 0x71f   :  { %v10473_v54 = vadd.f32 %v9975_v52, %v14305_v23  ;;  %v6452_v29 = vpop.f32.mrb[93].mxu0 }
 0x720   :  { %v10474_v57 = vadd.f32 %v14305_v23, %v6452_v29 }
 0x721   :  { %v6536_v56 = vmax.f32 %v10473_v54, 0.0 }
 0x722   :  { %v6535_v15 = vmax.f32 %v10474_v57, 0.0  ;;  %v9978_v11 = vpop.f32.mrb[94].mxu0 }
 0x723   :  { %v6550_v37 = vrot.slane %v6536_v56, 1  ;;  %v10475_v8 = vadd.f32 %v9978_v11, %v14305_v23  ;;  %v6462_v13 = vpop.f32.mrb[95].mxu0 }
 0x724   :  { %v14310_v3 = vrot.slane %v6535_v15, 1  ;;  %v10476_v9 = vadd.f32 %v14305_v23, %v6462_v13 }
 0x725   :  { %v6538_v12 = vmax.f32 %v10475_v8, 0.0 }
 0x726   :  { %v6575_v1 = vsel %vm930_vm0, %v14310_v3, %v6550_v37  ;;  %v6537_v26 = vmax.f32 %v10476_v9, 0.0  ;;  %v9981_v17 = vpop.f32.mrb[96].mxu0 }
 0x727   :  { %v6577_v60 = vmax.f32 %v6535_v15, %v6575_v1  ;;  %v6552_v6 = vrot.slane %v6538_v12, 1  ;;  %v10477_v7 = vadd.f32 %v9981_v17, %v14305_v23  ;;  %v6472_v30 = vpop.f32.mrb[97].mxu0 }
 0x728   :  { %v6551_v41 = vrot.slane %v6537_v26, 1  ;;  %v10478_v2 = vadd.f32 %v14305_v23, %v6472_v30 }
 0x729   :  { %v6540_v34 = vmax.f32 %v10477_v7, 0.0 }
 0x72a   :  { %v6573_v50 = vsel %vm930_vm0, %v6551_v41, %v6552_v6  ;;  %v6574_v46 = vsel %vm930_vm0, %v6550_v37, %v6551_v41  ;;  %v6539_v53 = vmax.f32 %v10478_v2, 0.0  ;;  %v9984_v14 = vpop.f32.mrb[98].mxu0 }
 0x72b   :  { %v6578_v47 = vmax.f32 %v6536_v56, %v6574_v46  ;;  %v6579_v18 = vmax.f32 %v6537_v26, %v6573_v50  ;;  %v6554_v10 = vrot.slane %v6540_v34, 1  ;;  %v10479_v38 = vadd.f32 %v9984_v14, %v14305_v23  ;;  %v6482_v44 = vpop.f32.mrb[99].mxu0 }
 0x72c   :  { %v6553_v5 = vrot.slane %v6539_v53, 1  ;;  %v10480_v48 = vadd.f32 %v14305_v23, %v6482_v44 }
 0x72d   :  { %v6542_v24 = vmax.f32 %v10479_v38, 0.0  ;;  %v10350_v59 = vpack.c.bf16 %v6578_v47, %v6577_v60 }
 0x72e   :  { %v6571_v33 = vsel %vm930_vm0, %v6553_v5, %v6554_v10  ;;  %v6572_v58 = vsel %vm930_vm0, %v6552_v6, %v6553_v5  ;;  %v6541_v22 = vmax.f32 %v10480_v48, 0.0  ;;  %v9987_v43 = vpop.f32.mrb[100].mxu0  ;;  %v6598_v5 = vpop.permute.xlu0 %6597  ;;  %v6733_v48 = vld [vmem:[%s14650_s1 + $0x1f0] sm:$0x3] }
 0x72f   :  { %v6580_v35 = vmax.f32 %v6538_v12, %v6572_v58  ;;  %v6581_v51 = vmax.f32 %v6539_v53, %v6571_v33  ;;  %v6556_v49 = vrot.slane %v6542_v24, 1  ;;  %v10481_v32 = vadd.f32 %v9987_v43, %v14305_v23  ;;  %v6492_v36 = vpop.f32.mrb[101].mxu0  ;;  %10351 = vmatpush3.bf16.msra.mxu0 %v10350_v59  ;;  %v6601_v59 = vpop.permute.xlu1 %6600 }
 0x730   :  { %v6555_v19 = vrot.slane %v6541_v22, 1  ;;  %v10482_v16 = vadd.f32 %v14305_v23, %v6492_v36  ;;  %10352 = vmatprep.subr.bf16.mxu0 %v10935_v63 }
 0x731   :  { %v6544_v4 = vmax.f32 %v10481_v32, 0.0  ;;  %v10353_v31 = vpack.c.bf16 %v6580_v35, %v6579_v18 }
 0x732   :  { %v6569_v39 = vsel %vm930_vm0, %v6555_v19, %v6556_v49  ;;  %v6570_v20 = vsel %vm930_vm0, %v6554_v10, %v6555_v19  ;;  %v6543_v40 = vmax.f32 %v10482_v16, 0.0  ;;  %v9990_v27 = vpop.f32.mrb[102].mxu0  ;;  %v6857_v19 = vld [vmem:[%s14650_s1 + $0x1f8] sm:$0xff]  ;;  %v6858_v16 = vld [vmem:[%s14650_s1 + $0x200] sm:$0x3] }
 0x733   :  { %v6582_v62 = vmax.f32 %v6540_v34, %v6570_v20  ;;  %v6583_v28 = vmax.f32 %v6541_v22, %v6569_v39  ;;  %v6558_v0 = vrot.slane %v6544_v4, 1  ;;  %v10483_v21 = vadd.f32 %v9990_v27, %v14305_v23  ;;  %v6502_v55 = vpop.f32.mrb[103].mxu0  ;;  %10354 = vmatpush3.bf16.msra.mxu0 %v10353_v31  ;;  %v6604_v22 = vpop.permute.xlu0 %6603 }
 0x734   :  { %v6557_v45 = vrot.slane %v6543_v40, 1  ;;  %v10484_v52 = vadd.f32 %v14305_v23, %v6502_v55  ;;  %10355 = vmatprep.subr.bf16.mxu0 %v10935_v63  ;;  %v6607_v35 = vpop.permute.xlu1 %6606 }
 0x735   :  { %v6546_v54 = vmax.f32 %v10483_v21, 0.0  ;;  %v10356_v29 = vpack.c.bf16 %v6582_v62, %v6581_v51 }
 0x736   :  { %v6567_v57 = vsel %vm930_vm0, %v6557_v45, %v6558_v0  ;;  %v6568_v56 = vsel %vm930_vm0, %v6556_v49, %v6557_v45  ;;  %v6545_v15 = vmax.f32 %v10484_v52, 0.0  ;;  %v9993_v11 = vpop.f32.mrb[104].mxu0 }
 0x737   :  { %v6584_v37 = vmax.f32 %v6542_v24, %v6568_v56  ;;  %v6585_v8 = vmax.f32 %v6543_v40, %v6567_v57  ;;  %v6560_v13 = vrot.slane %v6546_v54, 1  ;;  %v10485_v9 = vadd.f32 %v9993_v11, %v14305_v23  ;;  %v6512_v12 = vpop.f32.mrb[105].mxu0  ;;  %10357 = vmatpush3.bf16.msra.mxu0 %v10356_v29  ;;  %v15298_v24 = vld [vmem:[#allocation2_spill] sm:$0xff]  ;;  %v6610_v49 = vpop.permute.xlu0 %6609 }
 0x738   :  { %v6559_v1 = vrot.slane %v6545_v15, 1  ;;  %v10486_v26 = vadd.f32 %v14305_v23, %v6512_v12  ;;  %10358 = vmatprep.subr.bf16.mxu0 %v10935_v63  ;;  %vm6611_vm9 = vcmp.eq.s32.totalorder %v15298_v24, %v6598_v5  ;;  %vm6612_vm15 = vcmp.eq.s32.totalorder %v15298_v24, %v6601_v59 }
 0x739   :  { %v6548_v17 = vmax.f32 %v10485_v9, 0.0  ;;  %v10359_v60 = vpack.c.bf16 %v6584_v37, %v6583_v28  ;;  %v8450_v58 = vsel %vm6611_vm9, 1.0, %v15297_v25  ;;  %v8451_v43 = vsel %vm6612_vm15, 1.0, %v15297_v25 }
 0x73a   :  { %v6565_v6 = vsel %vm930_vm0, %v6559_v1, %v6560_v13  ;;  %v6566_v7 = vsel %vm930_vm0, %v6558_v0, %v6559_v1  ;;  %v6547_v30 = vmax.f32 %v10486_v26, 0.0  ;;  %vm6613_vm1 = vcmp.eq.s32.totalorder %v15298_v24, %v6604_v22 }
 0x73b   :  { %v6586_v41 = vmax.f32 %v6544_v4, %v6566_v7  ;;  %v6587_v2 = vmax.f32 %v6545_v15, %v6565_v6  ;;  %v6562_v34 = vrot.slane %v6548_v17, 1  ;;  %10360 = vmatpush3.bf16.msra.mxu0 %v10359_v60  ;;  %v8452_v51 = vsel %vm6613_vm1, 1.0, %v15297_v25 }
 0x73c   :  { %v6561_v50 = vrot.slane %v6547_v30, 1  ;;  %10361 = vmatprep.subr.bf16.mxu0 %v10935_v63  ;;  %vm6614_vm2 = vcmp.eq.s32.totalorder %v15298_v24, %v6607_v35  ;;  %vm6615_vm3 = vcmp.eq.s32.totalorder %v15298_v24, %v6610_v49  ;;  %v10375_v4 = vpack.c.bf16 %v6858_v16, %v6857_v19  ;;  %v7107_v49 = vld [vmem:[%s14650_s1 + $0x218] sm:$0xff]  ;;  %v7232_v19 = vld [vmem:[%s14650_s1 + $0x228] sm:$0xff]  ;;  %v7233_v16 = vld [vmem:[%s14650_s1 + $0x230] sm:$0x3] }
 0x73d   :  { %v6576_v23 = vsel %vm930_vm0, %v6562_v34, %v14310_v3  ;;  %v10362_v46 = vpack.c.bf16 %v6586_v41, %v6585_v8  ;;  %v6732_v3 = vld [vmem:[%s14650_s1 + $0x1e8] sm:$0xff]  ;;  %v8453_v32 = vsel %vm6614_vm2, 1.0, %v15297_v25  ;;  %v8454_v36 = vsel %vm6615_vm3, 1.0, %v15297_v25 }
 0x73e   :  { %v6590_v53 = vmax.f32 %v6548_v17, %v6576_v23  ;;  %v6563_v14 = vsel %vm930_vm0, %v6561_v50, %v6562_v34  ;;  %v6564_v47 = vsel %vm930_vm0, %v6560_v13, %v6561_v50  ;;  %v10371_v33 = vpack.c.bf16 %v6733_v48, %v6732_v3  ;;  %v6982_v50 = vld [vmem:[%s14650_s1 + $0x208] sm:$0xff]  ;;  %v6983_v23 = vld [vmem:[%s14650_s1 + $0x210] sm:$0x3] }
 0x73f   :  { %v6588_v18 = vmax.f32 %v6546_v54, %v6564_v47  ;;  %v6589_v10 = vmax.f32 %v6547_v30, %v6563_v14  ;;  %10363 = vmatpush3.bf16.msra.mxu0 %v10362_v46  ;;  %v10379_v3 = vpack.c.bf16 %v6983_v23, %v6982_v50 }
 0x740   :  { %10364 = vmatprep.subr.bf16.mxu0 %v10935_v63 }
 0x741   :  { %v10368_v38 = vpack.c.bf16 %v6590_v53, %v6589_v10  ;;  %v10365_v44 = vpack.c.bf16 %v6588_v18, %v6587_v2 }
 0x743   :  { %10366 = vmatpush3.bf16.msra.mxu0 %v10365_v44 }
 0x744   :  { %10367 = vmatprep.subr.bf16.mxu0 %v10935_v63 }
 0x747   :  { %10369 = vmatpush3.bf16.msra.mxu0 %v10368_v38 }
 0x748   :  { %10370 = vmatprep.subr.bf16.mxu0 %v10935_v63 }
 0x74a   :  { %10023 = vmatmul.mubr.msk.f32.vlgmr.msra.gmra.mrb[106].mxu0 %vm6626_vm10, %v8450_v58 }
 0x74b   :  { %10025 = vmatprep.mubr.msk.f32.mxu0 %vm10936_vm7, %v15297_v25  ;;  %10373 = vmatpush3.bf16.msk.msra.mxu0 %vm13598_vm13, %v10371_v33 }
 0x74c   :  { %10374 = vmatprep.subr.bf16.mxu0 %v10935_v63 }
 0x74e   :  { %10026 = vmatmul.mubr.msk.f32.gmra.mrb[108].mxu0 %vm6626_vm10, %v8451_v43 }
 0x74f   :  { %10028 = vmatprep.mubr.msk.f32.mxu0 %vm10936_vm7, %v15297_v25 }
 0x752   :  { %10029 = vmatmul.mubr.msk.f32.gmra.mrb[110].mxu0 %vm6626_vm10, %v8452_v51 }
 0x753   :  { %10031 = vmatprep.mubr.msk.f32.mxu0 %vm10936_vm7, %v15297_v25 }
 0x756   :  { %10032 = vmatmul.mubr.msk.f32.gmra.mrb[112].mxu0 %vm6626_vm10, %v8453_v32  ;;  %v7108_v32 = vld [vmem:[%s14650_s1 + $0x220] sm:$0x3] }
 0x757   :  { %10034 = vmatprep.mubr.msk.f32.mxu0 %vm10936_vm7, %v15297_v25 }
 0x75a   :  { %10035 = vmatmul.mubr.msk.f32.gmra.mrb[114].mxu0 %vm6626_vm10, %v8454_v36  ;;  %v10383_v36 = vpack.c.bf16 %v7108_v32, %v7107_v49  ;;  %v8497_v49 = vld [vmem:[%s14650_s1 + $0x260] ss:$0 sm:$0xff] }
 0x75b   :  { %10041 = vmatprep.mubr.msk.f32.mxu0 %vm10936_vm7, %v15297_v25 }
 0x81d   :  { %v14400_v31 = vpop.f32.mrb[106].mxu0 }
 0x81e   :  { %v10024_v39 = vpop.f32.mrb[107].mxu0  ;;  %10042 = vmatmul.mubr.msk.f32.vlgmr.msra.gmra.mrb[116].mxu0 %vm4785_vm14, %v14400_v31  ;;  %v6847_v20 = vrot.slane %v14400_v31, 1  ;;  %v6972_v40 = vrot.slane %v14400_v31, 2  ;;  %v7097_v27 = vrot.slane %v14400_v31, 3  ;;  %v7222_v62 = vrot.slane %v14400_v31, 4 }
 0x81f   :  { %10044 = vmatprep.mubr.msk.f32.mxu0 %vm10936_vm7, %v15297_v25  ;;  %10377 = vmatpush3.bf16.msk.msra.mxu0 %vm13598_vm13, %v10375_v4  ;;  %v10387_v4 = vpack.c.bf16 %v7233_v16, %v7232_v19  ;;  %v8460_v31 = vld [vmem:[%s14650_s1 + $0x238] ss:$0 sm:$0xff] }
 0x820   :  { %10378 = vmatprep.subr.bf16.mxu0 %v10935_v63 }
 0x821   :  { %v6713_v28 = vpop.f32.mrb[108].mxu0 }
 0x822   :  { %v6848_v0 = vrot.slane %v6713_v28, 1  ;;  %v6973_v21 = vrot.slane %v6713_v28, 2  ;;  %v7098_v55 = vrot.slane %v6713_v28, 3  ;;  %v7223_v45 = vrot.slane %v6713_v28, 4  ;;  %v10027_v52 = vpop.f32.mrb[109].mxu0  ;;  %10045 = vmatmul.mubr.msk.f32.gmra.mrb[118].mxu0 %vm4785_vm14, %v6713_v28 }
 0x823   :  { %10047 = vmatprep.mubr.msk.f32.mxu0 %vm10936_vm7, %v15297_v25 }
 0x824   :  { %v6855_v54 = vsel %vm930_vm0, %v6847_v20, %v6848_v0  ;;  %v6980_v29 = vsel %vm1352_vm4, %v6972_v40, %v6973_v21  ;;  %v14422_v57 = vsel %vm1774_vm5, %v7097_v27, %v7098_v55  ;;  %v14426_v56 = vsel %vm2196_vm6, %v7222_v62, %v7223_v45 }
 0x825   :  { %v6718_v15 = vpop.f32.mrb[110].mxu0 }
 0x826   :  { %v10030_v11 = vpop.f32.mrb[111].mxu0  ;;  %10048 = vmatmul.mubr.msk.f32.gmra.mrb[120].mxu0 %vm4785_vm14, %v6718_v15  ;;  %v6849_v37 = vrot.slane %v6718_v15, 1  ;;  %v6974_v8 = vrot.slane %v6718_v15, 2  ;;  %v7099_v13 = vrot.slane %v6718_v15, 3  ;;  %v7224_v9 = vrot.slane %v6718_v15, 4 }
 0x827   :  { %10050 = vmatprep.mubr.msk.f32.mxu0 %vm10936_vm7, %v15297_v25 }
 0x828   :  { %v6854_v12 = vsel %vm930_vm0, %v6848_v0, %v6849_v37  ;;  %v6979_v1 = vsel %vm1352_vm4, %v6973_v21, %v6974_v8  ;;  %v14437_v26 = vsel %vm1774_vm5, %v7098_v55, %v7099_v13  ;;  %v14441_v17 = vsel %vm2196_vm6, %v7223_v45, %v7224_v9 }
 0x829   :  { %v6723_v60 = vpop.f32.mrb[112].mxu0 }
 0x82a   :  { %v10033_v6 = vpop.f32.mrb[113].mxu0  ;;  %10051 = vmatmul.mubr.msk.f32.gmra.mrb[122].mxu0 %vm4785_vm14, %v6723_v60  ;;  %v6850_v7 = vrot.slane %v6723_v60, 1  ;;  %v6975_v30 = vrot.slane %v6723_v60, 2  ;;  %v7100_v41 = vrot.slane %v6723_v60, 3  ;;  %v7225_v2 = vrot.slane %v6723_v60, 4 }
 0x82b   :  { %10053 = vmatprep.mubr.msk.f32.mxu0 %vm10936_vm7, %v15297_v25 }
 0x82c   :  { %v6853_v34 = vsel %vm930_vm0, %v6849_v37, %v6850_v7  ;;  %v6978_v46 = vsel %vm1352_vm4, %v6974_v8, %v6975_v30  ;;  %v7103_v53 = vsel %vm1774_vm5, %v7099_v13, %v7100_v41  ;;  %v14460_v14 = vsel %vm2196_vm6, %v7224_v9, %v7225_v2 }
 0x82d   :  { %v6728_v47 = vpop.f32.mrb[114].mxu0 }
 0x82e   :  { %v10036_v18 = vpop.f32.mrb[115].mxu0  ;;  %10054 = vmatmul.mubr.msk.f32.gmra.mrb[124].mxu0 %vm4785_vm14, %v6728_v47  ;;  %v6851_v10 = vrot.slane %v6728_v47, 1  ;;  %v6976_v38 = vrot.slane %v6728_v47, 2  ;;  %v7101_v44 = vrot.slane %v6728_v47, 3  ;;  %v7226_v5 = vrot.slane %v6728_v47, 4 }
 0x82f   :  { %10060 = vmatprep.mubr.msk.f32.mxu0 %vm10936_vm7, %v15297_v25  ;;  %v7478_v18 = vld [vmem:[%s14650_s1 + $0x240] sm:$0xff] }
 0x830   :  { %v6852_v48 = vsel %vm930_vm0, %v6850_v7, %v6851_v10  ;;  %v6856_v59 = vsel %vm930_vm0, %v6851_v10, %v6847_v20  ;;  %v6977_v33 = vsel %vm1352_vm4, %v6975_v30, %v6976_v38  ;;  %v6981_v58 = vsel %vm1352_vm4, %v6976_v38, %v6972_v40  ;;  %v7479_v10 = vld [vmem:[%s14650_s1 + $0x248] sm:$0x3]  ;;  %v7375_v38 = vpop.permute.xlu0 %7374 }
 0x831   :  { %v7102_v22 = vsel %vm1774_vm5, %v7100_v41, %v7101_v44  ;;  %v7106_v43 = vsel %vm1774_vm5, %v7101_v44, %v7097_v27  ;;  %v7227_v35 = vsel %vm2196_vm6, %v7225_v2, %v7226_v5  ;;  %v7231_v51 = vsel %vm2196_vm6, %v7226_v5, %v7222_v62 }
 0x832   :  { %10061 = vmatmul.mubr.msk.f32.vlgmr.msra.gmra.mrb[116].mxu0 %vm4785_vm14, %v6855_v54  ;;  %vm7388_vm5 = vcmask 326656   ;;  %v10397_v42 = vpack.c.bf16 %v7479_v10, %v7478_v18 }
 0x833   :  { %10063 = vmatprep.mubr.msk.f32.mxu0 %vm10936_vm7, %v15297_v25  ;;  %10381 = vmatpush3.bf16.msk.msra.mxu0 %vm13598_vm13, %v10379_v3 }
 0x834   :  { %10382 = vmatprep.subr.bf16.mxu0 %v10935_v63 }
 0x836   :  { %10064 = vmatmul.mubr.msk.f32.gmra.mrb[118].mxu0 %vm4785_vm14, %v6854_v12 }
 0x837   :  { %10066 = vmatprep.mubr.msk.f32.mxu0 %vm10936_vm7, %v15297_v25 }
 0x83a   :  { %10067 = vmatmul.mubr.msk.f32.gmra.mrb[120].mxu0 %vm4785_vm14, %v6853_v34 }
 0x83b   :  { %10069 = vmatprep.mubr.msk.f32.mxu0 %vm10936_vm7, %v15297_v25 }
 0x83e   :  { %10070 = vmatmul.mubr.msk.f32.gmra.mrb[122].mxu0 %vm4785_vm14, %v6852_v48 }
 0x83f   :  { %10072 = vmatprep.mubr.msk.f32.mxu0 %vm10936_vm7, %v15297_v25 }
 0x842   :  { %10073 = vmatmul.mubr.msk.f32.gmra.mrb[124].mxu0 %vm4785_vm14, %v6856_v59 }
 0x843   :  { %10079 = vmatprep.mubr.msk.f32.mxu0 %vm10936_vm7, %v15297_v25 }
 0x846   :  { %10080 = vmatmul.mubr.msk.f32.vlgmr.msra.gmra.mrb[116].mxu0 %vm4785_vm14, %v6980_v29 }
 0x847   :  { %10082 = vmatprep.mubr.msk.f32.mxu0 %vm10936_vm7, %v15297_v25  ;;  %10385 = vmatpush3.bf16.msk.msra.mxu0 %vm13598_vm13, %v10383_v36 }
 0x848   :  { %10386 = vmatprep.subr.bf16.mxu0 %v10935_v63 }
 0x84a   :  { %10083 = vmatmul.mubr.msk.f32.gmra.mrb[118].mxu0 %vm4785_vm14, %v6979_v1 }
 0x84b   :  { %10085 = vmatprep.mubr.msk.f32.mxu0 %vm10936_vm7, %v15297_v25 }
 0x84e   :  { %10086 = vmatmul.mubr.msk.f32.gmra.mrb[120].mxu0 %vm4785_vm14, %v6978_v46 }
 0x84f   :  { %10088 = vmatprep.mubr.msk.f32.mxu0 %vm10936_vm7, %v15297_v25 }
 0x852   :  { %10089 = vmatmul.mubr.msk.f32.gmra.mrb[122].mxu0 %vm4785_vm14, %v6977_v33 }
 0x853   :  { %10091 = vmatprep.mubr.msk.f32.mxu0 %vm10936_vm7, %v15297_v25 }
 0x856   :  { %10092 = vmatmul.mubr.msk.f32.gmra.mrb[124].mxu0 %vm4785_vm14, %v6981_v58 }
 0x857   :  { %10098 = vmatprep.mubr.msk.f32.mxu0 %vm10936_vm7, %v15297_v25 }
 0x85a   :  { %10099 = vmatmul.mubr.msk.f32.vlgmr.msra.gmra.mrb[116].mxu0 %vm4785_vm14, %v14422_v57 }
 0x85b   :  { %10101 = vmatprep.mubr.msk.f32.mxu0 %vm10936_vm7, %v15297_v25  ;;  %10389 = vmatpush3.bf16.msk.msra.mxu0 %vm13598_vm13, %v10387_v4 }
 0x85c   :  { %10390 = vmatprep.subr.bf16.mxu0 %v10935_v63 }
 0x85e   :  { %10102 = vmatmul.mubr.msk.f32.gmra.mrb[118].mxu0 %vm4785_vm14, %v14437_v26 }
 0x85f   :  { %10104 = vmatprep.mubr.msk.f32.mxu0 %vm10936_vm7, %v15297_v25 }
 0x862   :  { %10105 = vmatmul.mubr.msk.f32.gmra.mrb[120].mxu0 %vm4785_vm14, %v7103_v53 }
 0x863   :  { %10107 = vmatprep.mubr.msk.f32.mxu0 %vm10936_vm7, %v15297_v25 }
 0x866   :  { %10108 = vmatmul.mubr.msk.f32.gmra.mrb[122].mxu0 %vm4785_vm14, %v7102_v22 }
 0x867   :  { %10110 = vmatprep.mubr.msk.f32.mxu0 %vm10936_vm7, %v15297_v25 }
 0x86a   :  { %10111 = vmatmul.mubr.msk.f32.gmra.mrb[124].mxu0 %vm4785_vm14, %v7106_v43 }
 0x86b   :  { %10117 = vmatprep.mubr.msk.f32.mxu0 %vm10936_vm7, %v15297_v25 }
 0x86e   :  { %10118 = vmatmul.mubr.msk.f32.vlgmr.msra.gmra.mrb[116].mxu0 %vm4785_vm14, %v14426_v56 }
 0x86f   :  { %10120 = vmatprep.mubr.msk.f32.mxu0 %vm10936_vm7, %v15297_v25 }
 0x872   :  { %10121 = vmatmul.mubr.msk.f32.gmra.mrb[118].mxu0 %vm4785_vm14, %v14441_v17 }
 0x873   :  { %10123 = vmatprep.mubr.msk.f32.mxu0 %vm10936_vm7, %v15297_v25 }
 0x876   :  { %10124 = vmatmul.mubr.msk.f32.gmra.mrb[120].mxu0 %vm4785_vm14, %v14460_v14  ;;  %v7372_v14 = vpop.permute.xlu1 %7371 }
 0x877   :  { %10126 = vmatprep.mubr.msk.f32.mxu0 %vm10936_vm7, %v15297_v25  ;;  %vm7379_vm4 = vcmp.eq.s32.totalorder %v15298_v24, %v7372_v14 }
 0x878   :  { %v8491_v44 = vsel %vm7379_vm4, 1.0, %v15297_v25 }
 0x87a   :  { %10127 = vmatmul.mubr.msk.f32.gmra.mrb[122].mxu0 %vm4785_vm14, %v7227_v35  ;;  %v7378_v5 = vpop.permute.xlu1 %7377 }
 0x87b   :  { %10129 = vmatprep.mubr.msk.f32.mxu0 %vm10936_vm7, %v15297_v25  ;;  %vm7381_vm6 = vcmp.eq.s32.totalorder %v15298_v24, %v7378_v5 }
 0x87c   :  { %v8493_v48 = vsel %vm7381_vm6, 1.0, %v15297_v25 }
 0x87e   :  { %10130 = vmatmul.mubr.msk.f32.gmra.mrb[124].mxu0 %vm4785_vm14, %v7231_v51 }
 0x87f   :  { %10142 = vmatprep.mubr.msk.f32.mxu0 %vm10936_vm7, %v15297_v25 }
 0x941   :  { %v7318_v39 = vpop.f32.mrb[116].mxu0 }
 0x942   :  { %v10487_v20 = vadd.f32 %v8460_v31, %v7318_v39  ;;  %v10119_v40 = vpop.f32.mrb[117].mxu0 }
 0x944   :  { %v7347_v62 = vmax.f32 %v10487_v20, 0.0 }
 0x945   :  { %v7323_v27 = vpop.f32.mrb[118].mxu0 }
 0x946   :  { %v10488_v28 = vadd.f32 %v8460_v31, %v7323_v27  ;;  %v10122_v0 = vpop.f32.mrb[119].mxu0  ;;  %v7352_v45 = vrot.slane %v7347_v62, 1 }
 0x948   :  { %v7348_v21 = vmax.f32 %v10488_v28, 0.0 }
 0x949   :  { %v7328_v55 = vpop.f32.mrb[120].mxu0 }
 0x94a   :  { %v7353_v52 = vrot.slane %v7348_v21, 1  ;;  %v10489_v54 = vadd.f32 %v8460_v31, %v7328_v55  ;;  %v10125_v29 = vpop.f32.mrb[121].mxu0 }
 0x94c   :  { %v7360_v57 = vsel %vm930_vm0, %v7352_v45, %v7353_v52  ;;  %v7349_v56 = vmax.f32 %v10489_v54, 0.0 }
 0x94d   :  { %v7362_v15 = vmax.f32 %v7347_v62, %v7360_v57  ;;  %v7333_v11 = vpop.f32.mrb[122].mxu0 }
 0x94e   :  { %v7354_v37 = vrot.slane %v7349_v56, 1  ;;  %v10490_v8 = vadd.f32 %v8460_v31, %v7333_v11  ;;  %v10128_v13 = vpop.f32.mrb[123].mxu0 }
 0x950   :  { %v7359_v9 = vsel %vm930_vm0, %v7353_v52, %v7354_v37  ;;  %v7350_v12 = vmax.f32 %v10490_v8, 0.0 }
 0x951   :  { %v7363_v1 = vmax.f32 %v7348_v21, %v7359_v9  ;;  %v7338_v26 = vpop.f32.mrb[124].mxu0 }
 0x952   :  { %v7355_v17 = vrot.slane %v7350_v12, 1  ;;  %v10491_v60 = vadd.f32 %v8460_v31, %v7338_v26  ;;  %v10131_v6 = vpop.f32.mrb[125].mxu0 }
 0x953   :  { %v10391_v7 = vpack.c.bf16 %v7363_v1, %v7362_v15 }
 0x954   :  { %v7358_v30 = vsel %vm930_vm0, %v7354_v37, %v7355_v17  ;;  %v7351_v41 = vmax.f32 %v10491_v60, 0.0 }
 0x955   :  { %v7364_v2 = vmax.f32 %v7349_v56, %v7358_v30  ;;  %10392 = vmatpush3.bf16.msra.mxu0 %v10391_v7 }
 0x956   :  { %v7356_v34 = vrot.slane %v7351_v41, 1  ;;  %10393 = vmatprep.subr.bf16.mxu0 %v10935_v63 }
 0x958   :  { %v7357_v50 = vsel %vm930_vm0, %v7355_v17, %v7356_v34  ;;  %v7361_v23 = vsel %vm930_vm0, %v7356_v34, %v7352_v45  ;;  %vm7380_vm0 = vcmp.eq.s32.totalorder %v15298_v24, %v7375_v38  ;;  %v7578_v24 = vld [vmem:[%s14650_s1 + $0x258] sm:$0xff]  ;;  %s10939_s1 = smov 32  }
 0x959   :  { %v7365_v46 = vmax.f32 %v7350_v12, %v7357_v50  ;;  %v7366_v53 = vmax.f32 %v7351_v41, %v7361_v23  ;;  %v8492_v3 = vsel %vm7380_vm0, 1.0, %v15297_v25  ;;  %v10401_v59 = vpack.c.bf16 %v7578_v24, %v7577_v61 }
 0x95b   :  { %v10394_v47 = vpack.c.bf16 %v7365_v46, %v7364_v2 }
 0x95d   :  { %10395 = vmatpush3.bf16.msra.mxu0 %v10394_v47 }
 0x95e   :  { %10140 = vmatprep.subr.mxu0 %v15297_v25 }
 0x961   :  { %10141 = vmatpush3.msra.mxu0 %v7366_v53 }
 0x962   :  { %10143 = vmatmul.mubr.msk.f32.vlgmr.msra.gmra.mrb[126].mxu0 %vm7388_vm5, %v8491_v44  ;;  %10396 = vmatprep.subr.bf16.mxu0 %v10935_v63 }
 0x963   :  { %10145 = vmatprep.mubr.msk.f32.mxu0 %vm10936_vm7, %v15297_v25  ;;  %10399 = vmatpush3.bf16.msk.msra.mxu0 %vm13598_vm13, %v10397_v42 }
 0x964   :  { %10400 = vmatprep.subr.bf16.mxu0 %v10935_v63 }
 0x966   :  { %10146 = vmatmul.mubr.msk.f32.gmra.mrb[128].mxu0 %vm7388_vm5, %v8492_v3 }
 0x967   :  { %10148 = vmatprep.mubr.msk.f32.mxu0 %vm10936_vm7, %v15297_v25 }
 0x96a   :  { %10149 = vmatmul.mubr.msk.f32.gmra.mrb[130].mxu0 %vm7388_vm5, %v8493_v48 }
 0x96b   :  { %10155 = vmatprep.mubr.msk.f32.mxu0 %vm10936_vm7, %v15297_v25 }
 0xa35   :  { %v7464_v33 = vpop.f32.mrb[126].mxu0 }
 0xa36   :  { %v10144_v58 = vpop.f32.mrb[127].mxu0  ;;  %10156 = vmatmul.mubr.msk.f32.vlgmr.msra.gmra.mrb[132].mxu0 %vm4785_vm14, %v7464_v33 }
 0xa37   :  { %10158 = vmatprep.mubr.msk.f32.mxu0 %vm10936_vm7, %v15297_v25  ;;  %10402 = vmatpush3.bf16.msra.mxu0 %v10401_v59 }
 0xa38   :  { %10403 = vmatprep.subr.bf16.mxu0 %v10935_v63 }
 0xa39   :  { %v7469_v22 = vpop.f32.mrb[128].mxu0 }
 0xa3a   :  { %v10147_v43 = vpop.f32.mrb[129].mxu0  ;;  %10159 = vmatmul.mubr.msk.f32.gmra.mrb[134].mxu0 %vm4785_vm14, %v7469_v22 }
 0xa3b   :  { %10161 = vmatprep.mubr.msk.f32.mxu0 %vm10936_vm7, %v15297_v25 }
 0xa3d   :  { %v7474_v35 = vpop.f32.mrb[130].mxu0 }
 0xa3e   :  { %v10150_v51 = vpop.f32.mrb[131].mxu0  ;;  %10162 = vmatmul.mubr.msk.f32.gmra.mrb[136].mxu0 %vm4785_vm14, %v7474_v35 }
 0xa3f   :  { %10168 = vmatprep.mubr.msk.f32.mxu0 %vm10936_vm7, %v15297_v25 }
 0xa42   :  { %10169 = vmatmul.mubr.f32.vlgmr.msra.gmra.mrb[132].mxu0 %v15297_v25 }
 0xa43   :  { %10405 = vmatpush3.bf16.msra.mxu0 %v10401_v59  ;;  %10175 = vmatprep.mubr.msk.f32.mxu0 %vm10936_vm7, %v15297_v25 }
 0xa44   :  { %10406 = vmatprep.subr.bf16.mxu0 %v10935_v63 }
 0xb15   :  { %v7649_v32 = vpop.f32.mrb[132].mxu0 }
 0xb16   :  { %v10492_v36 = vadd.f32 %v8497_v49, %v7649_v32  ;;  %v10170_v19 = vpop.f32.mrb[133].mxu0 }
 0xb18   :  { %10907 = vtanh.f32 %v10492_v36  ;;  %v8502_v4 = vmul.f32 -1.442695, %v10492_v36 }
 0xb1a   :  { %10909 = vpow2.f32 %v8502_v4 }
 0xb22   :  { %v10908_v16 = vpop.eup %10907 }
 0xb23   :  { %7663 = vrot.lane.b32.xlu0 %v10908_v16, %s10937_s19 }
 0xb24   :  { %v10910_v31 = vpop.eup %10909 }
 0xb25   :  { %v7657_v39 = vadd.f32 1.0, %v10910_v31 }
 0xb27   :  { %10911 = vrcp.f32 %v7657_v39 }
 0xb31   :  { %v10912_v20 = vpop.eup %10911 }
 0xb32   :  { %v7661_v27 = vmul.f32 0.0, %v10912_v20 }
 0xb95   :  { %v7664_v40 = vpop.permute.xlu0 %7663 }
 0xb96   :  { %v7666_v63 = vmul.f32 %v10912_v20, %v7664_v40 }
 0xb98   :  { %7668 = vrot.lane.b32.xlu1 %v7666_v63, %s10938_s2 }
 0xc0a   :  { %v7669_v62 = vpop.permute.xlu1 %7668 }
 0xc0b   :  { %v7671_v28 = vadd.f32 %v7669_v62, %v7661_v27 }
 0xc0d   :  { %10913 = vtanh.f32 %v7671_v28 }
 0xc17   :  { %v10914_v0 = vpop.eup %10913 }
 0xc18   :  { %7674 = vrot.lane.b32.xlu0 %v10914_v0, %s10939_s1 }
 0xc8a   :  { %v7675_v21 = vpop.permute.xlu0 %7674 }
 0xc8b   :  { %v7677_v55 = vmul.f32 %v10912_v20, %v7675_v21 }
 0xc8d   :  { %7679 = vrot.lane.b32.xlu1 %v7677_v55, %s10940_s20 }
 0xcff   :  { %v7680_v45 = vpop.permute.xlu1 %7679 }
 0xd00   :  { %10176 = vmatmul.mubr.msk.f32.vlgmr.msra.gmra.mrb[134].mxu0 %vm7579_vm8, %v7680_v45 }
 0xd01   :  { %10408 = vmatpush3.bf16.msra.mxu0 %v10401_v59  ;;  %10182 = vmatprep.mubr.msk.f32.mxu0 %vm10936_vm7, %v15297_v25 }
 0xdd3   :  { %v7749_v52 = vpop.f32.mrb[134].mxu0 }
 0xdd4   :  { %v10493_v54 = vadd.f32 %v8497_v49, %v7749_v52  ;;  %v10177_v29 = vpop.f32.mrb[135].mxu0 }
 0xdd6   :  { %10915 = vtanh.f32 %v10493_v54  ;;  %v8504_v56 = vmul.f32 -1.442695, %v10493_v54 }
 0xdd8   :  { %10917 = vpow2.f32 %v8504_v56 }
 0xde0   :  { %v10916_v57 = vpop.eup %10915 }
 0xde1   :  { %7763 = vrot.lane.b32.xlu0 %v10916_v57, %s10937_s19 }
 0xde2   :  { %v10918_v15 = vpop.eup %10917 }
 0xde3   :  { %v7757_v11 = vadd.f32 1.0, %v10918_v15 }
 0xde5   :  { %10919 = vrcp.f32 %v7757_v11 }
 0xdef   :  { %v10920_v37 = vpop.eup %10919 }
 0xdf0   :  { %v7761_v9 = vmul.f32 %v10920_v37, %v7671_v28 }
 0xe53   :  { %v7764_v8 = vpop.permute.xlu0 %7763 }
 0xe54   :  { %v7766_v13 = vmul.f32 %v10920_v37, %v7764_v8 }
 0xe56   :  { %7768 = vrot.lane.b32.xlu1 %v7766_v13, %s10938_s2 }
 0xec8   :  { %v7769_v12 = vpop.permute.xlu1 %7768 }
 0xec9   :  { %v7771_v25 = vadd.f32 %v7769_v12, %v7761_v9 }
 0xecb   :  { %10921 = vtanh.f32 %v7771_v25 }
 0xed5   :  { %v10922_v1 = vpop.eup %10921 }
 0xed6   :  { %7774 = vrot.lane.b32.xlu0 %v10922_v1, %s10939_s1 }
 0xf48   :  { %v7775_v26 = vpop.permute.xlu0 %7774 }
 0xf49   :  { %v7777_v17 = vmul.f32 %v10920_v37, %v7775_v26 }
 0xf4b   :  { %7779 = vrot.lane.b32.xlu1 %v7777_v17, %s10940_s20 }
 0xfbd   :  { %v7780_v60 = vpop.permute.xlu1 %7779 }
 0xfbe   :  { %10183 = vmatmul.mubr.msk.f32.vlgmr.msra.gmra.mrb[136].mxu0 %vm7579_vm8, %v7780_v60 }
0x1091   :  { %v7849_v6 = vpop.f32.mrb[136].mxu0 }
0x1092   :  { %v10494_v7 = vadd.f32 %v8497_v49, %v7849_v6  ;;  %v10184_v30 = vpop.f32.mrb[137].mxu0 }
0x1094   :  { %10923 = vtanh.f32 %v10494_v7  ;;  %v8506_v2 = vmul.f32 -1.442695, %v10494_v7 }
0x1096   :  { %10925 = vpow2.f32 %v8506_v2 }
0x109e   :  { %v10924_v41 = vpop.eup %10923 }
0x109f   :  { %7863 = vrot.lane.b32.xlu0 %v10924_v41, %s10937_s19 }
0x10a0   :  { %v10926_v34 = vpop.eup %10925 }
0x10a1   :  { %v7857_v50 = vadd.f32 1.0, %v10926_v34 }
0x10a3   :  { %10927 = vrcp.f32 %v7857_v50 }
0x10ad   :  { %v10928_v23 = vpop.eup %10927 }
0x10ae   :  { %v7861_v14 = vmul.f32 %v10928_v23, %v7771_v25 }
0x1111   :  { %v7864_v46 = vpop.permute.xlu0 %7863 }
0x1112   :  { %v7866_v53 = vmul.f32 %v10928_v23, %v7864_v46 }
0x1114   :  { %7868 = vrot.lane.b32.xlu1 %v7866_v53, %s10938_s2 }
0x1186   :  { %v7869_v47 = vpop.permute.xlu1 %7868 }
0x1187   :  { %v7871_v18 = vadd.f32 %v7869_v47, %v7861_v14 }
0x1189   :  { %10929 = vtanh.f32 %v7871_v18 }
0x1193   :  { %v10930_v10 = vpop.eup %10929 }
0x1194   :  { %7874 = vrot.lane.b32.xlu0 %v10930_v10, %s10939_s1 }
0x1206   :  { %v7875_v38 = vpop.permute.xlu0 %7874 }
0x1207   :  { %v7877_v42 = vmul.f32 %v10928_v23, %v7875_v38 }
0x1209   :  { %7879 = vrot.lane.b32.xlu1 %v7877_v42, %s10940_s20 }
0x127b   :  { %v7880_v44 = vpop.permute.xlu1 %7879 }
0x127c   :  { %7883 = vst.msk [vmem:[%s14652_s3] sm:$0xf] %vm7882_vm11, %v7880_v44 }

</bundles_post_ra>
